<compile_context>
chip_gen: v5e
topology: v5e:2x2
jax: 0.10.0
libtpu: 0.0.40
codegen_flags: <defaults>
</compile_context>

<pallas_src>
import functools

import numpy as np

import jax
import jax.numpy as jnp
from jax.experimental import pallas as pl
from jax.experimental.pallas import tpu as pltpu

KSIZE = 3                      # every conv block: 3x3 kernel, padding=0
LANE = 128
CONV_FEATURES = (8, 16, 32)    # block1/2/3 output channels (from the module)


def _round_up(x, m):
    return ((x + m - 1) // m) * m


def _block_geometry(image_shape):
    """Static per-block geometry [(H, W, Cin, Cout), ...] for the 3 conv blocks."""
    cin, h, w = image_shape
    geom = []
    for cout in CONV_FEATURES:
        assert h >= KSIZE + 1 and w >= KSIZE + 1, "input too small for CNNClassifier"
        geom.append((h, w, cin, cout))
        h, w, cin = (h - KSIZE + 1) // 2, (w - KSIZE + 1) // 2, cout
    assert (h, w) == (1, 1), "CNNClassifier's Linear(32, .) expects 1x1 spatial after block3"
    return tuple(geom)


def _conv_block_operands(w, b, w_in, *, kh_stride):
    """Banded matmul operands for one Conv2dBlock, with kh folded into K.

    w: (Cout, Cin, 3, 3) torch layout, b: (Cout,), w_in: block input width.
    kh_stride: row-group stride per kh tap along the contraction axis
      (W*Cin for block1 whose lhs is packed host-side without lane padding,
       LANE=128 for blocks whose lhs groups are the 128-wide activations).

      band[kh*kh_stride + w*Cin+ci, dw*128 + j*Cout+co] = w[co, ci, kh, w-2j-dw]
        if 0 <= w-2j-dw <= 2, else 0;  all padding rows / columns are zero.
    Contracting the folded lhs with `band` yields conv output columns
    (q=2j+dw, co) with the two pool-column parities dw in separate, 128-wide,
    exactly-zero-padded column halves.
    """
    cout, cin, _, _ = w.shape
    wo = w_in - KSIZE + 1
    wp = wo // 2                           # MaxPool floor: odd wo drops last col
    wpc = wp * cout
    assert wpc <= LANE and w_in * cin <= kh_stride

    # Static 0/1 selector: sel[dw, w, j, kw] = 1  iff  w == 2*j + dw + kw.
    sel = np.zeros((2, w_in, wp, KSIZE), np.float32)
    for dw in range(2):
        for j in range(wp):
            for kw in range(KSIZE):
                sel[dw, 2 * j + dw + kw, j, kw] = 1.0
    sel = jnp.asarray(sel)

    wt = jnp.transpose(w, (2, 3, 1, 0))                       # (kh, kw, cin, cout)
    band = jnp.einsum("dwjk,hkcm->hwcdjm", sel, wt)           # (3, W, cin, 2, WP, cout)
    band = band.reshape(KSIZE, w_in * cin, 2, wpc)
    band = jnp.pad(band, ((0, 0), (0, kh_stride - w_in * cin),
                          (0, 0), (0, LANE - wpc)))
    band = band.reshape(KSIZE * kh_stride, 2 * LANE)

    bias = jnp.zeros((1, LANE), jnp.float32).at[0, :wpc].set(jnp.tile(b, wp))
    return band.astype(jnp.bfloat16), bias


def _const_index_map(ndim):
    return lambda i: (0,) * ndim


def _make_kernel(geom, tb):
    """Fused 3x(conv+ReLU+pool) + Linear kernel (closure over static geometry)."""

    def kernel(x_ref, n1, b1, n2, b2, n3, b3, wl_ref, bl_ref, out_ref):
        a = x_ref[...]                                   # block1 lhs, pre-folded, bf16
        for blk, (n_ref, bias_ref) in enumerate(((n1, b1), (n2, b2), (n3, b3))):
            h = geom[blk][0]
            ho = h - KSIZE + 1                           # conv output rows
            hp = ho // 2                                 # pooled rows (floor)
            if blk == 0:
                lhs = a                                  # (ho*tb, 3*W*C) bf16
            else:
                # Fold the 3 kh taps: aligned 128-lane concat of row-shifted slices.
                lhs = jnp.concatenate(
                    [a[kh * tb:(kh + ho) * tb, :] for kh in range(KSIZE)], axis=1)

            # Conv (bias deferred): ONE MXU matmul, f32 accumulation.
            y = jnp.dot(lhs, n_ref[...], preferred_element_type=jnp.float32)

            # 2x2 max-pool over W: max of the two 128-wide column-parity halves
            # (their padding lanes are exact zeros on both sides, so stay zero).
            rw = jnp.maximum(y[:, :LANE], y[:, LANE:])
            # 2x2 max-pool over H: max of adjacent (p=2i, p=2i+1) row blocks.
            pooled = [jnp.maximum(rw[(2 * i) * tb:(2 * i + 1) * tb, :],
                                  rw[(2 * i + 1) * tb:(2 * i + 2) * tb, :])
                      for i in range(hp)]
            pooled = pooled[0] if hp == 1 else jnp.concatenate(pooled, axis=0)
            # Bias + ReLU once, after the max; single bf16 cast for the next MXU op.
            a = jnp.maximum(pooled + bias_ref[...], 0.0).astype(jnp.bfloat16)

        # a: (tb, 128) bf16 (cols >= 32 are exactly zero)  ->  Linear, lane-dense.
        out_ref[...] = (jnp.dot(a, wl_ref[...], preferred_element_type=jnp.float32)
                        + bl_ref[...])

    return kernel


def init_params(key, in_channels, num_classes):
    """PyTorch-style uniform(-1/sqrt(fan_in), 1/sqrt(fan_in)) init, torch layouts."""

    def conv_init(k, cout, cin, ks):
        k1, k2 = jax.random.split(k)
        bound = 1.0 / np.sqrt(cin * ks * ks)
        w = jax.random.uniform(k1, (cout, cin, ks, ks), jnp.float32, -bound, bound)
        bb = jax.random.uniform(k2, (cout,), jnp.float32, -bound, bound)
        return w, bb

    def lin_init(k, out_f, in_f):
        k1, k2 = jax.random.split(k)
        bound = 1.0 / np.sqrt(in_f)
        w = jax.random.uniform(k1, (out_f, in_f), jnp.float32, -bound, bound)
        bb = jax.random.uniform(k2, (out_f,), jnp.float32, -bound, bound)
        return w, bb

    ks = jax.random.split(key, 4)
    return {
        "block1": conv_init(ks[0], CONV_FEATURES[0], in_channels, KSIZE),
        "block2": conv_init(ks[1], CONV_FEATURES[1], CONV_FEATURES[0], KSIZE),
        "block3": conv_init(ks[2], CONV_FEATURES[2], CONV_FEATURES[1], KSIZE),
        "predictor": lin_init(ks[3], num_classes, CONV_FEATURES[2]),
    }


def prepare_params(params, image_shape):
    """One-time conversion of PyTorch-layout params into kernel operands."""
    geom = _block_geometry(image_shape)
    ops = []
    for i, (name, (_, w_in, cin, _)) in enumerate(
            zip(("block1", "block2", "block3"), geom)):
        w, b = params[name]
        kh_stride = w_in * cin if i == 0 else LANE
        band, bias = _conv_block_operands(w, b, w_in, kh_stride=kh_stride)
        ops += [band, bias]

    wl, bl = params["predictor"]
    n_cls = wl.shape[0]
    assert wl.shape == (n_cls, CONV_FEATURES[-1]) and n_cls <= LANE
    wl_pad = jnp.zeros((LANE, LANE), jnp.float32).at[:wl.shape[1], :n_cls].set(wl.T)
    bl_pad = jnp.zeros((1, LANE), jnp.float32).at[0, :n_cls].set(bl)
    ops += [wl_pad.astype(jnp.bfloat16), bl_pad]

    return {"ops": tuple(ops), "num_classes": int(n_cls),
            "image_shape": tuple(image_shape)}


def cnn_classifier_forward(ops, x_nchw, *, num_classes, image_shape, batch_tile=256):
    """x_nchw: (B, C, H, W), same as the PyTorch module.  Returns (B, num_classes)."""
    b, c, h, w = x_nchw.shape
    assert (c, h, w) == tuple(image_shape), (
        "input geometry does not match the geometry baked into prepare_params()")
    geom = _block_geometry((c, h, w))
    assert ops[0].shape[0] == KSIZE * w * c, "prepared ops do not match input geometry"

    # Batch tile: multiple of 16 (bf16 sublane packing); clamp for small batches.
    tb = min(int(batch_tile), _round_up(b, 16))
    tb = max(16, (tb // 16) * 16)
    bp = _round_up(b, tb)
    t = bp // tb

    ho1 = h - KSIZE + 1
    wc = w * c
    kcols = KSIZE * wc

    # NCHW -> (B, H, W*C) in bf16 (the kernel feeds bf16 to the MXU anyway):
    # halves input HBM traffic / DMA / VMEM vs. f32.
    x = jnp.transpose(x_nchw, (0, 2, 3, 1)).astype(jnp.bfloat16).reshape(b, h, wc)
    if bp != b:
        x = jnp.pad(x, ((0, bp - b), (0, 0), (0, 0)))
    # Fold block1's three kh taps host-side: cols = (kh, w, c), K = 3*W*C.
    x = jnp.concatenate([x[:, kh:kh + ho1, :] for kh in range(KSIZE)], axis=2)
    # Pre-tile: rows of each grid block ordered (conv-row p, image), p-major.
    x2d = (x.reshape(t, tb, ho1, kcols)
             .transpose(0, 2, 1, 3)
             .reshape(t * ho1 * tb, kcols))

    kernel = _make_kernel(geom, tb)
    in_specs = [pl.BlockSpec((ho1 * tb, kcols), lambda i: (i, 0))]
    in_specs += [pl.BlockSpec(op.shape, _const_index_map(op.ndim)) for op in ops]
    out_specs = pl.BlockSpec((tb, LANE), lambda i: (i, 0))

    # Peak VMEM is ~100 KB/image (block1's f32 accumulators dominate) plus ~1 MB
    # of weights; leave headroom.  Cap keeps the default safe on v7x (64 MiB).
    vmem_limit = int(min(100 * 2**20, max(32 * 2**20, 4 * 2**20 + 128 * 1024 * tb)))

    logits = pl.pallas_call(
        kernel,
        out_shape=jax.ShapeDtypeStruct((bp, LANE), jnp.float32),
        grid=(t,),
        in_specs=in_specs,
        out_specs=out_specs,
        compiler_params=pltpu.CompilerParams(
            dimension_semantics=("parallel",),
            vmem_limit_bytes=vmem_limit),
    )(x2d, *ops)
    return logits[:b, :num_classes]


def _reference_forward(params, x_nchw):
    """Pure-JAX f32 reference of CNNClassifier.forward (for the self-test)."""
    a = x_nchw.astype(jnp.float32)
    for name in ("block1", "block2", "block3"):
        w, b = params[name]
        a = jax.lax.conv_general_dilated(
            a, w, (1, 1), "VALID", dimension_numbers=("NCHW", "OIHW", "NCHW"))
        a = jnp.maximum(a + b[None, :, None, None], 0.0)
        a = jax.lax.reduce_window(a, -jnp.inf, jax.lax.max,
                                  (1, 1, 2, 2), (1, 1, 2, 2), "VALID")
    wl, bl = params["predictor"]
    return a.reshape(a.shape[0], -1) @ wl.T + bl


if __name__ == "__main__":
    key = jax.random.PRNGKey(0)
    kx, kp = jax.random.split(key)

    task = {"num_classes": 10, "image_shape": (1, 28, 28)}   # MNIST-shaped
    B = 64
    x = jax.random.normal(kx, (B,) + task["image_shape"], dtype=jnp.float32)

    params = init_params(kp, task["image_shape"][0], task["num_classes"])
    prep = prepare_params(params, task["image_shape"])

    # Small tile for the smoke test (2 grid steps).  Production default is
    # batch_tile=256 (v7x-safe); push toward ~512 on v5e/v6e.
    fwd = jax.jit(functools.partial(
        cnn_classifier_forward,
        num_classes=prep["num_classes"],
        image_shape=prep["image_shape"],
        batch_tile=32))
    logits = fwd(prep["ops"], x)
    jax.block_until_ready(logits)
    assert logits.shape == (B, task["num_classes"]), logits.shape

    ref = _reference_forward(params, x)
    err = float(jnp.max(jnp.abs(logits - ref)))
    # bf16 MXU operands vs. f32 reference: tolerance, not a bug.
    assert err < 5e-2, f"max |kernel - reference| = {err}"
    print("KERNEL_OK")
</pallas_src>

<mosaic_0001>
module attributes {stable_mosaic.version = 11 : i64} {
  func.func @kernel(%arg0: i32, %arg1: memref<832x84xbf16, #tpu.memory_space<vmem>>, %arg2: memref<84x256xbf16, #tpu.memory_space<vmem>>, %arg3: memref<1x128xf32, #tpu.memory_space<vmem>>, %arg4: memref<384x256xbf16, #tpu.memory_space<vmem>>, %arg5: memref<1x128xf32, #tpu.memory_space<vmem>>, %arg6: memref<384x256xbf16, #tpu.memory_space<vmem>>, %arg7: memref<1x128xf32, #tpu.memory_space<vmem>>, %arg8: memref<128x128xbf16, #tpu.memory_space<vmem>>, %arg9: memref<1x128xf32, #tpu.memory_space<vmem>>, %arg10: memref<32x128xf32, #tpu.memory_space<vmem>>) attributes {dimension_semantics = [#tpu.dimension_semantics<parallel>], iteration_bounds = array<i64: 2>, scalar_prefetch = 0 : i64, scratch_operands = 0 : i64, tpu.core_type = #tpu.core_type<tc>, window_params = [{transform_indices = @transform_0, window_bounds = array<i64: 832, 84>}, {pipeline_mode = #tpu.pipeline_mode<synchronous>, transform_indices = @transform_1, window_bounds = array<i64: 84, 256>}, {pipeline_mode = #tpu.pipeline_mode<synchronous>, transform_indices = @transform_2, window_bounds = array<i64: 1, 128>}, {pipeline_mode = #tpu.pipeline_mode<synchronous>, transform_indices = @transform_3, window_bounds = array<i64: 384, 256>}, {pipeline_mode = #tpu.pipeline_mode<synchronous>, transform_indices = @transform_4, window_bounds = array<i64: 1, 128>}, {pipeline_mode = #tpu.pipeline_mode<synchronous>, transform_indices = @transform_5, window_bounds = array<i64: 384, 256>}, {pipeline_mode = #tpu.pipeline_mode<synchronous>, transform_indices = @transform_6, window_bounds = array<i64: 1, 128>}, {pipeline_mode = #tpu.pipeline_mode<synchronous>, transform_indices = @transform_7, window_bounds = array<i64: 128, 128>}, {pipeline_mode = #tpu.pipeline_mode<synchronous>, transform_indices = @transform_8, window_bounds = array<i64: 1, 128>}, {transform_indices = @transform_9, window_bounds = array<i64: 32, 128>}]} {
    %c0 = arith.constant 0 : index
    %c0_0 = arith.constant 0 : index
    %0 = vector.load %arg1[%c0, %c0_0] : memref<832x84xbf16, #tpu.memory_space<vmem>>, vector<832x84xbf16>
    %c0_1 = arith.constant 0 : index
    %c0_2 = arith.constant 0 : index
    %1 = vector.load %arg2[%c0_1, %c0_2] : memref<84x256xbf16, #tpu.memory_space<vmem>>, vector<84x256xbf16>
    %cst = arith.constant dense<0.000000e+00> : vector<832x256xf32>
    %2 = tpu.matmul %0, %1, %cst {dimension_numbers = #tpu.dot_dimension_numbers<[1], [0], [0], [1], [0, 0, 1, 1], [], []>} : vector<832x84xbf16>, vector<84x256xbf16>, vector<832x256xf32> -> vector<832x256xf32>
    %3 = vector.extract_strided_slice %2 {offsets = [0, 0], sizes = [832, 128], strides = [1, 1]} : vector<832x256xf32> to vector<832x128xf32>
    %4 = vector.extract_strided_slice %2 {offsets = [0, 128], sizes = [832, 128], strides = [1, 1]} : vector<832x256xf32> to vector<832x128xf32>
    %5 = arith.maximumf %3, %4 : vector<832x128xf32>
    %6 = vector.extract_strided_slice %5 {offsets = [0, 0], sizes = [32, 128], strides = [1, 1]} : vector<832x128xf32> to vector<32x128xf32>
    %7 = vector.extract_strided_slice %5 {offsets = [32, 0], sizes = [32, 128], strides = [1, 1]} : vector<832x128xf32> to vector<32x128xf32>
    %8 = arith.maximumf %6, %7 : vector<32x128xf32>
    %9 = vector.extract_strided_slice %5 {offsets = [64, 0], sizes = [32, 128], strides = [1, 1]} : vector<832x128xf32> to vector<32x128xf32>
    %10 = vector.extract_strided_slice %5 {offsets = [96, 0], sizes = [32, 128], strides = [1, 1]} : vector<832x128xf32> to vector<32x128xf32>
    %11 = arith.maximumf %9, %10 : vector<32x128xf32>
    %12 = vector.extract_strided_slice %5 {offsets = [128, 0], sizes = [32, 128], strides = [1, 1]} : vector<832x128xf32> to vector<32x128xf32>
    %13 = vector.extract_strided_slice %5 {offsets = [160, 0], sizes = [32, 128], strides = [1, 1]} : vector<832x128xf32> to vector<32x128xf32>
    %14 = arith.maximumf %12, %13 : vector<32x128xf32>
    %15 = vector.extract_strided_slice %5 {offsets = [192, 0], sizes = [32, 128], strides = [1, 1]} : vector<832x128xf32> to vector<32x128xf32>
    %16 = vector.extract_strided_slice %5 {offsets = [224, 0], sizes = [32, 128], strides = [1, 1]} : vector<832x128xf32> to vector<32x128xf32>
    %17 = arith.maximumf %15, %16 : vector<32x128xf32>
    %18 = vector.extract_strided_slice %5 {offsets = [256, 0], sizes = [32, 128], strides = [1, 1]} : vector<832x128xf32> to vector<32x128xf32>
    %19 = vector.extract_strided_slice %5 {offsets = [288, 0], sizes = [32, 128], strides = [1, 1]} : vector<832x128xf32> to vector<32x128xf32>
    %20 = arith.maximumf %18, %19 : vector<32x128xf32>
    %21 = vector.extract_strided_slice %5 {offsets = [320, 0], sizes = [32, 128], strides = [1, 1]} : vector<832x128xf32> to vector<32x128xf32>
    %22 = vector.extract_strided_slice %5 {offsets = [352, 0], sizes = [32, 128], strides = [1, 1]} : vector<832x128xf32> to vector<32x128xf32>
    %23 = arith.maximumf %21, %22 : vector<32x128xf32>
    %24 = vector.extract_strided_slice %5 {offsets = [384, 0], sizes = [32, 128], strides = [1, 1]} : vector<832x128xf32> to vector<32x128xf32>
    %25 = vector.extract_strided_slice %5 {offsets = [416, 0], sizes = [32, 128], strides = [1, 1]} : vector<832x128xf32> to vector<32x128xf32>
    %26 = arith.maximumf %24, %25 : vector<32x128xf32>
    %27 = vector.extract_strided_slice %5 {offsets = [448, 0], sizes = [32, 128], strides = [1, 1]} : vector<832x128xf32> to vector<32x128xf32>
    %28 = vector.extract_strided_slice %5 {offsets = [480, 0], sizes = [32, 128], strides = [1, 1]} : vector<832x128xf32> to vector<32x128xf32>
    %29 = arith.maximumf %27, %28 : vector<32x128xf32>
    %30 = vector.extract_strided_slice %5 {offsets = [512, 0], sizes = [32, 128], strides = [1, 1]} : vector<832x128xf32> to vector<32x128xf32>
    %31 = vector.extract_strided_slice %5 {offsets = [544, 0], sizes = [32, 128], strides = [1, 1]} : vector<832x128xf32> to vector<32x128xf32>
    %32 = arith.maximumf %30, %31 : vector<32x128xf32>
    %33 = vector.extract_strided_slice %5 {offsets = [576, 0], sizes = [32, 128], strides = [1, 1]} : vector<832x128xf32> to vector<32x128xf32>
    %34 = vector.extract_strided_slice %5 {offsets = [608, 0], sizes = [32, 128], strides = [1, 1]} : vector<832x128xf32> to vector<32x128xf32>
    %35 = arith.maximumf %33, %34 : vector<32x128xf32>
    %36 = vector.extract_strided_slice %5 {offsets = [640, 0], sizes = [32, 128], strides = [1, 1]} : vector<832x128xf32> to vector<32x128xf32>
    %37 = vector.extract_strided_slice %5 {offsets = [672, 0], sizes = [32, 128], strides = [1, 1]} : vector<832x128xf32> to vector<32x128xf32>
    %38 = arith.maximumf %36, %37 : vector<32x128xf32>
    %39 = vector.extract_strided_slice %5 {offsets = [704, 0], sizes = [32, 128], strides = [1, 1]} : vector<832x128xf32> to vector<32x128xf32>
    %40 = vector.extract_strided_slice %5 {offsets = [736, 0], sizes = [32, 128], strides = [1, 1]} : vector<832x128xf32> to vector<32x128xf32>
    %41 = arith.maximumf %39, %40 : vector<32x128xf32>
    %42 = vector.extract_strided_slice %5 {offsets = [768, 0], sizes = [32, 128], strides = [1, 1]} : vector<832x128xf32> to vector<32x128xf32>
    %43 = vector.extract_strided_slice %5 {offsets = [800, 0], sizes = [32, 128], strides = [1, 1]} : vector<832x128xf32> to vector<32x128xf32>
    %44 = arith.maximumf %42, %43 : vector<32x128xf32>
    %45 = tpu.concatenate %8, %11, %14, %17, %20, %23, %26, %29, %32, %35, %38, %41, %44 in 0 : vector<32x128xf32>, vector<32x128xf32>, vector<32x128xf32>, vector<32x128xf32>, vector<32x128xf32>, vector<32x128xf32>, vector<32x128xf32>, vector<32x128xf32>, vector<32x128xf32>, vector<32x128xf32>, vector<32x128xf32>, vector<32x128xf32>, vector<32x128xf32> -> vector<416x128xf32>
    %c0_3 = arith.constant 0 : index
    %c0_4 = arith.constant 0 : index
    %46 = vector.load %arg3[%c0_3, %c0_4] : memref<1x128xf32, #tpu.memory_space<vmem>>, vector<1x128xf32>
    %47 = vector.broadcast %46 : vector<1x128xf32> to vector<416x128xf32>
    %48 = arith.addf %45, %47 : vector<416x128xf32>
    %cst_5 = arith.constant 0.000000e+00 : f32
    %49 = vector.broadcast %cst_5 : f32 to vector<416x128xf32>
    %50 = arith.maximumf %48, %49 : vector<416x128xf32>
    %51 = arith.truncf %50 : vector<416x128xf32> to vector<416x128xbf16>
    %52 = vector.extract_strided_slice %51 {offsets = [0, 0], sizes = [352, 128], strides = [1, 1]} : vector<416x128xbf16> to vector<352x128xbf16>
    %53 = vector.extract_strided_slice %51 {offsets = [32, 0], sizes = [352, 128], strides = [1, 1]} : vector<416x128xbf16> to vector<352x128xbf16>
    %54 = vector.extract_strided_slice %51 {offsets = [64, 0], sizes = [352, 128], strides = [1, 1]} : vector<416x128xbf16> to vector<352x128xbf16>
    %55 = tpu.concatenate %52, %53, %54 in 1 : vector<352x128xbf16>, vector<352x128xbf16>, vector<352x128xbf16> -> vector<352x384xbf16>
    %c0_6 = arith.constant 0 : index
    %c0_7 = arith.constant 0 : index
    %56 = vector.load %arg4[%c0_6, %c0_7] : memref<384x256xbf16, #tpu.memory_space<vmem>>, vector<384x256xbf16>
    %cst_8 = arith.constant dense<0.000000e+00> : vector<352x256xf32>
    %57 = tpu.matmul %55, %56, %cst_8 {dimension_numbers = #tpu.dot_dimension_numbers<[1], [0], [0], [1], [0, 0, 1, 1], [], []>} : vector<352x384xbf16>, vector<384x256xbf16>, vector<352x256xf32> -> vector<352x256xf32>
    %58 = vector.extract_strided_slice %57 {offsets = [0, 0], sizes = [352, 128], strides = [1, 1]} : vector<352x256xf32> to vector<352x128xf32>
    %59 = vector.extract_strided_slice %57 {offsets = [0, 128], sizes = [352, 128], strides = [1, 1]} : vector<352x256xf32> to vector<352x128xf32>
    %60 = arith.maximumf %58, %59 : vector<352x128xf32>
    %61 = vector.extract_strided_slice %60 {offsets = [0, 0], sizes = [32, 128], strides = [1, 1]} : vector<352x128xf32> to vector<32x128xf32>
    %62 = vector.extract_strided_slice %60 {offsets = [32, 0], sizes = [32, 128], strides = [1, 1]} : vector<352x128xf32> to vector<32x128xf32>
    %63 = arith.maximumf %61, %62 : vector<32x128xf32>
    %64 = vector.extract_strided_slice %60 {offsets = [64, 0], sizes = [32, 128], strides = [1, 1]} : vector<352x128xf32> to vector<32x128xf32>
    %65 = vector.extract_strided_slice %60 {offsets = [96, 0], sizes = [32, 128], strides = [1, 1]} : vector<352x128xf32> to vector<32x128xf32>
    %66 = arith.maximumf %64, %65 : vector<32x128xf32>
    %67 = vector.extract_strided_slice %60 {offsets = [128, 0], sizes = [32, 128], strides = [1, 1]} : vector<352x128xf32> to vector<32x128xf32>
    %68 = vector.extract_strided_slice %60 {offsets = [160, 0], sizes = [32, 128], strides = [1, 1]} : vector<352x128xf32> to vector<32x128xf32>
    %69 = arith.maximumf %67, %68 : vector<32x128xf32>
    %70 = vector.extract_strided_slice %60 {offsets = [192, 0], sizes = [32, 128], strides = [1, 1]} : vector<352x128xf32> to vector<32x128xf32>
    %71 = vector.extract_strided_slice %60 {offsets = [224, 0], sizes = [32, 128], strides = [1, 1]} : vector<352x128xf32> to vector<32x128xf32>
    %72 = arith.maximumf %70, %71 : vector<32x128xf32>
    %73 = vector.extract_strided_slice %60 {offsets = [256, 0], sizes = [32, 128], strides = [1, 1]} : vector<352x128xf32> to vector<32x128xf32>
    %74 = vector.extract_strided_slice %60 {offsets = [288, 0], sizes = [32, 128], strides = [1, 1]} : vector<352x128xf32> to vector<32x128xf32>
    %75 = arith.maximumf %73, %74 : vector<32x128xf32>
    %76 = tpu.concatenate %63, %66, %69, %72, %75 in 0 : vector<32x128xf32>, vector<32x128xf32>, vector<32x128xf32>, vector<32x128xf32>, vector<32x128xf32> -> vector<160x128xf32>
    %c0_9 = arith.constant 0 : index
    %c0_10 = arith.constant 0 : index
    %77 = vector.load %arg5[%c0_9, %c0_10] : memref<1x128xf32, #tpu.memory_space<vmem>>, vector<1x128xf32>
    %78 = vector.broadcast %77 : vector<1x128xf32> to vector<160x128xf32>
    %79 = arith.addf %76, %78 : vector<160x128xf32>
    %cst_11 = arith.constant 0.000000e+00 : f32
    %80 = vector.broadcast %cst_11 : f32 to vector<160x128xf32>
    %81 = arith.maximumf %79, %80 : vector<160x128xf32>
    %82 = arith.truncf %81 : vector<160x128xf32> to vector<160x128xbf16>
    %83 = vector.extract_strided_slice %82 {offsets = [0, 0], sizes = [96, 128], strides = [1, 1]} : vector<160x128xbf16> to vector<96x128xbf16>
    %84 = vector.extract_strided_slice %82 {offsets = [32, 0], sizes = [96, 128], strides = [1, 1]} : vector<160x128xbf16> to vector<96x128xbf16>
    %85 = vector.extract_strided_slice %82 {offsets = [64, 0], sizes = [96, 128], strides = [1, 1]} : vector<160x128xbf16> to vector<96x128xbf16>
    %86 = tpu.concatenate %83, %84, %85 in 1 : vector<96x128xbf16>, vector<96x128xbf16>, vector<96x128xbf16> -> vector<96x384xbf16>
    %c0_12 = arith.constant 0 : index
    %c0_13 = arith.constant 0 : index
    %87 = vector.load %arg6[%c0_12, %c0_13] : memref<384x256xbf16, #tpu.memory_space<vmem>>, vector<384x256xbf16>
    %cst_14 = arith.constant dense<0.000000e+00> : vector<96x256xf32>
    %88 = tpu.matmul %86, %87, %cst_14 {dimension_numbers = #tpu.dot_dimension_numbers<[1], [0], [0], [1], [0, 0, 1, 1], [], []>} : vector<96x384xbf16>, vector<384x256xbf16>, vector<96x256xf32> -> vector<96x256xf32>
    %89 = vector.extract_strided_slice %88 {offsets = [0, 0], sizes = [96, 128], strides = [1, 1]} : vector<96x256xf32> to vector<96x128xf32>
    %90 = vector.extract_strided_slice %88 {offsets = [0, 128], sizes = [96, 128], strides = [1, 1]} : vector<96x256xf32> to vector<96x128xf32>
    %91 = arith.maximumf %89, %90 : vector<96x128xf32>
    %92 = vector.extract_strided_slice %91 {offsets = [0, 0], sizes = [32, 128], strides = [1, 1]} : vector<96x128xf32> to vector<32x128xf32>
    %93 = vector.extract_strided_slice %91 {offsets = [32, 0], sizes = [32, 128], strides = [1, 1]} : vector<96x128xf32> to vector<32x128xf32>
    %94 = arith.maximumf %92, %93 : vector<32x128xf32>
    %c0_15 = arith.constant 0 : index
    %c0_16 = arith.constant 0 : index
    %95 = vector.load %arg7[%c0_15, %c0_16] : memref<1x128xf32, #tpu.memory_space<vmem>>, vector<1x128xf32>
    %96 = vector.broadcast %95 : vector<1x128xf32> to vector<32x128xf32>
    %97 = arith.addf %94, %96 : vector<32x128xf32>
    %cst_17 = arith.constant 0.000000e+00 : f32
    %98 = vector.broadcast %cst_17 : f32 to vector<32x128xf32>
    %99 = arith.maximumf %97, %98 : vector<32x128xf32>
    %100 = arith.truncf %99 : vector<32x128xf32> to vector<32x128xbf16>
    %c0_18 = arith.constant 0 : index
    %c0_19 = arith.constant 0 : index
    %101 = vector.load %arg8[%c0_18, %c0_19] : memref<128x128xbf16, #tpu.memory_space<vmem>>, vector<128x128xbf16>
    %cst_20 = arith.constant dense<0.000000e+00> : vector<32x128xf32>
    %102 = tpu.matmul %100, %101, %cst_20 {dimension_numbers = #tpu.dot_dimension_numbers<[1], [0], [0], [1], [0, 0, 1, 1], [], []>} : vector<32x128xbf16>, vector<128x128xbf16>, vector<32x128xf32> -> vector<32x128xf32>
    %c0_21 = arith.constant 0 : index
    %c0_22 = arith.constant 0 : index
    %103 = vector.load %arg9[%c0_21, %c0_22] : memref<1x128xf32, #tpu.memory_space<vmem>>, vector<1x128xf32>
    %104 = vector.broadcast %103 : vector<1x128xf32> to vector<32x128xf32>
    %105 = arith.addf %102, %104 : vector<32x128xf32>
    %c0_23 = arith.constant 0 : index
    %c0_24 = arith.constant 0 : index
    %106 = vector.load %arg10[%c0_23, %c0_24] : memref<32x128xf32, #tpu.memory_space<vmem>>, vector<32x128xf32>
    tpu.vector_store %arg10[%c0_23, %c0_24], %105 {strides = array<i32>} : memref<32x128xf32, #tpu.memory_space<vmem>>, vector<32x128xf32>,
    return
  }
  func.func @transform_0(%arg0: i32) -> (i32, i32) {
    %c0_i32 = arith.constant 0 : i32
    %c0_i32_0 = arith.constant 0 : i32
    return %arg0, %c0_i32 : i32, i32
  }
  func.func @transform_1(%arg0: i32) -> (i32, i32) {
    %c0_i32 = arith.constant 0 : i32
    %c0_i32_0 = arith.constant 0 : i32
    %c0_i32_1 = arith.constant 0 : i32
    return %c0_i32, %c0_i32_0 : i32, i32
  }
  func.func @transform_2(%arg0: i32) -> (i32, i32) {
    %c0_i32 = arith.constant 0 : i32
    %c0_i32_0 = arith.constant 0 : i32
    %c0_i32_1 = arith.constant 0 : i32
    return %c0_i32, %c0_i32_0 : i32, i32
  }
  func.func @transform_3(%arg0: i32) -> (i32, i32) {
    %c0_i32 = arith.constant 0 : i32
    %c0_i32_0 = arith.constant 0 : i32
    %c0_i32_1 = arith.constant 0 : i32
    return %c0_i32, %c0_i32_0 : i32, i32
  }
  func.func @transform_4(%arg0: i32) -> (i32, i32) {
    %c0_i32 = arith.constant 0 : i32
    %c0_i32_0 = arith.constant 0 : i32
    %c0_i32_1 = arith.constant 0 : i32
    return %c0_i32, %c0_i32_0 : i32, i32
  }
  func.func @transform_5(%arg0: i32) -> (i32, i32) {
    %c0_i32 = arith.constant 0 : i32
    %c0_i32_0 = arith.constant 0 : i32
    %c0_i32_1 = arith.constant 0 : i32
    return %c0_i32, %c0_i32_0 : i32, i32
  }
  func.func @transform_6(%arg0: i32) -> (i32, i32) {
    %c0_i32 = arith.constant 0 : i32
    %c0_i32_0 = arith.constant 0 : i32
    %c0_i32_1 = arith.constant 0 : i32
    return %c0_i32, %c0_i32_0 : i32, i32
  }
  func.func @transform_7(%arg0: i32) -> (i32, i32) {
    %c0_i32 = arith.constant 0 : i32
    %c0_i32_0 = arith.constant 0 : i32
    %c0_i32_1 = arith.constant 0 : i32
    return %c0_i32, %c0_i32_0 : i32, i32
  }
  func.func @transform_8(%arg0: i32) -> (i32, i32) {
    %c0_i32 = arith.constant 0 : i32
    %c0_i32_0 = arith.constant 0 : i32
    %c0_i32_1 = arith.constant 0 : i32
    return %c0_i32, %c0_i32_0 : i32, i32
  }
  func.func @transform_9(%arg0: i32) -> (i32, i32) {
    %c0_i32 = arith.constant 0 : i32
    %c0_i32_0 = arith.constant 0 : i32
    return %arg0, %c0_i32 : i32, i32
  }
}

</mosaic_0001>

<bundles_post_ra>
// kernel: cnn_classifier_forward.1
= control target key start
LH: loop header
LB: loop body
LE: loop exit
PB: predicated region body
PF: predicated region fallthrough
CT: control target
= control target key end

     0   :  { %s4806_s30 = smov 0   ;;  %s6690_s0 = inlined_call_operand.vmem [shape: bf16[1664,84], index: 0, kind: input, shape index: {}]   ;;  %s6691_s1 = inlined_call_operand.vmem [shape: bf16[84,256], index: 1, kind: input, shape index: {}]   ;;  %s6692_s2 = inlined_call_operand.vmem [shape: f32[1,128], index: 2, kind: input, shape index: {}]   ;;  %s6693_s3 = inlined_call_operand.vmem [shape: bf16[384,256], index: 3, kind: input, shape index: {}]   ;;  %s6694_s4 = inlined_call_operand.vmem [shape: f32[1,128], index: 4, kind: input, shape index: {}]   ;;  %s6695_s5 = inlined_call_operand.vmem [shape: bf16[384,256], index: 5, kind: input, shape index: {}]   ;;  %s6696_s6 = inlined_call_operand.vmem [shape: f32[1,128], index: 6, kind: input, shape index: {}]   ;;  %s6697_s7 = inlined_call_operand.vmem [shape: bf16[128,128], index: 7, kind: input, shape index: {}]   ;;  %s6698_s8 = inlined_call_operand.vmem [shape: f32[1,128], index: 8, kind: input, shape index: {}]   ;;  %s6699_s9 = inlined_call_operand.vmem [shape: f32[64,128], index: 9, kind: output, shape index: {}]  }
   0x1 LB: > { %s3774_s10 = sadd.s32 4294967295, %s4754_s30   ;;  %p3778_p0 = scmp.ge.s32.totalorder %s4754_s30, 1  ;;  %s4754_s30 = sphi %s4806_s30, %s19_s30  }
   0x2   : > { %p288_p1 = scmp.lt.s32.totalorder %s4754_s30, 3 }
   0x4   : > { %p289_p2 = pnand %p3778_p0, %p288_p1 }
   0x6   : > { %292 = sbr.rel (%p289_p2) target bundleno = 2138 (0x85a), region = 56 }
   0xb   : > { %v451_v0 = vld [vmem:[%s6691_s1 + $0x50] sm:$0x33]  ;;  %vm924_vm0 = vcmask 1041408   ;;  %v4024_v3 = vld [vmem:[%s6691_s1 + $0x40] sm:$0xf]  ;;  %s324_s23 = smul.u32 104, %s3774_s10 }
   0xc   : > { %v743_v1 = vunpack.c.l.b16 %v451_v0  ;;  %v744_v2 = vunpack.c.h.b16 %v451_v0  ;;  %v4613_v6 = vld [vmem:[%s6691_s1 + $0x44] sm:$0xf0]  ;;  %v4612_v7 = vld [vmem:[%s6691_s1 + $0x44] sm:$0xf]  ;;  %v4026_v8 = vld [vmem:[%s6691_s1 + $0x48] sm:$0xf0] }
   0xd   : > { %v4025_v11 = vor.u32 %v4613_v6, %v4024_v3  ;;  %v4029_v12 = vor.u32 %v4612_v7, %v4026_v8  ;;  %v4016_v13 = vld [vmem:[%s6691_s1 + $0x30] sm:$0xf]  ;;  %v4611_v14 = vld [vmem:[%s6691_s1 + $0x34] sm:$0xf0]  ;;  %v4610_v15 = vld [vmem:[%s6691_s1 + $0x34] sm:$0xf] }
   0xe   : > { %v755_v4 = vpack.c.b16 %v743_v1, %v743_v1  ;;  %v756_v5 = vpack.c.b16 %v744_v2, %v744_v2  ;;  %v4018_v16 = vld [vmem:[%s6691_s1 + $0x38] sm:$0xf0]  ;;  %v4017_v17 = vor.u32 %v4611_v14, %v4016_v13  ;;  %v4008_v19 = vld [vmem:[%s6691_s1 + $0x20] sm:$0xf]  ;;  %v4609_v20 = vld [vmem:[%s6691_s1 + $0x24] sm:$0xf0] }
   0xf   : > { %v4021_v18 = vor.u32 %v4610_v15, %v4018_v16  ;;  %v4608_v21 = vld [vmem:[%s6691_s1 + $0x24] sm:$0xf]  ;;  %v4010_v22 = vld [vmem:[%s6691_s1 + $0x28] sm:$0xf0]  ;;  %p325_p3 = scmp.lt.s32.totalorder %s324_s23, 207  ;;  %v4009_v23 = vor.u32 %v4609_v20, %v4008_v19  ;;  %vm767_vm1 = vcmask 687104  }
  0x10   : > { %v926_v9 = vsel %vm924_vm0, %v755_v4, 0  ;;  %v929_v10 = vsel %vm924_vm0, %v756_v5, 0  ;;  %v4013_v24 = vor.u32 %v4608_v21, %v4010_v22  ;;  %v4000_v25 = vld [vmem:[%s6691_s1 + $0x10] sm:$0xf]  ;;  %v4607_v26 = vld [vmem:[%s6691_s1 + $0x14] sm:$0xf0] }
  0x11   : > { %933 = vmatpush.bf16.msra.mxu0 %v926_v9  ;;  %1202 = vmatpush.bf16.msra.mxu1 %v929_v10  ;;  %v4606_v27 = vld [vmem:[%s6691_s1 + $0x14] sm:$0xf]  ;;  %v4002_v28 = vld [vmem:[%s6691_s1 + $0x18] sm:$0xf0]  ;;  %s6912_s23 = smov (!%p325_p3, %s324_s23), 207  ;;  %v4001_v29 = vor.u32 %v4607_v26, %v4000_v25  ;;  %s3780_s22 = sshll.u32 %s3774_s10, 2 }
  0x12   : > { %v4005_v30 = vor.u32 %v4606_v27, %v4002_v28  ;;  %v3992_v31 = vld [vmem:[%s6691_s1] sm:$0xf]  ;;  %v4605_v32 = vld [vmem:[%s6691_s1 + $0x4] sm:$0xf0]  ;;  %v4604_v33 = vld [vmem:[%s6691_s1 + $0x4] sm:$0xf] }
  0x13   : > { %v3994_v34 = vld [vmem:[%s6691_s1 + $0x8] sm:$0xf0]  ;;  %s3779_s17 = sshll.u32 %s6912_s23, 2  ;;  %v3993_v35 = vor.u32 %v4605_v32, %v3992_v31  ;;  %v4192_v45 = vld [vmem:[%s6693_s3 + $0x70] sm:$0xf]  ;;  %p331_p4 = scmp.lt.s32.totalorder %s3780_s22, 7 }
  0x14   : > { %v3997_v36 = vor.u32 %v4604_v33, %v3994_v34  ;;  %s4882_s20 = scalar_lea.vmem %s6690_s0, %s3779_s17  ;;  %v4629_v46 = vld [vmem:[%s6693_s3 + $0x74] sm:$0xf0]  ;;  %v4184_v48 = vld [vmem:[%s6693_s3 + $0x60] sm:$0xf]  ;;  %v4627_v49 = vld [vmem:[%s6693_s3 + $0x64] sm:$0xf0] }
  0x15   : > { %934 = vmatpush.bf16.msra.mxu0 %v4025_v11  ;;  %1203 = vmatpush.bf16.msra.mxu1 %v4029_v12  ;;  %v4552_v37 = vld [vmem:[%s4882_s20] sm:$0xff]  ;;  %v4553_v38 = vld [vmem:[%s4882_s20 + $0x8] sm:$0xff]  ;;  %v4554_v39 = vld [vmem:[%s4882_s20 + $0x10] sm:$0xff]  ;;  %v4193_v47 = vor.u32 %v4629_v46, %v4192_v45  ;;  %v4185_v50 = vor.u32 %v4627_v49, %v4184_v48  ;;  %s6914_s22 = smov (!%p331_p4, %s3780_s22), 7 }
  0x16   : > { %v4555_v40 = vld [vmem:[%s4882_s20 + $0x18] sm:$0xff]  ;;  %v4556_v41 = vld [vmem:[%s4882_s20 + $0x20] sm:$0xff]  ;;  %v4557_v42 = vld [vmem:[%s4882_s20 + $0x28] sm:$0xff]  ;;  %s3781_s24 = sshll.u32 %s6914_s22, 3 }
  0x17   : > { %v4558_v43 = vld [vmem:[%s4882_s20 + $0x30] sm:$0xff]  ;;  %v4559_v44 = vld [vmem:[%s4882_s20 + $0x38] sm:$0xff]  ;;  %2229 = vmatpush.bf16.msra.mxu2 %v4193_v47  ;;  %v4560_v54 = vld [vmem:[%s4882_s20 + $0x40] sm:$0xff]  ;;  %s334_s28 = scalar_lea.vmem %s6699_s9, %s3781_s24 }
  0x18   : > { %v4176_v51 = vld [vmem:[%s6693_s3 + $0x50] sm:$0xf]  ;;  %v4625_v52 = vld [vmem:[%s6693_s3 + $0x54] sm:$0xf0]  ;;  %v4168_v57 = vld [vmem:[%s6693_s3 + $0x40] sm:$0xf] }
  0x19   : > { %935 = vmatpush.bf16.msra.mxu0 %v4017_v17  ;;  %1204 = vmatpush.bf16.msra.mxu1 %v4021_v18  ;;  %v4177_v53 = vor.u32 %v4625_v52, %v4176_v51  ;;  %v4623_v58 = vld [vmem:[%s6693_s3 + $0x44] sm:$0xf0]  ;;  %v4160_v60 = vld [vmem:[%s6693_s3 + $0x30] sm:$0xf]  ;;  %v4621_v61 = vld [vmem:[%s6693_s3 + $0x34] sm:$0xf0] }
  0x1a   : > { %v4169_v59 = vor.u32 %v4623_v58, %v4168_v57  ;;  %v4161_v62 = vor.u32 %v4621_v61, %v4160_v60  ;;  %v4152_v1 = vld [vmem:[%s6693_s3 + $0x20] sm:$0xf]  ;;  %v4619_v2 = vld [vmem:[%s6693_s3 + $0x24] sm:$0xf0]  ;;  %v4144_v4 = vld [vmem:[%s6693_s3 + $0x10] sm:$0xf] }
  0x1b   : > { %2230 = vmatpush.bf16.msra.mxu2 %v4185_v50  ;;  %v4153_v3 = vor.u32 %v4619_v2, %v4152_v1  ;;  %v4617_v5 = vld [vmem:[%s6693_s3 + $0x14] sm:$0xf0]  ;;  %v4561_v7 = vld [vmem:[%s4882_s20 + $0x48] sm:$0xff]  ;;  %v4136_v10 = vld [vmem:[%s6693_s3] sm:$0xf] }
  0x1c   : > { %v4145_v6 = vor.u32 %v4617_v5, %v4144_v4  ;;  %v4615_v11 = vld [vmem:[%s6693_s3 + $0x4] sm:$0xf0]  ;;  %v4562_v15 = vld [vmem:[%s4882_s20 + $0x50] sm:$0xff]  ;;  %v4966_v21 = vld [vmem:[%s6692_s2] ss:$0 sm:$0xff] }
  0x1d   : > { %936 = vmatpush.bf16.msra.mxu0 %v4009_v23  ;;  %1205 = vmatpush.bf16.msra.mxu1 %v4013_v24  ;;  %v4137_v12 = vor.u32 %v4615_v11, %v4136_v10  ;;  %v4248_v50 = vld [vmem:[%s6693_s3 + $0xe0] sm:$0xf]  ;;  %v4643_v51 = vld [vmem:[%s6693_s3 + $0xe4] sm:$0xf0]  ;;  %v4641_v57 = vld [vmem:[%s6693_s3 + $0xd4] sm:$0xf0] }
  0x1e   : > { %v4249_v52 = vor.u32 %v4643_v51, %v4248_v50  ;;  %v4232_v1 = vld [vmem:[%s6693_s3 + $0xc0] sm:$0xf]  ;;  %v4639_v2 = vld [vmem:[%s6693_s3 + $0xc4] sm:$0xf0] }
  0x1f   : > { %2231 = vmatpush.bf16.msra.mxu2 %v4177_v53 }
  0x21   : > { %937 = vmatpush.bf16.msra.mxu0 %v4001_v29  ;;  %1206 = vmatpush.bf16.msra.mxu1 %v4005_v30  ;;  %v4563_v30 = vld [vmem:[%s4882_s20 + $0x58] sm:$0xff] }
  0x23   : > { %2232 = vmatpush.bf16.msra.mxu2 %v4169_v59  ;;  %v4564_v59 = vld [vmem:[%s4882_s20 + $0x60] sm:$0xff] }
  0x25   : > { %938 = vmatpush.bf16.msra.mxu0 %v3993_v35  ;;  %1207 = vmatpush.bf16.msra.mxu1 %v3997_v36 }
  0x27   : > { %2233 = vmatpush.bf16.msra.mxu2 %v4161_v62 }
  0x28   : > { %4030 = vmatmul.msk.bf16.vlgmr.msra.gmra.mxu0 %vm767_vm1, %v4552_v37  ;;  %4082 = vmatmul.msk.bf16.vlgmr.msra.gmra.mxu1 %vm767_vm1, %v4552_v37 }
  0x2b   : > { %2234 = vmatpush.bf16.msra.mxu2 %v4153_v3  ;;  %v4233_v3 = vor.u32 %v4639_v2, %v4232_v1 }
  0x2f   : > { %2235 = vmatpush.bf16.msra.mxu2 %v4145_v6 }
  0x33   : > { %2236 = vmatpush.bf16.msra.mxu2 %v4137_v12  ;;  %v4216_v12 = vld [vmem:[%s6693_s3 + $0xa0] sm:$0xf] }
  0x38   : > { %4031 = vmatmul.msk.bf16.gmra.mxu0 %vm767_vm1, %v4553_v38  ;;  %4083 = vmatmul.msk.bf16.gmra.mxu1 %vm767_vm1, %v4553_v38 }
  0x48   : > { %4032 = vmatmul.msk.bf16.gmra.mxu0 %vm767_vm1, %v4554_v39  ;;  %4084 = vmatmul.msk.bf16.gmra.mxu1 %vm767_vm1, %v4554_v39 }
  0x58   : > { %4033 = vmatmul.msk.bf16.gmra.mxu0 %vm767_vm1, %v4555_v40  ;;  %4085 = vmatmul.msk.bf16.gmra.mxu1 %vm767_vm1, %v4555_v40 }
  0x68   : > { %4034 = vmatmul.msk.bf16.gmra.mxu0 %vm767_vm1, %v4556_v41  ;;  %4086 = vmatmul.msk.bf16.gmra.mxu1 %vm767_vm1, %v4556_v41 }
  0x78   : > { %4035 = vmatmul.msk.bf16.gmra.mxu0 %vm767_vm1, %v4557_v42  ;;  %4087 = vmatmul.msk.bf16.gmra.mxu1 %vm767_vm1, %v4557_v42  ;;  %v4256_v42 = vld [vmem:[%s6693_s3 + $0xf0] sm:$0xf] }
  0x88   : > { %4036 = vmatmul.msk.bf16.gmra.mxu0 %vm767_vm1, %v4558_v43  ;;  %4088 = vmatmul.msk.bf16.gmra.mxu1 %vm767_vm1, %v4558_v43  ;;  %v4645_v43 = vld [vmem:[%s6693_s3 + $0xf4] sm:$0xf0] }
  0x98   : > { %4037 = vmatmul.msk.bf16.gmra.mxu0 %vm767_vm1, %v4559_v44  ;;  %4089 = vmatmul.msk.bf16.gmra.mxu1 %vm767_vm1, %v4559_v44  ;;  %v4257_v44 = vor.u32 %v4645_v43, %v4256_v42 }
  0x9a   : > { %2344 = vmatpush.bf16.msra.mxu3 %v4257_v44  ;;  %v4567_v44 = vld [vmem:[%s4882_s20 + $0x78] sm:$0xff] }
  0x9e   : > { %2345 = vmatpush.bf16.msra.mxu3 %v4249_v52 }
  0xa5   : > { %v940_v55 = vpop.f32.mrf.mxu0  ;;  %v1209_v56 = vpop.f32.mrf.mxu1 }
  0xa6   : > { %v1469_v18 = vmax.f32 %v940_v55, %v1209_v56  ;;  %v4240_v56 = vld [vmem:[%s6693_s3 + $0xd0] sm:$0xf] }
  0xa7   : > { %v4241_v58 = vor.u32 %v4641_v57, %v4240_v56 }
  0xa8   : > { %4038 = vmatmul.msk.bf16.gmra.mxu0 %vm767_vm1, %v4560_v54  ;;  %4090 = vmatmul.msk.bf16.gmra.mxu1 %vm767_vm1, %v4560_v54 }
  0xa9   : > { %2346 = vmatpush.bf16.msra.mxu3 %v4241_v58 }
  0xad   : > { %v942_v63 = vpop.f32.mrf.mxu0  ;;  %v1211_v0 = vpop.f32.mrf.mxu1  ;;  %2347 = vmatpush.bf16.msra.mxu3 %v4233_v3 }
  0xae   : > { %v1470_v25 = vmax.f32 %v942_v63, %v1211_v0 }
  0xb5   : > { %v945_v8 = vpop.f32.mrf.mxu0  ;;  %v1214_v9 = vpop.f32.mrf.mxu1 }
  0xb6   : > { %v1471_v35 = vmax.f32 %v945_v8, %v1214_v9  ;;  %v4637_v8 = vld [vmem:[%s6693_s3 + $0xb4] sm:$0xf0] }
  0xb8   : > { %4039 = vmatmul.msk.bf16.gmra.mxu0 %vm767_vm1, %v4561_v7  ;;  %4091 = vmatmul.msk.bf16.gmra.mxu1 %vm767_vm1, %v4561_v7  ;;  %v4224_v7 = vld [vmem:[%s6693_s3 + $0xb0] sm:$0xf] }
  0xb9   : > { %v4225_v9 = vor.u32 %v4637_v8, %v4224_v7 }
  0xbb   : > { %2348 = vmatpush.bf16.msra.mxu3 %v4225_v9 }
  0xbd   : > { %v947_v13 = vpop.f32.mrf.mxu0  ;;  %v1216_v14 = vpop.f32.mrf.mxu1 }
  0xbe   : > { %v1472_v48 = vmax.f32 %v947_v13, %v1216_v14  ;;  %v4635_v13 = vld [vmem:[%s6693_s3 + $0xa4] sm:$0xf0] }
  0xbf   : > { %v4217_v14 = vor.u32 %v4635_v13, %v4216_v12 }
  0xc1   : > { %2349 = vmatpush.bf16.msra.mxu3 %v4217_v14 }
  0xc5   : > { %v950_v16 = vpop.f32.mrf.mxu0  ;;  %v1219_v17 = vpop.f32.mrf.mxu1 }
  0xc6   : > { %v1473_v19 = vmax.f32 %v950_v16, %v1219_v17  ;;  %v4633_v16 = vld [vmem:[%s6693_s3 + $0x94] sm:$0xf0] }
  0xc8   : > { %v1573_v20 = vmax.f32 %v1469_v18, %v1473_v19  ;;  %4040 = vmatmul.msk.bf16.gmra.mxu0 %vm767_vm1, %v4562_v15  ;;  %4092 = vmatmul.msk.bf16.gmra.mxu1 %vm767_vm1, %v4562_v15  ;;  %v4208_v15 = vld [vmem:[%s6693_s3 + $0x90] sm:$0xf]  ;;  %v4565_v18 = vld [vmem:[%s4882_s20 + $0x68] sm:$0xff] }
  0xc9   : > { %v4209_v17 = vor.u32 %v4633_v16, %v4208_v15  ;;  %v4570_v15 = vld [vmem:[%s4882_s20 + $0x90] sm:$0xff] }
  0xca   : > { %v1629_v22 = vadd.f32 %v4966_v21, %v1573_v20 }
  0xcb   : > { %2350 = vmatpush.bf16.msra.mxu3 %v4209_v17 }
  0xcc   : > { %v1681_v28 = vmax.f32 %v1629_v22, 0.0  ;;  %v4200_v22 = vld [vmem:[%s6693_s3 + $0x80] sm:$0xf] }
  0xcd   : > { %v952_v23 = vpop.f32.mrf.mxu0  ;;  %v1221_v24 = vpop.f32.mrf.mxu1 }
  0xce   : > { %v1474_v26 = vmax.f32 %v952_v23, %v1221_v24  ;;  %v1733_v32 = vpack.c.bf16 %v1681_v28, %v1681_v28  ;;  %v4631_v23 = vld [vmem:[%s6693_s3 + $0x84] sm:$0xf0] }
  0xcf   : > { %v4201_v24 = vor.u32 %v4631_v23, %v4200_v22 }
  0xd0   : > { %v1574_v27 = vmax.f32 %v1470_v25, %v1474_v26  ;;  %v1829_v39 = vunpack.c.l.b16 %v1733_v32 }
  0xd1   : > { %2351 = vmatpush.bf16.msra.mxu3 %v4201_v24 }
  0xd2   : > { %v1630_v29 = vadd.f32 %v4966_v21, %v1574_v27  ;;  %v4566_v27 = vld [vmem:[%s4882_s20 + $0x70] sm:$0xff] }
  0xd4   : > { %v1682_v31 = vmax.f32 %v1630_v29, 0.0 }
  0xd5   : > { %v955_v33 = vpop.f32.mrf.mxu0  ;;  %v1224_v34 = vpop.f32.mrf.mxu1 }
  0xd6   : > { %v1475_v36 = vmax.f32 %v955_v33, %v1224_v34  ;;  %v1734_v37 = vpack.c.bf16 %v1682_v31, %v1682_v31 }
  0xd8   : > { %v1575_v38 = vmax.f32 %v1471_v35, %v1475_v36  ;;  %4041 = vmatmul.msk.bf16.gmra.mxu0 %vm767_vm1, %v4563_v30  ;;  %4093 = vmatmul.msk.bf16.gmra.mxu1 %vm767_vm1, %v4563_v30  ;;  %v1830_v40 = vunpack.c.l.b16 %v1734_v37 }
  0xda   : > { %v4975_v41 = vpack.c.b16 %v1830_v40, %v1829_v39  ;;  %v1631_v45 = vadd.f32 %v4966_v21, %v1575_v38 }
  0xdc   : > { %2237 = vmatmul.bf16.vlgmr.msra.gmra.mxu2 %v4975_v41  ;;  %v1683_v54 = vmax.f32 %v1631_v45, 0.0 }
  0xdd   : > { %v957_v46 = vpop.f32.mrf.mxu0  ;;  %v1226_v47 = vpop.f32.mrf.mxu1 }
  0xde   : > { %v1476_v49 = vmax.f32 %v957_v46, %v1226_v47  ;;  %v1735_v61 = vpack.c.bf16 %v1683_v54, %v1683_v54 }
  0xe0   : > { %v1576_v53 = vmax.f32 %v1472_v48, %v1476_v49  ;;  %v1831_v4 = vunpack.c.l.b16 %v1735_v61 }
  0xe2   : > { %v1632_v55 = vadd.f32 %v4966_v21, %v1576_v53 }
  0xe4   : > { %v1684_v60 = vmax.f32 %v1632_v55, 0.0 }
  0xe5   : > { %v960_v62 = vpop.f32.mrf.mxu0  ;;  %v1229_v63 = vpop.f32.mrf.mxu1 }
  0xe6   : > { %v1736_v0 = vpack.c.bf16 %v1684_v60, %v1684_v60  ;;  %v1477_v30 = vmax.f32 %v960_v62, %v1229_v63 }
  0xe8   : > { %4042 = vmatmul.msk.bf16.gmra.mxu0 %vm767_vm1, %v4564_v59  ;;  %4094 = vmatmul.msk.bf16.gmra.mxu1 %vm767_vm1, %v4564_v59  ;;  %v1832_v5 = vunpack.c.l.b16 %v1736_v0  ;;  %v4568_v0 = vld [vmem:[%s4882_s20 + $0x80] sm:$0xff] }
  0xea   : > { %v5007_v6 = vpack.c.b16 %v1832_v5, %v1831_v4 }
  0xec   : > { %2242 = vmatmul.bf16.gmra.mxu2 %v5007_v6 }
  0xed   : > { %v962_v10 = vpop.f32.mrf.mxu0  ;;  %v1231_v11 = vpop.f32.mrf.mxu1 }
  0xee   : > { %v1478_v36 = vmax.f32 %v962_v10, %v1231_v11  ;;  %v4569_v10 = vld [vmem:[%s4882_s20 + $0x88] sm:$0xff] }
  0xf5   : > { %v965_v19 = vpop.f32.mrf.mxu0  ;;  %v1234_v20 = vpop.f32.mrf.mxu1 }
  0xf6   : > { %v1479_v47 = vmax.f32 %v965_v19, %v1234_v20 }
  0xf8   : > { %4043 = vmatmul.msk.bf16.gmra.mxu0 %vm767_vm1, %v4565_v18  ;;  %4095 = vmatmul.msk.bf16.gmra.mxu1 %vm767_vm1, %v4565_v18 }
  0xfd   : > { %v967_v25 = vpop.f32.mrf.mxu0  ;;  %v1236_v26 = vpop.f32.mrf.mxu1 }
  0xfe   : > { %v1480_v57 = vmax.f32 %v967_v25, %v1236_v26 }
 0x105   : > { %v970_v28 = vpop.f32.mrf.mxu0  ;;  %v1239_v29 = vpop.f32.mrf.mxu1 }
 0x106   : > { %v1481_v31 = vmax.f32 %v970_v28, %v1239_v29 }
 0x108   : > { %v1577_v32 = vmax.f32 %v1477_v30, %v1481_v31  ;;  %4044 = vmatmul.msk.bf16.gmra.mxu0 %vm767_vm1, %v4566_v27  ;;  %4096 = vmatmul.msk.bf16.gmra.mxu1 %vm767_vm1, %v4566_v27 }
 0x10a   : > { %v1633_v33 = vadd.f32 %v4966_v21, %v1577_v32  ;;  %v4571_v32 = vld [vmem:[%s4882_s20 + $0x98] sm:$0xff] }
 0x10c   : > { %v1685_v38 = vmax.f32 %v1633_v33, 0.0 }
 0x10d   : > { %v972_v34 = vpop.f32.mrf.mxu0  ;;  %v1241_v35 = vpop.f32.mrf.mxu1 }
 0x10e   : > { %v1482_v37 = vmax.f32 %v972_v34, %v1241_v35  ;;  %v1737_v42 = vpack.c.bf16 %v1685_v38, %v1685_v38 }
 0x110   : > { %v1578_v39 = vmax.f32 %v1478_v36, %v1482_v37  ;;  %v1833_v50 = vunpack.c.l.b16 %v1737_v42 }
 0x112   : > { %v1634_v40 = vadd.f32 %v4966_v21, %v1578_v39 }
 0x114   : > { %v1686_v43 = vmax.f32 %v1634_v40, 0.0 }
 0x115   : > { %v975_v45 = vpop.f32.mrf.mxu0  ;;  %v1244_v46 = vpop.f32.mrf.mxu1 }
 0x116   : > { %v1738_v48 = vpack.c.bf16 %v1686_v43, %v1686_v43  ;;  %v1483_v49 = vmax.f32 %v975_v45, %v1244_v46 }
 0x118   : > { %v1834_v51 = vunpack.c.l.b16 %v1738_v48  ;;  %v1579_v52 = vmax.f32 %v1479_v47, %v1483_v49  ;;  %4045 = vmatmul.msk.bf16.gmra.mxu0 %vm767_vm1, %v4567_v44  ;;  %4097 = vmatmul.msk.bf16.gmra.mxu1 %vm767_vm1, %v4567_v44 }
 0x11a   : > { %v5045_v53 = vpack.c.b16 %v1834_v51, %v1833_v50  ;;  %v1635_v54 = vadd.f32 %v4966_v21, %v1579_v52 }
 0x11c   : > { %2247 = vmatmul.bf16.gmra.mxu2 %v5045_v53  ;;  %2352 = vmatmul.bf16.vlgmr.msra.gmra.mxu3 %v5045_v53  ;;  %v1687_v59 = vmax.f32 %v1635_v54, 0.0  ;;  %v4572_v54 = vld [vmem:[%s4882_s20 + $0xa0] sm:$0xff] }
 0x11d   : > { %v977_v55 = vpop.f32.mrf.mxu0  ;;  %v1246_v56 = vpop.f32.mrf.mxu1 }
 0x11e   : > { %v1484_v58 = vmax.f32 %v977_v55, %v1246_v56  ;;  %v1739_v62 = vpack.c.bf16 %v1687_v59, %v1687_v59 }
 0x120   : > { %v1580_v60 = vmax.f32 %v1480_v57, %v1484_v58  ;;  %v1835_v4 = vunpack.c.l.b16 %v1739_v62 }
 0x122   : > { %v1636_v61 = vadd.f32 %v4966_v21, %v1580_v60 }
 0x124   : > { %v1688_v63 = vmax.f32 %v1636_v61, 0.0 }
 0x125   : > { %v980_v1 = vpop.f32.mrf.mxu0  ;;  %v1249_v2 = vpop.f32.mrf.mxu1 }
 0x126   : > { %v1740_v3 = vpack.c.bf16 %v1688_v63, %v1688_v63  ;;  %v1485_v18 = vmax.f32 %v980_v1, %v1249_v2  ;;  %v4573_v63 = vld [vmem:[%s4882_s20 + $0xa8] sm:$0xff] }
 0x128   : > { %v1836_v5 = vunpack.c.l.b16 %v1740_v3  ;;  %4046 = vmatmul.msk.bf16.gmra.mxu0 %vm767_vm1, %v4568_v0  ;;  %4098 = vmatmul.msk.bf16.gmra.mxu1 %vm767_vm1, %v4568_v0 }
 0x12a   : > { %v5054_v7 = vpack.c.b16 %v1836_v5, %v1835_v4  ;;  %v4574_v4 = vld [vmem:[%s4882_s20 + $0xb0] sm:$0xff] }
 0x12c   : > { %2252 = vmatmul.bf16.gmra.mxu2 %v5054_v7  ;;  %2357 = vmatmul.bf16.gmra.mxu3 %v5054_v7 }
 0x12d   : > { %v982_v8 = vpop.f32.mrf.mxu0  ;;  %v1251_v9 = vpop.f32.mrf.mxu1 }
 0x12e   : > { %v1486_v25 = vmax.f32 %v982_v8, %v1251_v9 }
 0x135   : > { %v985_v11 = vpop.f32.mrf.mxu0  ;;  %v1254_v12 = vpop.f32.mrf.mxu1 }
 0x136   : > { %v1487_v35 = vmax.f32 %v985_v11, %v1254_v12 }
 0x138   : > { %4047 = vmatmul.msk.bf16.gmra.mxu0 %vm767_vm1, %v4569_v10  ;;  %4099 = vmatmul.msk.bf16.gmra.mxu1 %vm767_vm1, %v4569_v10 }
 0x13d   : > { %v987_v13 = vpop.f32.mrf.mxu0  ;;  %v1256_v14 = vpop.f32.mrf.mxu1 }
 0x13e   : > { %v1488_v46 = vmax.f32 %v987_v13, %v1256_v14 }
 0x145   : > { %v990_v16 = vpop.f32.mrf.mxu0  ;;  %v1259_v17 = vpop.f32.mrf.mxu1 }
 0x146   : > { %v1489_v19 = vmax.f32 %v990_v16, %v1259_v17 }
 0x148   : > { %v1581_v20 = vmax.f32 %v1485_v18, %v1489_v19  ;;  %4048 = vmatmul.msk.bf16.gmra.mxu0 %vm767_vm1, %v4570_v15  ;;  %4100 = vmatmul.msk.bf16.gmra.mxu1 %vm767_vm1, %v4570_v15 }
 0x14a   : > { %v1637_v22 = vadd.f32 %v4966_v21, %v1581_v20 }
 0x14c   : > { %v1689_v27 = vmax.f32 %v1637_v22, 0.0 }
 0x14d   : > { %v992_v23 = vpop.f32.mrf.mxu0  ;;  %v1261_v24 = vpop.f32.mrf.mxu1 }
 0x14e   : > { %v1490_v26 = vmax.f32 %v992_v23, %v1261_v24  ;;  %v1741_v30 = vpack.c.bf16 %v1689_v27, %v1689_v27  ;;  %v4575_v23 = vld [vmem:[%s4882_s20 + $0xb8] sm:$0xff] }
 0x150   : > { %v1582_v28 = vmax.f32 %v1486_v25, %v1490_v26  ;;  %v1837_v38 = vunpack.c.l.b16 %v1741_v30 }
 0x152   : > { %v1638_v29 = vadd.f32 %v4966_v21, %v1582_v28 }
 0x154   : > { %v1690_v31 = vmax.f32 %v1638_v29, 0.0 }
 0x155   : > { %v995_v33 = vpop.f32.mrf.mxu0  ;;  %v1264_v34 = vpop.f32.mrf.mxu1 }
 0x156   : > { %v1742_v36 = vpack.c.bf16 %v1690_v31, %v1690_v31  ;;  %v1491_v37 = vmax.f32 %v995_v33, %v1264_v34 }
 0x158   : > { %v1838_v39 = vunpack.c.l.b16 %v1742_v36  ;;  %v1583_v40 = vmax.f32 %v1487_v35, %v1491_v37  ;;  %4049 = vmatmul.msk.bf16.gmra.mxu0 %vm767_vm1, %v4571_v32  ;;  %4101 = vmatmul.msk.bf16.gmra.mxu1 %vm767_vm1, %v4571_v32 }
 0x15a   : > { %v5069_v42 = vpack.c.b16 %v1838_v39, %v1837_v38  ;;  %v1639_v43 = vadd.f32 %v4966_v21, %v1583_v40 }
 0x15c   : > { %2257 = vmatmul.bf16.gmra.mxu2 %v5069_v42  ;;  %2362 = vmatmul.bf16.gmra.mxu3 %v5069_v42  ;;  %v1691_v48 = vmax.f32 %v1639_v43, 0.0 }
 0x15d   : > { %v997_v44 = vpop.f32.mrf.mxu0  ;;  %v1266_v45 = vpop.f32.mrf.mxu1 }
 0x15e   : > { %v1492_v47 = vmax.f32 %v997_v44, %v1266_v45  ;;  %v1743_v51 = vpack.c.bf16 %v1691_v48, %v1691_v48 }
 0x15f   : > { %v2238_v32 = vpop.f32.mrf.mxu2 }
 0x160   : > { %v1584_v49 = vmax.f32 %v1488_v46, %v1492_v47  ;;  %v1839_v58 = vunpack.c.l.b16 %v1743_v51 }
 0x162   : > { %v1640_v50 = vadd.f32 %v4966_v21, %v1584_v49  ;;  %v4576_v49 = vld [vmem:[%s4882_s20 + $0xc0] sm:$0xff] }
 0x164   : > { %v1692_v52 = vmax.f32 %v1640_v50, 0.0 }
 0x165   : > { %v1000_v55 = vpop.f32.mrf.mxu0  ;;  %v1269_v56 = vpop.f32.mrf.mxu1 }
 0x166   : > { %v1744_v57 = vpack.c.bf16 %v1692_v52, %v1692_v52  ;;  %v1493_v9 = vmax.f32 %v1000_v55, %v1269_v56 }
 0x167   : > { %v5101_v46 = vpop.f32.mrf.mxu2 }
 0x168   : > { %v1840_v59 = vunpack.c.l.b16 %v1744_v57  ;;  %4050 = vmatmul.msk.bf16.gmra.mxu0 %vm767_vm1, %v4572_v54  ;;  %4102 = vmatmul.msk.bf16.gmra.mxu1 %vm767_vm1, %v4572_v54  ;;  %6713 = vst [vmem:[#allocation2_spill] sm:$0xff] %v5101_v46 }
 0x16a   : > { %v5078_v60 = vpack.c.b16 %v1840_v59, %v1839_v58 }
 0x16c   : > { %2262 = vmatmul.bf16.gmra.mxu2 %v5078_v60  ;;  %2367 = vmatmul.bf16.gmra.mxu3 %v5078_v60 }
 0x16d   : > { %v1002_v61 = vpop.f32.mrf.mxu0  ;;  %v1271_v62 = vpop.f32.mrf.mxu1 }
 0x16e   : > { %v1494_v15 = vmax.f32 %v1002_v61, %v1271_v62 }
 0x16f   : > { %v2243_v61 = vpop.f32.mrf.mxu2 }
 0x175   : > { %v1005_v0 = vpop.f32.mrf.mxu0  ;;  %v1274_v1 = vpop.f32.mrf.mxu1 }
 0x176   : > { %v1495_v26 = vmax.f32 %v1005_v0, %v1274_v1  ;;  %v4577_v0 = vld [vmem:[%s4882_s20 + $0xc8] sm:$0xff] }
 0x178   : > { %4051 = vmatmul.msk.bf16.gmra.mxu0 %vm767_vm1, %v4573_v63  ;;  %4103 = vmatmul.msk.bf16.gmra.mxu1 %vm767_vm1, %v4573_v63 }
 0x17d   : > { %v1007_v2 = vpop.f32.mrf.mxu0  ;;  %v1276_v3 = vpop.f32.mrf.mxu1 }
 0x17e   : > { %v1496_v37 = vmax.f32 %v1007_v2, %v1276_v3 }
 0x185   : > { %v1010_v5 = vpop.f32.mrf.mxu0  ;;  %v1279_v8 = vpop.f32.mrf.mxu1 }
 0x186   : > { %v1497_v10 = vmax.f32 %v1010_v5, %v1279_v8  ;;  %v4578_v5 = vld [vmem:[%s4882_s20 + $0xd0] sm:$0xff] }
 0x188   : > { %v1585_v11 = vmax.f32 %v1493_v9, %v1497_v10  ;;  %4052 = vmatmul.msk.bf16.gmra.mxu0 %vm767_vm1, %v4574_v4  ;;  %4104 = vmatmul.msk.bf16.gmra.mxu1 %vm767_vm1, %v4574_v4 }
 0x18a   : > { %v1641_v12 = vadd.f32 %v4966_v21, %v1585_v11 }
 0x18c   : > { %v1693_v17 = vmax.f32 %v1641_v12, 0.0 }
 0x18d   : > { %v1012_v13 = vpop.f32.mrf.mxu0  ;;  %v1281_v14 = vpop.f32.mrf.mxu1 }
 0x18e   : > { %v1498_v16 = vmax.f32 %v1012_v13, %v1281_v14  ;;  %v1745_v20 = vpack.c.bf16 %v1693_v17, %v1693_v17 }
 0x190   : > { %v1586_v18 = vmax.f32 %v1494_v15, %v1498_v16  ;;  %v1841_v29 = vunpack.c.l.b16 %v1745_v20  ;;  %v5121_v20 = vpop.f32.mrf.mxu2 }
 0x191   : > { %6715 = vst [vmem:[#allocation4_spill] sm:$0xff] %v5121_v20 }
 0x192   : > { %v1642_v19 = vadd.f32 %v4966_v21, %v1586_v18 }
 0x194   : > { %v1694_v22 = vmax.f32 %v1642_v19, 0.0 }
 0x195   : > { %v1015_v24 = vpop.f32.mrf.mxu0  ;;  %v1284_v25 = vpop.f32.mrf.mxu1 }
 0x196   : > { %v1746_v27 = vpack.c.bf16 %v1694_v22, %v1694_v22  ;;  %v1499_v28 = vmax.f32 %v1015_v24, %v1284_v25  ;;  %v4579_v25 = vld [vmem:[%s4882_s20 + $0xd8] sm:$0xff] }
 0x198   : > { %v1842_v30 = vunpack.c.l.b16 %v1746_v27  ;;  %v1587_v31 = vmax.f32 %v1495_v26, %v1499_v28  ;;  %4053 = vmatmul.msk.bf16.gmra.mxu0 %vm767_vm1, %v4575_v23  ;;  %4105 = vmatmul.msk.bf16.gmra.mxu1 %vm767_vm1, %v4575_v23 }
 0x19a   : > { %v5093_v33 = vpack.c.b16 %v1842_v30, %v1841_v29  ;;  %v1643_v34 = vadd.f32 %v4966_v21, %v1587_v31 }
 0x19c   : > { %2267 = vmatmul.bf16.gmra.mxu2 %v5093_v33  ;;  %2372 = vmatmul.bf16.gmra.mxu3 %v5093_v33  ;;  %v1695_v40 = vmax.f32 %v1643_v34, 0.0 }
 0x19d   : > { %v1017_v35 = vpop.f32.mrf.mxu0  ;;  %v1286_v36 = vpop.f32.mrf.mxu1 }
 0x19e   : > { %v1500_v38 = vmax.f32 %v1017_v35, %v1286_v36  ;;  %v1747_v47 = vpack.c.bf16 %v1695_v40, %v1695_v40 }
 0x19f   : > { %v2353_v39 = vpop.f32.mrf.mxu3  ;;  %v2248_v36 = vpop.f32.mrf.mxu2 }
 0x1a0   : > { %v1588_v43 = vmax.f32 %v1496_v37, %v1500_v38  ;;  %v5098_v44 = vadd.f32 %v2353_v39, %v2238_v32  ;;  %v1843_v55 = vunpack.c.l.b16 %v1747_v47 }
 0x1a2   : > { %v1644_v45 = vadd.f32 %v4966_v21, %v1588_v43 }
 0x1a4   : > { %v1696_v48 = vmax.f32 %v1644_v45, 0.0 }
 0x1a5   : > { %v1020_v50 = vpop.f32.mrf.mxu0  ;;  %v1289_v51 = vpop.f32.mrf.mxu1 }
 0x1a6   : > { %v1748_v52 = vpack.c.bf16 %v1696_v48, %v1696_v48  ;;  %v1501_v10 = vmax.f32 %v1020_v50, %v1289_v51 }
 0x1a7   : > { %v5104_v54 = vpop.f32.mrf.mxu3 }
 0x1a8   : > { %6714 = vst [vmem:[#allocation3_spill] sm:$0xff] %v5104_v54  ;;  %v1844_v56 = vunpack.c.l.b16 %v1748_v52  ;;  %4054 = vmatmul.msk.bf16.gmra.mxu0 %vm767_vm1, %v4576_v49  ;;  %4106 = vmatmul.msk.bf16.gmra.mxu1 %vm767_vm1, %v4576_v49  ;;  %v5137_v52 = vpop.f32.mrf.mxu2 }
 0x1a9   : > { %6717 = vst [vmem:[#allocation6_spill] sm:$0xff] %v5137_v52 }
 0x1aa   : > { %v5108_v57 = vpack.c.b16 %v1844_v56, %v1843_v55 }
 0x1ac   : > { %2272 = vmatmul.bf16.gmra.mxu2 %v5108_v57  ;;  %2377 = vmatmul.bf16.gmra.mxu3 %v5108_v57 }
 0x1ad   : > { %v1022_v58 = vpop.f32.mrf.mxu0  ;;  %v1291_v59 = vpop.f32.mrf.mxu1 }
 0x1ae   : > { %v1502_v16 = vmax.f32 %v1022_v58, %v1291_v59  ;;  %v4580_v58 = vld [vmem:[%s4882_s20 + $0xe0] sm:$0xff] }
 0x1af   : > { %v2358_v62 = vpop.f32.mrf.mxu3 }
 0x1b0   : > { %v5112_v63 = vadd.f32 %v2358_v62, %v2243_v61 }
 0x1b5   : > { %v1025_v1 = vpop.f32.mrf.mxu0  ;;  %v1294_v2 = vpop.f32.mrf.mxu1 }
 0x1b6   : > { %v1503_v28 = vmax.f32 %v1025_v1, %v1294_v2 }
 0x1b7   : > { %v5125_v31 = vpop.f32.mrf.mxu3 }
 0x1b8   : > { %4055 = vmatmul.msk.bf16.gmra.mxu0 %vm767_vm1, %v4577_v0  ;;  %4107 = vmatmul.msk.bf16.gmra.mxu1 %vm767_vm1, %v4577_v0  ;;  %6716 = vst [vmem:[#allocation5_spill] sm:$0xff] %v5125_v31 }
 0x1bd   : > { %v1027_v3 = vpop.f32.mrf.mxu0  ;;  %v1296_v4 = vpop.f32.mrf.mxu1 }
 0x1be   : > { %v1504_v43 = vmax.f32 %v1027_v3, %v1296_v4 }
 0x1c5   : > { %v1030_v8 = vpop.f32.mrf.mxu0  ;;  %v1299_v9 = vpop.f32.mrf.mxu1 }
 0x1c6   : > { %v1505_v11 = vmax.f32 %v1030_v8, %v1299_v9  ;;  %v2253_v8 = vpop.f32.mrf.mxu2 }
 0x1c8   : > { %v1589_v12 = vmax.f32 %v1501_v10, %v1505_v11  ;;  %4056 = vmatmul.msk.bf16.gmra.mxu0 %vm767_vm1, %v4578_v5  ;;  %4108 = vmatmul.msk.bf16.gmra.mxu1 %vm767_vm1, %v4578_v5  ;;  %v4581_v11 = vld [vmem:[%s4882_s20 + $0xe8] sm:$0xff] }
 0x1ca   : > { %v1645_v13 = vadd.f32 %v4966_v21, %v1589_v12 }
 0x1cc   : > { %v1697_v18 = vmax.f32 %v1645_v13, 0.0 }
 0x1cd   : > { %v1032_v14 = vpop.f32.mrf.mxu0  ;;  %v1301_v15 = vpop.f32.mrf.mxu1 }
 0x1ce   : > { %v1506_v17 = vmax.f32 %v1032_v14, %v1301_v15  ;;  %v1749_v23 = vpack.c.bf16 %v1697_v18, %v1697_v18 }
 0x1d0   : > { %v1590_v19 = vmax.f32 %v1502_v16, %v1506_v17  ;;  %v1845_v32 = vunpack.c.l.b16 %v1749_v23  ;;  %v4582_v16 = vld [vmem:[%s4882_s20 + $0xf0] sm:$0xff] }
 0x1d2   : > { %v1646_v22 = vadd.f32 %v4966_v21, %v1590_v19 }
 0x1d4   : > { %v1698_v24 = vmax.f32 %v1646_v22, 0.0 }
 0x1d5   : > { %v1035_v26 = vpop.f32.mrf.mxu0  ;;  %v1304_v27 = vpop.f32.mrf.mxu1 }
 0x1d6   : > { %v1750_v29 = vpack.c.bf16 %v1698_v24, %v1698_v24  ;;  %v1507_v30 = vmax.f32 %v1035_v26, %v1304_v27 }
 0x1d8   : > { %v1846_v34 = vunpack.c.l.b16 %v1750_v29  ;;  %v1591_v35 = vmax.f32 %v1503_v28, %v1507_v30  ;;  %4057 = vmatmul.msk.bf16.gmra.mxu0 %vm767_vm1, %v4579_v25  ;;  %4109 = vmatmul.msk.bf16.gmra.mxu1 %vm767_vm1, %v4579_v25 }
 0x1da   : > { %v5129_v37 = vpack.c.b16 %v1846_v34, %v1845_v32  ;;  %v1647_v38 = vadd.f32 %v4966_v21, %v1591_v35  ;;  %v5157_v32 = vpop.f32.mrf.mxu2 }
 0x1db   : > { %6719 = vst [vmem:[#allocation8_spill] sm:$0xff] %v5157_v32 }
 0x1dc   : > { %2277 = vmatmul.bf16.gmra.mxu2 %v5129_v37  ;;  %2382 = vmatmul.bf16.gmra.mxu3 %v5129_v37  ;;  %v1699_v48 = vmax.f32 %v1647_v38, 0.0  ;;  %v4583_v38 = vld [vmem:[%s4882_s20 + $0xf8] sm:$0xff] }
 0x1dd   : > { %v1037_v39 = vpop.f32.mrf.mxu0  ;;  %v1306_v40 = vpop.f32.mrf.mxu1 }
 0x1de   : > { %v1508_v45 = vmax.f32 %v1037_v39, %v1306_v40  ;;  %v1751_v55 = vpack.c.bf16 %v1699_v48, %v1699_v48 }
 0x1df   : > { %v2363_v47 = vpop.f32.mrf.mxu3 }
 0x1e0   : > { %v1592_v49 = vmax.f32 %v1504_v43, %v1508_v45  ;;  %v5134_v50 = vadd.f32 %v2363_v47, %v2248_v36  ;;  %v1847_v1 = vunpack.c.l.b16 %v1751_v55 }
 0x1e2   : > { %v1648_v51 = vadd.f32 %v4966_v21, %v1592_v49 }
 0x1e4   : > { %v1700_v56 = vmax.f32 %v1648_v51, 0.0 }
 0x1e5   : > { %v1040_v59 = vpop.f32.mrf.mxu0  ;;  %v1309_v61 = vpop.f32.mrf.mxu1 }
 0x1e6   : > { %v1752_v62 = vpack.c.bf16 %v1700_v56, %v1700_v56  ;;  %v1509_v19 = vmax.f32 %v1040_v59, %v1309_v61  ;;  %v2258_v56 = vpop.f32.mrf.mxu2 }
 0x1e7   : > { %v5140_v0 = vpop.f32.mrf.mxu3 }
 0x1e8   : > { %6718 = vst [vmem:[#allocation7_spill] sm:$0xff] %v5140_v0  ;;  %v1848_v2 = vunpack.c.l.b16 %v1752_v62  ;;  %4058 = vmatmul.msk.bf16.gmra.mxu0 %vm767_vm1, %v4580_v58  ;;  %4110 = vmatmul.msk.bf16.gmra.mxu1 %vm767_vm1, %v4580_v58 }
 0x1ea   : > { %v5144_v3 = vpack.c.b16 %v1848_v2, %v1847_v1 }
 0x1ec   : > { %2282 = vmatmul.bf16.gmra.mxu2 %v5144_v3  ;;  %2387 = vmatmul.bf16.gmra.mxu3 %v5144_v3 }
 0x1ed   : > { %v1042_v4 = vpop.f32.mrf.mxu0  ;;  %v1311_v5 = vpop.f32.mrf.mxu1 }
 0x1ee   : > { %v1510_v27 = vmax.f32 %v1042_v4, %v1311_v5 }
 0x1ef   : > { %v2368_v9 = vpop.f32.mrf.mxu3 }
 0x1f0   : > { %v5148_v10 = vadd.f32 %v2368_v9, %v2253_v8 }
 0x1f5   : > { %v1045_v12 = vpop.f32.mrf.mxu0  ;;  %v1314_v13 = vpop.f32.mrf.mxu1 }
 0x1f6   : > { %v1511_v43 = vmax.f32 %v1045_v12, %v1314_v13  ;;  %v5173_v12 = vpop.f32.mrf.mxu2 }
 0x1f7   : > { %v5161_v48 = vpop.f32.mrf.mxu3  ;;  %6721 = vst [vmem:[#allocation10_spill] sm:$0xff] %v5173_v12 }
 0x1f8   : > { %4059 = vmatmul.msk.bf16.gmra.mxu0 %vm767_vm1, %v4581_v11  ;;  %4111 = vmatmul.msk.bf16.gmra.mxu1 %vm767_vm1, %v4581_v11  ;;  %6720 = vst [vmem:[#allocation9_spill] sm:$0xff] %v5161_v48 }
 0x1fd   : > { %v1047_v14 = vpop.f32.mrf.mxu0  ;;  %v1316_v15 = vpop.f32.mrf.mxu1 }
 0x1fe   : > { %v1512_v1 = vmax.f32 %v1047_v14, %v1316_v15 }
 0x205   : > { %v1050_v17 = vpop.f32.mrf.mxu0  ;;  %v1319_v18 = vpop.f32.mrf.mxu1 }
 0x206   : > { %v1513_v22 = vmax.f32 %v1050_v17, %v1319_v18  ;;  %v4584_v17 = vld [vmem:[%s4882_s20 + $0x100] sm:$0xff] }
 0x208   : > { %v1593_v23 = vmax.f32 %v1509_v19, %v1513_v22  ;;  %4060 = vmatmul.msk.bf16.gmra.mxu0 %vm767_vm1, %v4582_v16  ;;  %4112 = vmatmul.msk.bf16.gmra.mxu1 %vm767_vm1, %v4582_v16 }
 0x20a   : > { %v1649_v24 = vadd.f32 %v4966_v21, %v1593_v23 }
 0x20c   : > { %v1701_v29 = vmax.f32 %v1649_v24, 0.0 }
 0x20d   : > { %v1052_v25 = vpop.f32.mrf.mxu0  ;;  %v1321_v26 = vpop.f32.mrf.mxu1 }
 0x20e   : > { %v1514_v28 = vmax.f32 %v1052_v25, %v1321_v26  ;;  %v1753_v35 = vpack.c.bf16 %v1701_v29, %v1701_v29 }
 0x210   : > { %v1594_v30 = vmax.f32 %v1510_v27, %v1514_v28  ;;  %v1849_v49 = vunpack.c.l.b16 %v1753_v35  ;;  %v2263_v27 = vpop.f32.mrf.mxu2 }
 0x212   : > { %v1650_v34 = vadd.f32 %v4966_v21, %v1594_v30  ;;  %v4585_v30 = vld [vmem:[%s4882_s20 + $0x108] sm:$0xff] }
 0x214   : > { %v1702_v36 = vmax.f32 %v1650_v34, 0.0 }
 0x215   : > { %v1055_v39 = vpop.f32.mrf.mxu0  ;;  %v1324_v40 = vpop.f32.mrf.mxu1 }
 0x216   : > { %v1754_v45 = vpack.c.bf16 %v1702_v36, %v1702_v36  ;;  %v1515_v47 = vmax.f32 %v1055_v39, %v1324_v40  ;;  %v4320_v39 = vld [vmem:[%s6693_s3 + $0x170] sm:$0xf]  ;;  %v4661_v40 = vld [vmem:[%s6693_s3 + $0x174] sm:$0xf0] }
 0x218   : > { %v1850_v51 = vunpack.c.l.b16 %v1754_v45  ;;  %v1595_v55 = vmax.f32 %v1511_v43, %v1515_v47  ;;  %4061 = vmatmul.msk.bf16.gmra.mxu0 %vm767_vm1, %v4583_v38  ;;  %4113 = vmatmul.msk.bf16.gmra.mxu1 %vm767_vm1, %v4583_v38  ;;  %v4628_v43 = vld [vmem:[%s6693_s3 + $0x74] sm:$0xf]  ;;  %v4321_v45 = vor.u32 %v4661_v40, %v4320_v39  ;;  %v4194_v47 = vld [vmem:[%s6693_s3 + $0x78] sm:$0xf0] }
 0x21a   : > { %v5165_v58 = vpack.c.b16 %v1850_v51, %v1849_v49  ;;  %v1651_v59 = vadd.f32 %v4966_v21, %v1595_v55  ;;  %v4197_v49 = vor.u32 %v4628_v43, %v4194_v47  ;;  %2459 = vmatpush.bf16.msrb.mxu2 %v4321_v45  ;;  %v4586_v51 = vld [vmem:[%s4882_s20 + $0x110] sm:$0xff] }
 0x21c   : > { %2287 = vmatmul.bf16.gmra.mxu2 %v5165_v58  ;;  %2392 = vmatmul.bf16.gmra.mxu3 %v5165_v58  ;;  %v1703_v5 = vmax.f32 %v1651_v59, 0.0 }
 0x21d   : > { %v1057_v61 = vpop.f32.mrf.mxu0  ;;  %v1326_v62 = vpop.f32.mrf.mxu1  ;;  %2574 = vmatpush.bf16.msrb.mxu3 %v4197_v49 }
 0x21e   : > { %v1516_v2 = vmax.f32 %v1057_v61, %v1326_v62  ;;  %v1755_v13 = vpack.c.bf16 %v1703_v5, %v1703_v5 }
 0x21f   : > { %v2373_v4 = vpop.f32.mrf.mxu3 }
 0x220   : > { %v1596_v8 = vmax.f32 %v1512_v1, %v1516_v2  ;;  %v5170_v9 = vadd.f32 %v2373_v4, %v2258_v56  ;;  %v1851_v14 = vunpack.c.l.b16 %v1755_v13 }
 0x222   : > { %v1652_v11 = vadd.f32 %v4966_v21, %v1596_v8 }
 0x224   : > { %v1704_v16 = vmax.f32 %v1652_v11, 0.0 }
 0x225   : > { %v1060_v18 = vpop.f32.mrf.mxu0  ;;  %v1329_v19 = vpop.f32.mrf.mxu1 }
 0x226   : > { %v1756_v22 = vpack.c.bf16 %v1704_v16, %v1704_v16  ;;  %v1517_v59 = vmax.f32 %v1060_v18, %v1329_v19  ;;  %v5205_v16 = vpop.f32.mrf.mxu2 }
 0x227   : > { %v5176_v23 = vpop.f32.mrf.mxu3  ;;  %6723 = vst [vmem:[#allocation12_spill] sm:$0xff] %v5205_v16 }
 0x228   : > { %6722 = vst [vmem:[#allocation11_spill] sm:$0xff] %v5176_v23  ;;  %v1852_v15 = vunpack.c.l.b16 %v1756_v22  ;;  %4062 = vmatmul.msk.bf16.gmra.mxu0 %vm767_vm1, %v4584_v17  ;;  %4114 = vmatmul.msk.bf16.gmra.mxu1 %vm767_vm1, %v4584_v17  ;;  %v4587_v22 = vld [vmem:[%s4882_s20 + $0x118] sm:$0xff] }
 0x22a   : > { %v5180_v24 = vpack.c.b16 %v1852_v15, %v1851_v14 }
 0x22c   : > { %2292 = vmatmul.bf16.gmra.mxu2 %v5180_v24  ;;  %2397 = vmatmul.bf16.gmra.mxu3 %v5180_v24 }
 0x22d   : > { %v1062_v25 = vpop.f32.mrf.mxu0  ;;  %v1331_v26 = vpop.f32.mrf.mxu1 }
 0x22e   : > { %v1518_v5 = vmax.f32 %v1062_v25, %v1331_v26  ;;  %v2268_v26 = vpop.f32.mrf.mxu2 }
 0x22f   : > { %v2378_v28 = vpop.f32.mrf.mxu3 }
 0x230   : > { %v5184_v29 = vadd.f32 %v2378_v28, %v2263_v27 }
 0x235   : > { %v1065_v34 = vpop.f32.mrf.mxu0  ;;  %v1334_v35 = vpop.f32.mrf.mxu1 }
 0x236   : > { %v1519_v27 = vmax.f32 %v1065_v34, %v1334_v35 }
 0x237   : > { %v5209_v39 = vpop.f32.mrf.mxu3 }
 0x238   : > { %4063 = vmatmul.msk.bf16.gmra.mxu0 %vm767_vm1, %v4585_v30  ;;  %4115 = vmatmul.msk.bf16.gmra.mxu1 %vm767_vm1, %v4585_v30  ;;  %6724 = vst [vmem:[#allocation13_spill] sm:$0xff] %v5209_v39 }
 0x23d   : > { %v1067_v36 = vpop.f32.mrf.mxu0  ;;  %v1336_v38 = vpop.f32.mrf.mxu1 }
 0x23e   : > { %v1520_v49 = vmax.f32 %v1067_v36, %v1336_v38 }
 0x245   : > { %v1070_v55 = vpop.f32.mrf.mxu0  ;;  %v1339_v56 = vpop.f32.mrf.mxu1 }
 0x246   : > { %v1521_v61 = vmax.f32 %v1070_v55, %v1339_v56 }
 0x248   : > { %v1597_v62 = vmax.f32 %v1517_v59, %v1521_v61  ;;  %4064 = vmatmul.msk.bf16.gmra.mxu0 %vm767_vm1, %v4586_v51  ;;  %4116 = vmatmul.msk.bf16.gmra.mxu1 %vm767_vm1, %v4586_v51 }
 0x24a   : > { %v1653_v1 = vadd.f32 %v4966_v21, %v1597_v62 }
 0x24c   : > { %v1705_v11 = vmax.f32 %v1653_v1, 0.0  ;;  %v5221_v1 = vpop.f32.mrf.mxu2 }
 0x24d   : > { %v1072_v2 = vpop.f32.mrf.mxu0  ;;  %v1341_v4 = vpop.f32.mrf.mxu1  ;;  %6725 = vst [vmem:[#allocation14_spill] sm:$0xff] %v5221_v1 }
 0x24e   : > { %v1522_v8 = vmax.f32 %v1072_v2, %v1341_v4  ;;  %v1757_v18 = vpack.c.bf16 %v1705_v11, %v1705_v11 }
 0x250   : > { %v1598_v13 = vmax.f32 %v1518_v5, %v1522_v8  ;;  %v1853_v40 = vunpack.c.l.b16 %v1757_v18  ;;  %v4588_v5 = vld [vmem:[%s4882_s20 + $0x120] sm:$0xff] }
 0x252   : > { %v1654_v17 = vadd.f32 %v4966_v21, %v1598_v13 }
 0x254   : > { %v1706_v19 = vmax.f32 %v1654_v17, 0.0 }
 0x255   : > { %v1075_v14 = vpop.f32.mrf.mxu0  ;;  %v1344_v15 = vpop.f32.mrf.mxu1 }
 0x256   : > { %v1758_v28 = vpack.c.bf16 %v1706_v19, %v1706_v19  ;;  %v1523_v30 = vmax.f32 %v1075_v14, %v1344_v15 }
 0x258   : > { %v1854_v43 = vunpack.c.l.b16 %v1758_v28  ;;  %v1599_v25 = vmax.f32 %v1519_v27, %v1523_v30  ;;  %4065 = vmatmul.msk.bf16.gmra.mxu0 %vm767_vm1, %v4587_v22  ;;  %4117 = vmatmul.msk.bf16.gmra.mxu1 %vm767_vm1, %v4587_v22  ;;  %v2273_v22 = vpop.f32.mrf.mxu2  ;;  %v4312_v27 = vld [vmem:[%s6693_s3 + $0x160] sm:$0xf]  ;;  %v4659_v28 = vld [vmem:[%s6693_s3 + $0x164] sm:$0xf0]  ;;  %v4626_v30 = vld [vmem:[%s6693_s3 + $0x64] sm:$0xf] }
 0x25a   : > { %v5213_v45 = vpack.c.b16 %v1854_v43, %v1853_v40  ;;  %v1655_v47 = vadd.f32 %v4966_v21, %v1599_v25  ;;  %v4313_v40 = vor.u32 %v4659_v28, %v4312_v27  ;;  %v4186_v43 = vld [vmem:[%s6693_s3 + $0x68] sm:$0xf0]  ;;  %v4657_v27 = vld [vmem:[%s6693_s3 + $0x154] sm:$0xf0]  ;;  %v4624_v28 = vld [vmem:[%s6693_s3 + $0x54] sm:$0xf] }
 0x25b   : > { %v4189_v25 = vor.u32 %v4626_v30, %v4186_v43 }
 0x25c   : > { %2297 = vmatmul.bf16.gmra.mxu2 %v5213_v45  ;;  %2402 = vmatmul.bf16.gmra.mxu3 %v5213_v45  ;;  %v1707_v56 = vmax.f32 %v1655_v47, 0.0 }
 0x25d   : > { %v1077_v34 = vpop.f32.mrf.mxu0  ;;  %v1346_v35 = vpop.f32.mrf.mxu1  ;;  %2460 = vmatpush.bf16.msrb.mxu2 %v4313_v40  ;;  %2575 = vmatpush.bf16.msrb.mxu3 %v4189_v25 }
 0x25e   : > { %v1524_v51 = vmax.f32 %v1077_v34, %v1346_v35  ;;  %v1759_v2 = vpack.c.bf16 %v1707_v56, %v1707_v56 }
 0x25f   : > { %v2383_v55 = vpop.f32.mrf.mxu3 }
 0x260   : > { %v1600_v59 = vmax.f32 %v1520_v49, %v1524_v51  ;;  %v5218_v61 = vadd.f32 %v2383_v55, %v2268_v26  ;;  %v1855_v18 = vunpack.c.l.b16 %v1759_v2  ;;  %v4589_v26 = vld [vmem:[%s4882_s20 + $0x128] sm:$0xff]  ;;  %v4590_v51 = vld [vmem:[%s4882_s20 + $0x130] sm:$0xff] }
 0x262   : > { %v1656_v62 = vadd.f32 %v4966_v21, %v1600_v59 }
 0x264   : > { %v1708_v4 = vmax.f32 %v1656_v62, 0.0 }
 0x265   : > { %v1080_v8 = vpop.f32.mrf.mxu0  ;;  %v1349_v11 = vpop.f32.mrf.mxu1 }
 0x266   : > { %v1760_v13 = vpack.c.bf16 %v1708_v4, %v1708_v4  ;;  %v1525_v59 = vmax.f32 %v1080_v8, %v1349_v11  ;;  %v5255_v4 = vld [vmem:[%s6692_s2] ss:$0 sm:$0xff]  ;;  %v4304_v11 = vld [vmem:[%s6693_s3 + $0x150] sm:$0xf] }
 0x267   : > { %v5224_v17 = vpop.f32.mrf.mxu3  ;;  %v4305_v30 = vor.u32 %v4657_v27, %v4304_v11 }
 0x268   : > { %6726 = vst [vmem:[#allocation15_spill] sm:$0xff] %v5224_v17  ;;  %v1856_v36 = vunpack.c.l.b16 %v1760_v13  ;;  %4066 = vmatmul.msk.bf16.gmra.mxu0 %vm767_vm1, %v4588_v5  ;;  %4118 = vmatmul.msk.bf16.gmra.mxu1 %vm767_vm1, %v4588_v5 }
 0x269   : > { %2461 = vmatpush.bf16.msrb.mxu2 %v4305_v30 }
 0x26a   : > { %v5228_v38 = vpack.c.b16 %v1856_v36, %v1855_v18 }
 0x26c   : > { %2302 = vmatmul.bf16.gmra.mxu2 %v5228_v38  ;;  %2407 = vmatmul.bf16.gmra.mxu3 %v5228_v38 }
 0x26d   : > { %v1082_v21 = vpop.f32.mrf.mxu0  ;;  %v1351_v19 = vpop.f32.mrf.mxu1 }
 0x26e   : > { %v1526_v36 = vmax.f32 %v1082_v21, %v1351_v19  ;;  %v4178_v21 = vld [vmem:[%s6693_s3 + $0x58] sm:$0xf0]  ;;  %v5270_v19 = vpop.f32.mrf.mxu2 }
 0x26f   : > { %v2388_v14 = vpop.f32.mrf.mxu3  ;;  %6727 = vst [vmem:[#allocation16_spill] sm:$0xff] %v5270_v19  ;;  %v4181_v43 = vor.u32 %v4624_v28, %v4178_v21  ;;  %v4595_v19 = vld [vmem:[%s4882_s20 + $0x158] sm:$0xff] }
 0x270   : > { %v5232_v15 = vadd.f32 %v2388_v14, %v2273_v22 }
 0x271   : > { %2576 = vmatpush.bf16.msrb.mxu3 %v4181_v43 }
 0x275   : > { %v1085_v47 = vpop.f32.mrf.mxu0  ;;  %v1354_v34 = vpop.f32.mrf.mxu1 }
 0x278   : > { %4067 = vmatmul.msk.bf16.gmra.mxu0 %vm767_vm1, %v4589_v26  ;;  %4119 = vmatmul.msk.bf16.gmra.mxu1 %vm767_vm1, %v4589_v26 }
 0x27d   : > { %v1087_v35 = vpop.f32.mrf.mxu0  ;;  %v1356_v49 = vpop.f32.mrf.mxu1 }
 0x27e   : > { %v1528_v11 = vmax.f32 %v1087_v35, %v1356_v49 }
 0x285   : > { %v1090_v55 = vpop.f32.mrf.mxu0  ;;  %v1359_v56 = vpop.f32.mrf.mxu1 }
 0x286   : > { %v1529_v62 = vmax.f32 %v1090_v55, %v1359_v56 }
 0x288   : > { %v1601_v2 = vmax.f32 %v1525_v59, %v1529_v62  ;;  %4068 = vmatmul.msk.bf16.gmra.mxu0 %vm767_vm1, %v4590_v51  ;;  %4120 = vmatmul.msk.bf16.gmra.mxu1 %vm767_vm1, %v4590_v51  ;;  %v4591_v51 = vld [vmem:[%s4882_s20 + $0x138] sm:$0xff]  ;;  %v1527_v59 = vmax.f32 %v1085_v47, %v1354_v34 }
 0x28a   : > { %v1657_v5 = vadd.f32 %v5255_v4, %v1601_v2 }
 0x28c   : > { %v1709_v14 = vmax.f32 %v1657_v5, 0.0  ;;  %v5274_v5 = vpop.f32.mrf.mxu3 }
 0x28d   : > { %v1092_v13 = vpop.f32.mrf.mxu0  ;;  %v1361_v18 = vpop.f32.mrf.mxu1  ;;  %6728 = vst [vmem:[#allocation17_spill] sm:$0xff] %v5274_v5 }
 0x28e   : > { %v1530_v22 = vmax.f32 %v1092_v13, %v1361_v18  ;;  %v1761_v25 = vpack.c.bf16 %v1709_v14, %v1709_v14 }
 0x290   : > { %v1602_v8 = vmax.f32 %v1526_v36, %v1530_v22  ;;  %v1857_v13 = vunpack.c.l.b16 %v1761_v25  ;;  %v2278_v22 = vpop.f32.mrf.mxu2 }
 0x292   : > { %v1658_v40 = vadd.f32 %v5255_v4, %v1602_v8 }
 0x294   : > { %v1710_v26 = vmax.f32 %v1658_v40, 0.0 }
 0x295   : > { %v1095_v55 = vpop.f32.mrf.mxu0  ;;  %v1364_v56 = vpop.f32.mrf.mxu1 }
 0x296   : > { %v1762_v62 = vpack.c.bf16 %v1710_v26, %v1710_v26  ;;  %v1531_v2 = vmax.f32 %v1095_v55, %v1364_v56  ;;  %v4592_v55 = vld [vmem:[%s4882_s20 + $0x140] sm:$0xff] }
 0x298   : > { %v1858_v18 = vunpack.c.l.b16 %v1762_v62  ;;  %v1603_v36 = vmax.f32 %v1527_v59, %v1531_v2  ;;  %4069 = vmatmul.msk.bf16.gmra.mxu0 %vm767_vm1, %v4591_v51  ;;  %4121 = vmatmul.msk.bf16.gmra.mxu1 %vm767_vm1, %v4591_v51  ;;  %v5286_v25 = vpop.f32.mrf.mxu2 }
 0x299   : > { %6729 = vst [vmem:[#allocation18_spill] sm:$0xff] %v5286_v25 }
 0x29a   : > { %v5278_v8 = vpack.c.b16 %v1858_v18, %v1857_v13  ;;  %v1659_v14 = vadd.f32 %v5255_v4, %v1603_v36 }
 0x29c   : > { %2307 = vmatmul.bf16.gmra.mxu2 %v5278_v8  ;;  %2412 = vmatmul.bf16.gmra.mxu3 %v5278_v8  ;;  %v1711_v30 = vmax.f32 %v1659_v14, 0.0 }
 0x29d   : > { %v1097_v47 = vpop.f32.mrf.mxu0  ;;  %v1366_v34 = vpop.f32.mrf.mxu1 }
 0x29e   : > { %v1532_v27 = vmax.f32 %v1097_v47, %v1366_v34  ;;  %v1763_v26 = vpack.c.bf16 %v1711_v30, %v1711_v30  ;;  %v4593_v34 = vld [vmem:[%s4882_s20 + $0x148] sm:$0xff] }
 0x29f   : > { %v2393_v28 = vpop.f32.mrf.mxu3 }
 0x2a0   : > { %v1604_v21 = vmax.f32 %v1528_v11, %v1532_v27  ;;  %v5283_v40 = vadd.f32 %v2393_v28, %v2278_v22  ;;  %v1859_v35 = vunpack.c.l.b16 %v1763_v26  ;;  %v2283_v22 = vpop.f32.mrf.mxu2 }
 0x2a2   : > { %v1660_v43 = vadd.f32 %v5255_v4, %v1604_v21  ;;  %v4594_v21 = vld [vmem:[%s4882_s20 + $0x150] sm:$0xff] }
 0x2a4   : > { %v1712_v51 = vmax.f32 %v1660_v43, 0.0 }
 0x2a5   : > { %v1100_v56 = vpop.f32.mrf.mxu0  ;;  %v1369_v59 = vpop.f32.mrf.mxu1 }
 0x2a6   : > { %v1764_v62 = vpack.c.bf16 %v1712_v51, %v1712_v51  ;;  %v1533_v51 = vmax.f32 %v1100_v56, %v1369_v59  ;;  %v4170_v56 = vld [vmem:[%s6693_s3 + $0x48] sm:$0xf0] }
 0x2a7   : > { %v5289_v2 = vpop.f32.mrf.mxu3 }
 0x2a8   : > { %6730 = vst [vmem:[#allocation19_spill] sm:$0xff] %v5289_v2  ;;  %v1860_v49 = vunpack.c.l.b16 %v1764_v62  ;;  %4070 = vmatmul.msk.bf16.gmra.mxu0 %vm767_vm1, %v4592_v55  ;;  %4122 = vmatmul.msk.bf16.gmra.mxu1 %vm767_vm1, %v4592_v55  ;;  %v5318_v25 = vpop.f32.mrf.mxu2 }
 0x2a9   : > { %6731 = vst [vmem:[#allocation20_spill] sm:$0xff] %v5318_v25 }
 0x2aa   : > { %v5293_v13 = vpack.c.b16 %v1860_v49, %v1859_v35  ;;  %v4296_v35 = vld [vmem:[%s6693_s3 + $0x140] sm:$0xf]  ;;  %v4655_v49 = vld [vmem:[%s6693_s3 + $0x144] sm:$0xf0] }
 0x2ac   : > { %2312 = vmatmul.bf16.gmra.mxu2 %v5293_v13  ;;  %2417 = vmatmul.bf16.gmra.mxu3 %v5293_v13 }
 0x2ad   : > { %v1102_v18 = vpop.f32.mrf.mxu0  ;;  %v1371_v36 = vpop.f32.mrf.mxu1 }
 0x2af   : > { %v2398_v14 = vpop.f32.mrf.mxu3 }
 0x2b0   : > { %v5297_v47 = vadd.f32 %v2398_v14, %v2283_v22  ;;  %v4622_v22 = vld [vmem:[%s6693_s3 + $0x44] sm:$0xf]  ;;  %v4297_v14 = vor.u32 %v4655_v49, %v4296_v35 }
 0x2b2   : > { %2462 = vmatpush.bf16.msrb.mxu2 %v4297_v14 }
 0x2b5   : > { %v1105_v11 = vpop.f32.mrf.mxu0  ;;  %v1374_v27 = vpop.f32.mrf.mxu1 }
 0x2b6   : > { %v1535_v39 = vmax.f32 %v1105_v11, %v1374_v27 }
 0x2b8   : > { %4071 = vmatmul.msk.bf16.gmra.mxu0 %vm767_vm1, %v4593_v34  ;;  %4123 = vmatmul.msk.bf16.gmra.mxu1 %vm767_vm1, %v4593_v34  ;;  %v4173_v34 = vor.u32 %v4622_v22, %v4170_v56  ;;  %v5322_v56 = vpop.f32.mrf.mxu3 }
 0x2b9   : > { %6732 = vst [vmem:[#allocation21_spill] sm:$0xff] %v5322_v56 }
 0x2ba   : > { %2577 = vmatpush.bf16.msrb.mxu3 %v4173_v34 }
 0x2bd   : > { %v1107_v28 = vpop.f32.mrf.mxu0  ;;  %v1376_v30 = vpop.f32.mrf.mxu1 }
 0x2c5   : > { %v1110_v43 = vpop.f32.mrf.mxu0  ;;  %v1379_v26 = vpop.f32.mrf.mxu1 }
 0x2c6   : > { %v1537_v55 = vmax.f32 %v1110_v43, %v1379_v26  ;;  %v1534_v26 = vmax.f32 %v1102_v18, %v1371_v36 }
 0x2c8   : > { %v1605_v62 = vmax.f32 %v1533_v51, %v1537_v55  ;;  %4072 = vmatmul.msk.bf16.gmra.mxu0 %vm767_vm1, %v4594_v21  ;;  %4124 = vmatmul.msk.bf16.gmra.mxu1 %vm767_vm1, %v4594_v21 }
 0x2ca   : > { %v1661_v59 = vadd.f32 %v5255_v4, %v1605_v62 }
 0x2cc   : > { %v1713_v55 = vmax.f32 %v1661_v59, 0.0  ;;  %v2288_v59 = vpop.f32.mrf.mxu2 }
 0x2cd   : > { %v1112_v21 = vpop.f32.mrf.mxu0  ;;  %v1381_v43 = vpop.f32.mrf.mxu1 }
 0x2ce   : > { %v1538_v51 = vmax.f32 %v1112_v21, %v1381_v43  ;;  %v1765_v49 = vpack.c.bf16 %v1713_v55, %v1713_v55 }
 0x2d0   : > { %v1606_v2 = vmax.f32 %v1534_v26, %v1538_v51  ;;  %v1861_v14 = vunpack.c.l.b16 %v1765_v49 }
 0x2d2   : > { %v1662_v35 = vadd.f32 %v5255_v4, %v1606_v2 }
 0x2d4   : > { %v1714_v5 = vmax.f32 %v1662_v35, 0.0  ;;  %v5334_v26 = vpop.f32.mrf.mxu2  ;;  %v4596_v35 = vld [vmem:[%s4882_s20 + $0x160] sm:$0xff] }
 0x2d5   : > { %v1115_v17 = vpop.f32.mrf.mxu0  ;;  %v1384_v1 = vpop.f32.mrf.mxu1  ;;  %6733 = vst [vmem:[#allocation22_spill] sm:$0xff] %v5334_v26 }
 0x2d6   : > { %v1766_v62 = vpack.c.bf16 %v1714_v5, %v1714_v5  ;;  %v1539_v22 = vmax.f32 %v1115_v17, %v1384_v1  ;;  %v1536_v5 = vmax.f32 %v1107_v28, %v1376_v30 }
 0x2d8   : > { %v1862_v18 = vunpack.c.l.b16 %v1766_v62  ;;  %v1607_v36 = vmax.f32 %v1535_v39, %v1539_v22  ;;  %4073 = vmatmul.msk.bf16.gmra.mxu0 %vm767_vm1, %v4595_v19  ;;  %4125 = vmatmul.msk.bf16.gmra.mxu1 %vm767_vm1, %v4595_v19 }
 0x2da   : > { %v5326_v34 = vpack.c.b16 %v1862_v18, %v1861_v14  ;;  %v1663_v2 = vadd.f32 %v5255_v4, %v1607_v36 }
 0x2dc   : > { %2317 = vmatmul.bf16.gmra.mxu2 %v5326_v34  ;;  %2422 = vmatmul.bf16.gmra.mxu3 %v5326_v34  ;;  %v1715_v39 = vmax.f32 %v1663_v2, 0.0  ;;  %v2293_v2 = vpop.f32.mrf.mxu2 }
 0x2dd   : > { %v1117_v1 = vpop.f32.mrf.mxu0  ;;  %v1386_v17 = vpop.f32.mrf.mxu1 }
 0x2de   : > { %v1540_v11 = vmax.f32 %v1117_v1, %v1386_v17  ;;  %v1767_v51 = vpack.c.bf16 %v1715_v39, %v1715_v39 }
 0x2df   : > { %v2403_v27 = vpop.f32.mrf.mxu3 }
 0x2e0   : > { %v1608_v21 = vmax.f32 %v1536_v5, %v1540_v11  ;;  %v5331_v43 = vadd.f32 %v2403_v27, %v2288_v59  ;;  %v1863_v18 = vunpack.c.l.b16 %v1767_v51  ;;  %v4288_v5 = vld [vmem:[%s6693_s3 + $0x130] sm:$0xf]  ;;  %v4653_v11 = vld [vmem:[%s6693_s3 + $0x134] sm:$0xf0]  ;;  %v4620_v27 = vld [vmem:[%s6693_s3 + $0x34] sm:$0xf] }
 0x2e1   : > { %v4289_v39 = vor.u32 %v4653_v11, %v4288_v5  ;;  %v4597_v51 = vld [vmem:[%s4882_s20 + $0x168] sm:$0xff]  ;;  %v4693_v11 = vld [vmem:[%s6695_s5 + $0xf4] sm:$0xf0] }
 0x2e2   : > { %v1664_v19 = vadd.f32 %v5255_v4, %v1608_v21  ;;  %v4162_v21 = vld [vmem:[%s6693_s3 + $0x38] sm:$0xf0] }
 0x2e3   : > { %2463 = vmatpush.bf16.msrb.mxu2 %v4289_v39  ;;  %v4598_v39 = vld [vmem:[%s4882_s20 + $0x170] sm:$0xff] }
 0x2e4   : > { %v1716_v55 = vmax.f32 %v1664_v19, 0.0  ;;  %v4165_v19 = vor.u32 %v4620_v27, %v4162_v21  ;;  %v5384_v23 = vpop.f32.mrf.mxu2 }
 0x2e5   : > { %v1120_v49 = vpop.f32.mrf.mxu0  ;;  %v1389_v62 = vpop.f32.mrf.mxu1  ;;  %6736 = vst [vmem:[#allocation25_spill] sm:$0xff] %v5384_v23 }
 0x2e6   : > { %v1768_v22 = vpack.c.bf16 %v1716_v55, %v1716_v55  ;;  %2578 = vmatpush.bf16.msrb.mxu3 %v4165_v19 }
 0x2e7   : > { %v5337_v14 = vpop.f32.mrf.mxu3 }
 0x2e8   : > { %6734 = vst [vmem:[#allocation23_spill] sm:$0xff] %v5337_v14  ;;  %v1864_v28 = vunpack.c.l.b16 %v1768_v22  ;;  %4074 = vmatmul.msk.bf16.gmra.mxu0 %vm767_vm1, %v4596_v35  ;;  %4126 = vmatmul.msk.bf16.gmra.mxu1 %vm767_vm1, %v4596_v35 }
 0x2ea   : > { %v5341_v30 = vpack.c.b16 %v1864_v28, %v1863_v18  ;;  %v4384_v28 = vld [vmem:[%s6695_s5 + $0x70] sm:$0xf] }
 0x2ec   : > { %2322 = vmatmul.bf16.gmra.mxu2 %v5341_v30  ;;  %2427 = vmatmul.bf16.gmra.mxu3 %v5341_v30 }
 0x2ed   : > { %v1122_v36 = vpop.f32.mrf.mxu0  ;;  %v1391_v59 = vpop.f32.mrf.mxu1 }
 0x2ef   : > { %v2408_v1 = vpop.f32.mrf.mxu3 }
 0x2f0   : > { %v5345_v17 = vadd.f32 %v2408_v1, %v2293_v2  ;;  %v4677_v2 = vld [vmem:[%s6695_s5 + $0x74] sm:$0xf0]  ;;  %v4448_v1 = vld [vmem:[%s6695_s5 + $0xf0] sm:$0xf] }
 0x2f1   : > { %v5371_v5 = vor.u32 %v4677_v2, %v4384_v28  ;;  %v5376_v27 = vor.u32 %v4693_v11, %v4448_v1  ;;  %v1542_v11 = vmax.f32 %v1122_v36, %v1391_v59 }
 0x2f3   : > { %6735 = vst [vmem:[#allocation24_spill] sm:$0xff] %v5376_v27  ;;  %3391 = vmatpush.bf16.msrb.mxu0 %v5371_v5  ;;  %3426 = vmatpush.bf16.msrb.mxu1 %v5376_v27 }
 0x2f5   : > { %v1125_v55 = vpop.f32.mrf.mxu0  ;;  %v1394_v35 = vpop.f32.mrf.mxu1 }
 0x2f7   : > { %v5394_v36 = vpop.f32.mrf.mxu3 }
 0x2f8   : > { %4075 = vmatmul.msk.bf16.gmra.mxu0 %vm767_vm1, %v4597_v51  ;;  %4127 = vmatmul.msk.bf16.gmra.mxu1 %vm767_vm1, %v4597_v51  ;;  %v1541_v51 = vmax.f32 %v1120_v49, %v1389_v62  ;;  %6737 = vst [vmem:[#allocation26_spill] sm:$0xff] %v5394_v36 }
 0x2fd   : > { %v1127_v22 = vpop.f32.mrf.mxu0  ;;  %v1396_v18 = vpop.f32.mrf.mxu1 }
 0x305   : > { %v1130_v21 = vpop.f32.mrf.mxu0  ;;  %v1399_v19 = vpop.f32.mrf.mxu1 }
 0x306   : > { %v1545_v14 = vmax.f32 %v1130_v21, %v1399_v19  ;;  %v4599_v21 = vld [vmem:[%s4882_s20 + $0x178] sm:$0xff] }
 0x308   : > { %v1609_v26 = vmax.f32 %v1541_v51, %v1545_v14  ;;  %4076 = vmatmul.msk.bf16.gmra.mxu0 %vm767_vm1, %v4598_v39  ;;  %4128 = vmatmul.msk.bf16.gmra.mxu1 %vm767_vm1, %v4598_v39  ;;  %v1543_v51 = vmax.f32 %v1125_v55, %v1394_v35  ;;  %v4618_v55 = vld [vmem:[%s6693_s3 + $0x24] sm:$0xf]  ;;  %v4154_v35 = vld [vmem:[%s6693_s3 + $0x28] sm:$0xf0] }
 0x30a   : > { %v1665_v28 = vadd.f32 %v5255_v4, %v1609_v26  ;;  %v4280_v26 = vld [vmem:[%s6693_s3 + $0x120] sm:$0xf] }
 0x30c   : > { %v1717_v25 = vmax.f32 %v1665_v28, 0.0  ;;  %v4157_v28 = vor.u32 %v4618_v55, %v4154_v35 }
 0x30d   : > { %v1132_v2 = vpop.f32.mrf.mxu0  ;;  %v1401_v1 = vpop.f32.mrf.mxu1 }
 0x30e   : > { %v1546_v56 = vmax.f32 %v1132_v2, %v1401_v1  ;;  %v1769_v49 = vpack.c.bf16 %v1717_v25, %v1717_v25  ;;  %v2298_v2 = vpop.f32.mrf.mxu2  ;;  %2579 = vmatpush.bf16.msrb.mxu3 %v4157_v28 }
 0x310   : > { %v1610_v16 = vmax.f32 %v1542_v11, %v1546_v56  ;;  %v4651_v56 = vld [vmem:[%s6693_s3 + $0x124] sm:$0xf0] }
 0x311   : > { %v4281_v59 = vor.u32 %v4651_v56, %v4280_v26 }
 0x312   : > { %v1666_v12 = vadd.f32 %v5255_v4, %v1610_v16  ;;  %v1865_v16 = vunpack.c.l.b16 %v1769_v49 }
 0x313   : > { %2464 = vmatpush.bf16.msrb.mxu2 %v4281_v59 }
 0x314   : > { %v1718_v62 = vmax.f32 %v1666_v12, 0.0 }
 0x315   : > { %v1135_v14 = vpop.f32.mrf.mxu0  ;;  %v1404_v19 = vpop.f32.mrf.mxu1 }
 0x316   : > { %v1770_v48 = vpack.c.bf16 %v1718_v62, %v1718_v62  ;;  %v1547_v39 = vmax.f32 %v1135_v14, %v1404_v19  ;;  %v1544_v62 = vmax.f32 %v1127_v22, %v1396_v18  ;;  %v5412_v56 = vpop.f32.mrf.mxu2 }
 0x317   : > { %6738 = vst [vmem:[#allocation27_spill] sm:$0xff] %v5412_v56 }
 0x318   : > { %v1866_v25 = vunpack.c.l.b16 %v1770_v48  ;;  %v1611_v12 = vmax.f32 %v1543_v51, %v1547_v39  ;;  %4077 = vmatmul.msk.bf16.gmra.mxu0 %vm767_vm1, %v4599_v21  ;;  %4129 = vmatmul.msk.bf16.gmra.mxu1 %vm767_vm1, %v4599_v21 }
 0x31a   : > { %v5404_v1 = vpack.c.b16 %v1866_v25, %v1865_v16  ;;  %v1667_v48 = vadd.f32 %v5255_v4, %v1611_v12 }
 0x31c   : > { %2327 = vmatmul.bf16.gmra.mxu2 %v5404_v1  ;;  %2432 = vmatmul.bf16.gmra.mxu3 %v5404_v1  ;;  %v1719_v19 = vmax.f32 %v1667_v48, 0.0 }
 0x31d   : > { %v1137_v11 = vpop.f32.mrf.mxu0  ;;  %v1406_v49 = vpop.f32.mrf.mxu1 }
 0x31e   : > { %v1548_v21 = vmax.f32 %v1137_v11, %v1406_v49  ;;  %v1771_v59 = vpack.c.bf16 %v1719_v19, %v1719_v19  ;;  %v2303_v48 = vpop.f32.mrf.mxu2 }
 0x31f   : > { %v2413_v14 = vpop.f32.mrf.mxu3 }
 0x320   : > { %v1612_v51 = vmax.f32 %v1544_v62, %v1548_v21  ;;  %v5409_v39 = vadd.f32 %v2413_v14, %v2298_v2  ;;  %v1867_v28 = vunpack.c.l.b16 %v1771_v59 }
 0x322   : > { %v1668_v26 = vadd.f32 %v5255_v4, %v1612_v51 }
 0x324   : > { %v1720_v16 = vmax.f32 %v1668_v26, 0.0 }
 0x325   : > { %v1140_v25 = vpop.f32.mrf.mxu0  ;;  %v1409_v12 = vpop.f32.mrf.mxu1 }
 0x326   : > { %v1772_v55 = vpack.c.bf16 %v1720_v16, %v1720_v16  ;;  %v1549_v59 = vmax.f32 %v1140_v25, %v1409_v12  ;;  %v5435_v32 = vpop.f32.mrf.mxu2 }
 0x327   : > { %v5414_v35 = vpop.f32.mrf.mxu3  ;;  %6740 = vst [vmem:[#allocation29_spill] sm:$0xff] %v5435_v32 }
 0x328   : > { %6739 = vst [vmem:[#allocation28_spill] sm:$0xff] %v5414_v35  ;;  %v1868_v36 = vunpack.c.l.b16 %v1772_v55  ;;  %v4272_v55 = vld [vmem:[%s6693_s3 + $0x110] sm:$0xf]  ;;  %v4146_v35 = vld [vmem:[%s6693_s3 + $0x18] sm:$0xf0] }
 0x32a   : > { %v5416_v22 = vpack.c.b16 %v1868_v36, %v1867_v28  ;;  %v4649_v28 = vld [vmem:[%s6693_s3 + $0x114] sm:$0xf0] }
 0x32c   : > { %2332 = vmatmul.bf16.gmra.mxu2 %v5416_v22  ;;  %2437 = vmatmul.bf16.gmra.mxu3 %v5416_v22 }
 0x32d   : > { %v1142_v18 = vpop.f32.mrf.mxu0  ;;  %v1411_v2 = vpop.f32.mrf.mxu1 }
 0x32f   : > { %v2418_v11 = vpop.f32.mrf.mxu3 }
 0x330   : > { %v5420_v49 = vadd.f32 %v2418_v11, %v2303_v48  ;;  %v4616_v48 = vld [vmem:[%s6693_s3 + $0x14] sm:$0xf]  ;;  %v4273_v11 = vor.u32 %v4649_v28, %v4272_v55 }
 0x331   : > { %v4149_v12 = vor.u32 %v4616_v48, %v4146_v35  ;;  %v4264_v35 = vld [vmem:[%s6693_s3 + $0x100] sm:$0xf] }
 0x332   : > { %2465 = vmatpush.bf16.msrb.mxu2 %v4273_v11 }
 0x333   : > { %2580 = vmatpush.bf16.msrb.mxu3 %v4149_v12 }
 0x335   : > { %v1145_v62 = vpop.f32.mrf.mxu0  ;;  %v1414_v21 = vpop.f32.mrf.mxu1 }
 0x336   : > { %v1551_v31 = vmax.f32 %v1145_v62, %v1414_v21 }
 0x33d   : > { %v1147_v14 = vpop.f32.mrf.mxu0  ;;  %v1416_v19 = vpop.f32.mrf.mxu1 }
 0x33e   : > { %v1552_v21 = vmax.f32 %v1147_v14, %v1416_v19  ;;  %v4691_v14 = vld [vmem:[%s6695_s5 + $0xe4] sm:$0xf0] }
 0x345   : > { %v1150_v51 = vpop.f32.mrf.mxu0  ;;  %v1419_v26 = vpop.f32.mrf.mxu1 }
 0x346   : > { %v1553_v16 = vmax.f32 %v1150_v51, %v1419_v26 }
 0x348   : > { %v1613_v36 = vmax.f32 %v1549_v59, %v1553_v16  ;;  %v1550_v59 = vmax.f32 %v1142_v18, %v1411_v2  ;;  %v4647_v18 = vld [vmem:[%s6693_s3 + $0x104] sm:$0xf0]  ;;  %v5444_v2 = vpop.f32.mrf.mxu3 }
 0x349   : > { %6741 = vst [vmem:[#allocation30_spill] sm:$0xff] %v5444_v2  ;;  %v4265_v48 = vor.u32 %v4647_v18, %v4264_v35 }
 0x34a   : > { %v1669_v25 = vadd.f32 %v5255_v4, %v1613_v36 }
 0x34b   : > { %2466 = vmatpush.bf16.msrb.mxu2 %v4265_v48 }
 0x34c   : > { %v1721_v56 = vmax.f32 %v1669_v25, 0.0 }
 0x34d   : > { %v1152_v51 = vpop.f32.mrf.mxu0  ;;  %v1421_v26 = vpop.f32.mrf.mxu1 }
 0x34e   : > { %v1554_v16 = vmax.f32 %v1152_v51, %v1421_v26  ;;  %v1773_v55 = vpack.c.bf16 %v1721_v56, %v1721_v56  ;;  %v4376_v51 = vld [vmem:[%s6695_s5 + $0x60] sm:$0xf] }
 0x350   : > { %v1614_v23 = vmax.f32 %v1550_v59, %v1554_v16  ;;  %v1869_v11 = vunpack.c.l.b16 %v1773_v55 }
 0x352   : > { %v1670_v0 = vadd.f32 %v5255_v4, %v1614_v23 }
 0x354   : > { %v1722_v28 = vmax.f32 %v1670_v0, 0.0  ;;  %v2308_v0 = vpop.f32.mrf.mxu2 }
 0x355   : > { %v1155_v52 = vpop.f32.mrf.mxu0  ;;  %v1424_v27 = vpop.f32.mrf.mxu1 }
 0x356   : > { %v1774_v20 = vpack.c.bf16 %v1722_v28, %v1722_v28  ;;  %v1555_v36 = vmax.f32 %v1155_v52, %v1424_v27 }
 0x358   : > { %v1870_v23 = vunpack.c.l.b16 %v1774_v20  ;;  %v1615_v56 = vmax.f32 %v1551_v31, %v1555_v36  ;;  %v4675_v20 = vld [vmem:[%s6695_s5 + $0x64] sm:$0xf0]  ;;  %v4440_v31 = vld [vmem:[%s6695_s5 + $0xe0] sm:$0xf] }
 0x359   : > { %v5460_v59 = vor.u32 %v4675_v20, %v4376_v51  ;;  %v5467_v28 = vor.u32 %v4691_v14, %v4440_v31 }
 0x35a   : > { %v5446_v25 = vpack.c.b16 %v1870_v23, %v1869_v11  ;;  %v1671_v52 = vadd.f32 %v5255_v4, %v1615_v56 }
 0x35b   : > { %6742 = vst [vmem:[#allocation31_spill] sm:$0xff] %v5460_v59  ;;  %3392 = vmatpush.bf16.msrb.mxu0 %v5460_v59  ;;  %3427 = vmatpush.bf16.msrb.mxu1 %v5467_v28 }
 0x35c   : > { %2337 = vmatmul.bf16.gmra.mxu2 %v5446_v25  ;;  %2442 = vmatmul.bf16.gmra.mxu3 %v5446_v25  ;;  %v1723_v19 = vmax.f32 %v1671_v52, 0.0  ;;  %6744 = vst [vmem:[#allocation33_spill] sm:$0xff] %v5467_v28  ;;  %v5472_v35 = vpop.f32.mrf.mxu2 }
 0x35d   : > { %v1157_v27 = vpop.f32.mrf.mxu0  ;;  %v1426_v62 = vpop.f32.mrf.mxu1  ;;  %6745 = vst [vmem:[#allocation34_spill] sm:$0xff] %v5472_v35 }
 0x35e   : > { %v1556_v12 = vmax.f32 %v1157_v27, %v1426_v62  ;;  %v1775_v18 = vpack.c.bf16 %v1723_v19, %v1723_v19  ;;  %v4614_v19 = vld [vmem:[%s6693_s3 + $0x4] sm:$0xf] }
 0x35f   : > { %v2423_v26 = vpop.f32.mrf.mxu3 }
 0x360   : > { %v1616_v16 = vmax.f32 %v1552_v21, %v1556_v12  ;;  %v5465_v55 = vadd.f32 %v2423_v26, %v2308_v0  ;;  %v1871_v52 = vunpack.c.l.b16 %v1775_v18 }
 0x362   : > { %6743 = vst [vmem:[#allocation32_spill] sm:$0xff] %v5465_v55  ;;  %v1672_v36 = vadd.f32 %v5255_v4, %v1616_v16  ;;  %v4138_v16 = vld [vmem:[%s6693_s3 + $0x8] sm:$0xf0] }
 0x364   : > { %v1724_v48 = vmax.f32 %v1672_v36, 0.0  ;;  %v2313_v51 = vpop.f32.mrf.mxu2  ;;  %v4141_v36 = vor.u32 %v4614_v19, %v4138_v16 }
 0x365   : > { %v1160_v11 = vpop.f32.mrf.mxu0  ;;  %v1429_v23 = vpop.f32.mrf.mxu1 }
 0x366   : > { %v1776_v56 = vpack.c.bf16 %v1724_v48, %v1724_v48  ;;  %2581 = vmatpush.bf16.msrb.mxu3 %v4141_v36 }
 0x367   : > { %v5474_v27 = vpop.f32.mrf.mxu3 }
 0x368   : > { %6746 = vst [vmem:[#allocation35_spill] sm:$0xff] %v5474_v27  ;;  %v1872_v0 = vunpack.c.l.b16 %v1776_v56 }
 0x36a   : > { %v5476_v62 = vpack.c.b16 %v1872_v0, %v1871_v52  ;;  %v1557_v0 = vmax.f32 %v1160_v11, %v1429_v23 }
 0x36c   : > { %2340 = vmatmul.bf16.gmra.mxu2 %v5476_v62  ;;  %2447 = vmatmul.bf16.gmra.mxu3 %v5476_v62  ;;  %v5489_v27 = vpop.f32.mrf.mxu2 }
 0x36d   : > { %v1162_v21 = vpop.f32.mrf.mxu0  ;;  %v1431_v12 = vpop.f32.mrf.mxu1  ;;  %6748 = vst [vmem:[#allocation37_spill] sm:$0xff] %v5489_v27 }
 0x36e   : > { %v1558_v28 = vmax.f32 %v1162_v21, %v1431_v12  ;;  %v4660_v21 = vld [vmem:[%s6693_s3 + $0x174] sm:$0xf]  ;;  %v4322_v12 = vld [vmem:[%s6693_s3 + $0x178] sm:$0xf0] }
 0x36f   : > { %v2428_v20 = vpop.f32.mrf.mxu3 }
 0x370   : > { %v5480_v31 = vadd.f32 %v2428_v20, %v2313_v51 }
 0x372   : > { %6747 = vst [vmem:[#allocation36_spill] sm:$0xff] %v5480_v31 }
 0x374   : > { %v2318_v54 = vpop.f32.mrf.mxu2 }
 0x375   : > { %v1165_v26 = vpop.f32.mrf.mxu0  ;;  %v1434_v14 = vpop.f32.mrf.mxu1 }
 0x37c   : > { %2467 = vmatmul.bf16.vlgmr.msrb.gmra.mxu2 %v5069_v42 }
 0x37d   : > { %v1167_v18 = vpop.f32.mrf.mxu0  ;;  %v1436_v48 = vpop.f32.mrf.mxu1 }
 0x385   : > { %v1170_v56 = vpop.f32.mrf.mxu0  ;;  %v1439_v52 = vpop.f32.mrf.mxu1 }
 0x386   : > { %v1561_v51 = vmax.f32 %v1170_v56, %v1439_v52  ;;  %v1559_v56 = vmax.f32 %v1165_v26, %v1434_v14  ;;  %v4325_v26 = vor.u32 %v4660_v21, %v4322_v12  ;;  %v1560_v14 = vmax.f32 %v1167_v18, %v1436_v48  ;;  %v4250_v21 = vld [vmem:[%s6693_s3 + $0xe8] sm:$0xf0]  ;;  %v4368_v12 = vld [vmem:[%s6695_s5 + $0x50] sm:$0xf] }
 0x388   : > { %v1617_v20 = vmax.f32 %v1557_v0, %v1561_v51  ;;  %v5494_v51 = vpop.f32.mrf.mxu3  ;;  %2804 = vmatpush.bf16.msra.mxu3 %v4325_v26 }
 0x389   : > { %6749 = vst [vmem:[#allocation38_spill] sm:$0xff] %v5494_v51 }
 0x38a   : > { %v1673_v35 = vadd.f32 %v5255_v4, %v1617_v20 }
 0x38c   : > { %2472 = vmatmul.bf16.gmra.mxu2 %v5078_v60  ;;  %v1725_v16 = vmax.f32 %v1673_v35, 0.0  ;;  %v5504_v35 = vpop.f32.mrf.mxu2 }
 0x38d   : > { %v1172_v2 = vpop.f32.mrf.mxu0  ;;  %v1441_v32 = vpop.f32.mrf.mxu1  ;;  %6751 = vst [vmem:[#allocation40_spill] sm:$0xff] %v5504_v35 }
 0x38e   : > { %v1562_v19 = vmax.f32 %v1172_v2, %v1441_v32  ;;  %v1777_v31 = vpack.c.bf16 %v1725_v16, %v1725_v16  ;;  %v4644_v32 = vld [vmem:[%s6693_s3 + $0xf4] sm:$0xf]  ;;  %v4258_v2 = vld [vmem:[%s6693_s3 + $0xf8] sm:$0xf0] }
 0x390   : > { %v1618_v36 = vmax.f32 %v1558_v28, %v1562_v19  ;;  %v1921_v20 = vunpack.c.l.b16 %v1777_v31  ;;  %v4261_v28 = vor.u32 %v4644_v32, %v4258_v2 }
 0x392   : > { %v1674_v46 = vadd.f32 %v5255_v4, %v1618_v36  ;;  %2689 = vmatpush.bf16.msra.mxu2 %v4261_v28 }
 0x394   : > { %v1726_v55 = vmax.f32 %v1674_v46, 0.0 }
 0x395   : > { %v1175_v11 = vpop.f32.mrf.mxu0  ;;  %v1444_v23 = vpop.f32.mrf.mxu1 }
 0x396   : > { %v1778_v52 = vpack.c.bf16 %v1726_v55, %v1726_v55  ;;  %v1563_v0 = vmax.f32 %v1175_v11, %v1444_v23 }
 0x398   : > { %v1922_v27 = vunpack.c.l.b16 %v1778_v52  ;;  %v1619_v59 = vmax.f32 %v1559_v56, %v1563_v0 }
 0x39a   : > { %v5502_v46 = vpack.c.b16 %v1922_v27, %v1921_v20  ;;  %v1675_v55 = vadd.f32 %v5255_v4, %v1619_v59  ;;  %v2323_v20 = vpop.f32.mrf.mxu2 }
 0x39c   : > { %6750 = vst [vmem:[#allocation39_spill] sm:$0xff] %v5502_v46  ;;  %2452 = vmatmul.bf16.gmra.mxu3 %v5502_v46  ;;  %2477 = vmatmul.bf16.gmra.mxu2 %v5093_v33  ;;  %v1727_v59 = vmax.f32 %v1675_v55, 0.0  ;;  %v4642_v55 = vld [vmem:[%s6693_s3 + $0xe4] sm:$0xf] }
 0x39d   : > { %v1177_v31 = vpop.f32.mrf.mxu0  ;;  %v1446_v27 = vpop.f32.mrf.mxu1 }
 0x39e   : > { %v1564_v19 = vmax.f32 %v1177_v31, %v1446_v27  ;;  %v1779_v56 = vpack.c.bf16 %v1727_v59, %v1727_v59  ;;  %v4253_v31 = vor.u32 %v4642_v55, %v4250_v21  ;;  %v4673_v27 = vld [vmem:[%s6695_s5 + $0x54] sm:$0xf0] }
 0x39f   : > { %v2433_v16 = vpop.f32.mrf.mxu3  ;;  %v5542_v26 = vor.u32 %v4673_v27, %v4368_v12  ;;  %v4242_v27 = vld [vmem:[%s6693_s3 + $0xd8] sm:$0xf0] }
 0x3a0   : > { %v1620_v36 = vmax.f32 %v1560_v14, %v1564_v19  ;;  %v5515_v11 = vadd.f32 %v2433_v16, %v2318_v54  ;;  %v1923_v2 = vunpack.c.l.b16 %v1779_v56  ;;  %2690 = vmatpush.bf16.msra.mxu2 %v4253_v31  ;;  %v4658_v14 = vld [vmem:[%s6693_s3 + $0x164] sm:$0xf]  ;;  %v4314_v19 = vld [vmem:[%s6693_s3 + $0x168] sm:$0xf0]  ;;  %v4432_v16 = vld [vmem:[%s6695_s5 + $0xd0] sm:$0xf] }
 0x3a1   : > { %3393 = vmatpush.bf16.msrb.mxu0 %v5542_v26  ;;  %v4317_v59 = vor.u32 %v4658_v14, %v4314_v19  ;;  %v4656_v14 = vld [vmem:[%s6693_s3 + $0x154] sm:$0xf] }
 0x3a2   : > { %v1676_v23 = vadd.f32 %v5255_v4, %v1620_v36  ;;  %v5526_v54 = vpop.f32.mrf.mxu2  ;;  %v4689_v36 = vld [vmem:[%s6695_s5 + $0xd4] sm:$0xf0] }
 0x3a3   : > { %6754 = vst [vmem:[#allocation43_spill] sm:$0xff] %v5526_v54  ;;  %2805 = vmatpush.bf16.msra.mxu3 %v4317_v59 }
 0x3a4   : > { %v1728_v52 = vmax.f32 %v1676_v23, 0.0  ;;  %v5559_v23 = vor.u32 %v4689_v36, %v4432_v16  ;;  %v4306_v16 = vld [vmem:[%s6693_s3 + $0x158] sm:$0xf0]  ;;  %v4601_v36 = vld [vmem:[%s4882_s20 + $0x188] sm:$0xff] }
 0x3a5   : > { %v4309_v59 = vor.u32 %v4656_v14, %v4306_v16  ;;  %v4638_v14 = vld [vmem:[%s6693_s3 + $0xc4] sm:$0xf] }
 0x3a6   : > { %v1780_v0 = vpack.c.bf16 %v1728_v52, %v1728_v52  ;;  %6756 = vst [vmem:[#allocation45_spill] sm:$0xff] %v5559_v23  ;;  %3428 = vmatpush.bf16.msrb.mxu1 %v5559_v23 }
 0x3a7   : > { %v5518_v32 = vpop.f32.mrf.mxu3  ;;  %2806 = vmatpush.bf16.msra.mxu3 %v4309_v59 }
 0x3a8   : > { %6752 = vst [vmem:[#allocation41_spill] sm:$0xff] %v5518_v32  ;;  %v1924_v28 = vunpack.c.l.b16 %v1780_v0 }
 0x3aa   : > { %v5520_v35 = vpack.c.b16 %v1924_v28, %v1923_v2  ;;  %v2328_v4 = vpop.f32.mrf.mxu2 }
 0x3ac   : > { %6753 = vst [vmem:[#allocation42_spill] sm:$0xff] %v5520_v35  ;;  %2455 = vmatmul.bf16.gmra.mxu3 %v5520_v35  ;;  %2482 = vmatmul.bf16.gmra.mxu2 %v5108_v57 }
 0x3af   : > { %v2438_v18 = vpop.f32.mrf.mxu3 }
 0x3b0   : > { %v5524_v48 = vadd.f32 %v2438_v18, %v2323_v20  ;;  %v4600_v18 = vld [vmem:[%s4882_s20 + $0x180] sm:$0xff] }
 0x3b1   : > { %4078 = vmatmul.msk.bf16.gmra.mxu0 %vm767_vm1, %v4600_v18  ;;  %4130 = vmatmul.msk.bf16.gmra.mxu1 %vm767_vm1, %v4600_v18  ;;  %v4602_v18 = vld [vmem:[%s4882_s20 + $0x190] sm:$0xff] }
 0x3b7   : > { %v5566_v0 = vpop.f32.mrf.mxu3 }
 0x3b8   : > { %6757 = vst [vmem:[#allocation46_spill] sm:$0xff] %v5566_v0 }
 0x3bc   : > { %2487 = vmatmul.bf16.gmra.mxu2 %v5129_v37  ;;  %2582 = vmatmul.bf16.vlgmr.msrb.gmra.mxu3 %v4975_v41  ;;  %v5544_v41 = vpop.f32.mrf.mxu2 }
 0x3bd   : > { %6755 = vst [vmem:[#allocation44_spill] sm:$0xff] %v5544_v41 }
 0x3c1   : > { %4079 = vmatmul.msk.bf16.gmra.mxu0 %vm767_vm1, %v4601_v36  ;;  %4131 = vmatmul.msk.bf16.gmra.mxu1 %vm767_vm1, %v4601_v36 }
 0x3c4   : > { %v2333_v56 = vpop.f32.mrf.mxu2 }
 0x3cc   : > { %2492 = vmatmul.bf16.gmra.mxu2 %v5144_v3  ;;  %2587 = vmatmul.bf16.gmra.mxu3 %v5007_v6  ;;  %v5564_v52 = vpop.f32.mrf.mxu2 }
 0x3d1   : > { %4080 = vmatmul.msk.bf16.gmra.mxu0 %vm767_vm1, %v4602_v18  ;;  %4132 = vmatmul.msk.bf16.gmra.mxu1 %vm767_vm1, %v4602_v18 }
 0x3dc   : > { %2497 = vmatmul.bf16.gmra.mxu2 %v5165_v58  ;;  %2592 = vmatmul.bf16.gmra.mxu3 %v5045_v53 }
 0x3df   : > { %v2338_v20 = vpop.f32.mrf.mxu2  ;;  %v2443_v2 = vpop.f32.mrf.mxu3 }
 0x3e0   : > { %v5570_v28 = vadd.f32 %v2443_v2, %v2328_v4  ;;  %v4640_v4 = vld [vmem:[%s6693_s3 + $0xd4] sm:$0xf] }
 0x3e1   : > { %v4245_v19 = vor.u32 %v4640_v4, %v4242_v27  ;;  %v4603_v4 = vld [vmem:[%s4882_s20 + $0x198] sm:$0xff] }
 0x3e2   : > { %4081 = vmatmul.msk.bf16.gmra.mxu0 %vm767_vm1, %v4603_v4  ;;  %4133 = vmatmul.msk.bf16.gmra.mxu1 %vm767_vm1, %v4603_v4 }
 0x3e3   : > { %2691 = vmatpush.bf16.msra.mxu2 %v4245_v19 }
 0x3e7   : > { %v2339_v55 = vpop.f32.mrf.mxu2  ;;  %v5573_v21 = vpop.f32.mrf.mxu3 }
 0x3e8   : > { %6758 = vst [vmem:[#allocation47_spill] sm:$0xff] %v5573_v21 }
 0x3ec   : > { %2502 = vmatmul.bf16.gmra.mxu2 %v5180_v24  ;;  %2597 = vmatmul.bf16.gmra.mxu3 %v5054_v7 }
 0x3ef   : > { %v2341_v6 = vpop.f32.mrf.mxu2  ;;  %v2448_v12 = vpop.f32.mrf.mxu3 }
 0x3f0   : > { %v5579_v31 = vadd.f32 %v2448_v12, %v2333_v56 }
 0x3f7   : > { %v2342_v56 = vpop.f32.mrf.mxu2  ;;  %v5612_v27 = vpop.f32.mrf.mxu3 }
 0x3f8   : > { %v4654_v56 = vld [vmem:[%s6693_s3 + $0x144] sm:$0xf] }
 0x3fc   : > { %2507 = vmatmul.bf16.gmra.mxu2 %v5213_v45  ;;  %2602 = vmatmul.bf16.gmra.mxu3 %v5069_v42 }
 0x3ff   : > { %v2468_v20 = vpop.f32.mrf.mxu2 }
 0x400   : > { %v5599_v2 = vadd.f32 %v2468_v20, %v5098_v44  ;;  %v4298_v20 = vld [vmem:[%s6693_s3 + $0x148] sm:$0xf0] }
 0x401   : > { %v4301_v18 = vor.u32 %v4654_v56, %v4298_v20  ;;  %v4424_v56 = vld [vmem:[%s6695_s5 + $0xc0] sm:$0xf]  ;;  %v4687_v20 = vld [vmem:[%s6695_s5 + $0xc4] sm:$0xf0] }
 0x403   : > { %2807 = vmatpush.bf16.msra.mxu3 %v4301_v18  ;;  %v5657_v18 = vor.u32 %v4687_v20, %v4424_v56  ;;  %v4636_v56 = vld [vmem:[%s6693_s3 + $0xb4] sm:$0xf]  ;;  %v4226_v20 = vld [vmem:[%s6693_s3 + $0xb8] sm:$0xf0] }
 0x405   : > { %6763 = vst [vmem:[#allocation52_spill] sm:$0xff] %v5657_v18  ;;  %3429 = vmatpush.bf16.msrb.mxu1 %v5657_v18 }
 0x407   : > { %v5602_v55 = vpop.f32.mrf.mxu2 }
 0x40c   : > { %2512 = vmatmul.bf16.gmra.mxu2 %v5228_v38  ;;  %2607 = vmatmul.bf16.gmra.mxu3 %v5078_v60 }
 0x40f   : > { %v2473_v6 = vpop.f32.mrf.mxu2 }
 0x410   : > { %v5609_v12 = vadd.f32 %v2473_v6, %v5112_v63  ;;  %v4234_v63 = vld [vmem:[%s6693_s3 + $0xc8] sm:$0xf0] }
 0x411   : > { %v4237_v19 = vor.u32 %v4638_v14, %v4234_v63  ;;  %v4671_v14 = vld [vmem:[%s6695_s5 + $0x44] sm:$0xf0] }
 0x413   : > { %2692 = vmatpush.bf16.msra.mxu2 %v4237_v19 }
 0x417   : > { %v5614_v44 = vpop.f32.mrf.mxu2 }
 0x418   : > { %6759 = vst [vmem:[#allocation48_spill] sm:$0xff] %v5614_v44 }
 0x41c   : > { %2517 = vmatmul.bf16.gmra.mxu2 %v5278_v8  ;;  %2612 = vmatmul.bf16.gmra.mxu3 %v5093_v33 }
 0x41f   : > { %v2453_v16 = vpop.f32.mrf.mxu3  ;;  %v2478_v59 = vpop.f32.mrf.mxu2 }
 0x420   : > { %v5627_v36 = vadd.f32 %v2478_v59, %v5134_v50  ;;  %v4360_v50 = vld [vmem:[%s6695_s5 + $0x40] sm:$0xf] }
 0x421   : > { %v5645_v63 = vor.u32 %v4671_v14, %v4360_v50 }
 0x422   : > { %6760 = vst [vmem:[#allocation49_spill] sm:$0xff] %v5627_v36 }
 0x423   : > { %3394 = vmatpush.bf16.msrb.mxu0 %v5645_v63 }
 0x427   : > { %v2454_v6 = vpop.f32.mrf.mxu3  ;;  %v5635_v4 = vpop.f32.mrf.mxu2 }
 0x428   : > { %6761 = vst [vmem:[#allocation50_spill] sm:$0xff] %v5635_v4 }
 0x42c   : > { %2522 = vmatmul.bf16.gmra.mxu2 %v5293_v13  ;;  %2617 = vmatmul.bf16.gmra.mxu3 %v5108_v57 }
 0x42f   : > { %v2456_v19 = vpop.f32.mrf.mxu3  ;;  %v2483_v16 = vpop.f32.mrf.mxu2 }
 0x430   : > { %v5649_v59 = vadd.f32 %v2483_v16, %v5148_v10 }
 0x432   : > { %6762 = vst [vmem:[#allocation51_spill] sm:$0xff] %v5649_v59 }
 0x437   : > { %v2457_v6 = vpop.f32.mrf.mxu3  ;;  %v5660_v50 = vpop.f32.mrf.mxu2 }
 0x438   : > { %6764 = vst [vmem:[#allocation53_spill] sm:$0xff] %v5660_v50  ;;  %v4229_v6 = vor.u32 %v4636_v56, %v4226_v20 }
 0x43a   : > { %2693 = vmatpush.bf16.msra.mxu2 %v4229_v6 }
 0x43c   : > { %2527 = vmatmul.bf16.gmra.mxu2 %v5326_v34  ;;  %2622 = vmatmul.bf16.gmra.mxu3 %v5129_v37 }
 0x43f   : > { %v2488_v10 = vpop.f32.mrf.mxu2  ;;  %v5664_v14 = vpop.f32.mrf.mxu3 }
 0x440   : > { %v5667_v19 = vadd.f32 %v2488_v10, %v5170_v9  ;;  %v4652_v9 = vld [vmem:[%s6693_s3 + $0x134] sm:$0xf]  ;;  %v4290_v10 = vld [vmem:[%s6693_s3 + $0x138] sm:$0xf0] }
 0x441   : > { %v4293_v41 = vor.u32 %v4652_v9, %v4290_v10  ;;  %v5703_v10 = vpop.f32.mrf.mxu0 }
 0x442   : > { %6765 = vst [vmem:[#allocation54_spill] sm:$0xff] %v5667_v19 }
 0x443   : > { %2808 = vmatpush.bf16.msra.mxu3 %v4293_v41  ;;  %v5705_v41 = vpop.f32.mrf.mxu1 }
 0x447   : > { %v5669_v16 = vpop.f32.mrf.mxu2  ;;  %v5671_v21 = vpop.f32.mrf.mxu3 }
 0x448   : > { %6766 = vst [vmem:[#allocation55_spill] sm:$0xff] %v5669_v16 }
 0x44c   : > { %2532 = vmatmul.bf16.gmra.mxu2 %v5341_v30  ;;  %2627 = vmatmul.bf16.gmra.mxu3 %v5144_v3 }
 0x44f   : > { %v2493_v0 = vpop.f32.mrf.mxu2  ;;  %v5687_v54 = vpop.f32.mrf.mxu3 }
 0x450   : > { %v5690_v56 = vadd.f32 %v2493_v0, %v5184_v29 }
 0x452   : > { %6767 = vst [vmem:[#allocation56_spill] sm:$0xff] %v5690_v56 }
 0x457   : > { %v5692_v20 = vpop.f32.mrf.mxu2  ;;  %v5694_v6 = vpop.f32.mrf.mxu3 }
 0x458   : > { %6768 = vst [vmem:[#allocation57_spill] sm:$0xff] %v5692_v20 }
 0x459   : > { %6769 = vst [vmem:[#allocation58_spill] sm:$0xff] %v5694_v6 }
 0x45c   : > { %2537 = vmatmul.bf16.gmra.mxu2 %v5404_v1  ;;  %2632 = vmatmul.bf16.gmra.mxu3 %v5165_v58 }
 0x45f   : > { %v2498_v32 = vpop.f32.mrf.mxu2  ;;  %v5698_v51 = vpop.f32.mrf.mxu3 }
 0x460   : > { %6770 = vst [vmem:[#allocation59_spill] sm:$0xff] %v5698_v51  ;;  %v5701_v9 = vadd.f32 %v2498_v32, %v5218_v61  ;;  %v1182_v61 = vpop.f32.mrf.mxu0  ;;  %v1451_v32 = vpop.f32.mrf.mxu1 }
 0x461   : > { %v1566_v51 = vmax.f32 %v1182_v61, %v1451_v32 }
 0x462   : > { %6771 = vst [vmem:[#allocation60_spill] sm:$0xff] %v5701_v9  ;;  %v4634_v9 = vld [vmem:[%s6693_s3 + $0xa4] sm:$0xf] }
 0x467   : > { %v5707_v29 = vpop.f32.mrf.mxu2  ;;  %v5709_v0 = vpop.f32.mrf.mxu3 }
 0x468   : > { %6772 = vst [vmem:[#allocation61_spill] sm:$0xff] %v5707_v29  ;;  %v4218_v29 = vld [vmem:[%s6693_s3 + $0xa8] sm:$0xf0]  ;;  %v5736_v4 = vpop.f32.mrf.mxu1 }
 0x469   : > { %6773 = vst [vmem:[#allocation62_spill] sm:$0xff] %v5709_v0  ;;  %v4221_v19 = vor.u32 %v4634_v9, %v4218_v29 }
 0x46b   : > { %2694 = vmatpush.bf16.msra.mxu2 %v4221_v19 }
 0x46c   : > { %2542 = vmatmul.bf16.gmra.mxu2 %v5416_v22  ;;  %2637 = vmatmul.bf16.gmra.mxu3 %v5180_v24 }
 0x46f   : > { %v2503_v20 = vpop.f32.mrf.mxu2  ;;  %v5713_v56 = vpop.f32.mrf.mxu3 }
 0x470   : > { %6774 = vst [vmem:[#allocation63_spill] sm:$0xff] %v5713_v56  ;;  %v5716_v16 = vadd.f32 %v2503_v20, %v5232_v15  ;;  %v4650_v15 = vld [vmem:[%s6693_s3 + $0x124] sm:$0xf]  ;;  %v4282_v20 = vld [vmem:[%s6693_s3 + $0x128] sm:$0xf0]  ;;  %v5734_v56 = vpop.f32.mrf.mxu0 }
 0x472   : > { %6775 = vst [vmem:[#allocation64_spill] sm:$0xff] %v5716_v16  ;;  %v4285_v16 = vor.u32 %v4650_v15, %v4282_v20 }
 0x474   : > { %2809 = vmatpush.bf16.msra.mxu3 %v4285_v16 }
 0x477   : > { %v5724_v50 = vpop.f32.mrf.mxu2  ;;  %v5726_v59 = vpop.f32.mrf.mxu3 }
 0x478   : > { %6776 = vst [vmem:[#allocation65_spill] sm:$0xff] %v5724_v50  ;;  %v5745_v50 = vpop.f32.mrf.mxu0 }
 0x479   : > { %6777 = vst [vmem:[#allocation66_spill] sm:$0xff] %v5726_v59  ;;  %v5747_v59 = vpop.f32.mrf.mxu1 }
 0x47c   : > { %2547 = vmatmul.bf16.gmra.mxu2 %v5446_v25  ;;  %2642 = vmatmul.bf16.gmra.mxu3 %v5213_v45 }
 0x47f   : > { %v2508_v19 = vpop.f32.mrf.mxu2  ;;  %v5740_v9 = vpop.f32.mrf.mxu3 }
 0x480   : > { %6778 = vst [vmem:[#allocation67_spill] sm:$0xff] %v5740_v9  ;;  %v5743_v29 = vadd.f32 %v2508_v19, %v5283_v40  ;;  %v1190_v16 = vpop.f32.mrf.mxu0  ;;  %v4352_v19 = vld [vmem:[%s6695_s5 + $0x30] sm:$0xf] }
 0x481   : > { %v1459_v0 = vpop.f32.mrf.mxu1 }
 0x482   : > { %6779 = vst [vmem:[#allocation68_spill] sm:$0xff] %v5743_v29 }
 0x487   : > { %v5749_v15 = vpop.f32.mrf.mxu2  ;;  %v5751_v20 = vpop.f32.mrf.mxu3 }
 0x488   : > { %6780 = vst [vmem:[#allocation69_spill] sm:$0xff] %v5749_v15  ;;  %v4669_v15 = vld [vmem:[%s6695_s5 + $0x34] sm:$0xf0] }
 0x489   : > { %6781 = vst [vmem:[#allocation70_spill] sm:$0xff] %v5751_v20  ;;  %v5766_v29 = vor.u32 %v4669_v15, %v4352_v19  ;;  %v1565_v15 = vmax.f32 %v5703_v10, %v5705_v41  ;;  %v4648_v10 = vld [vmem:[%s6693_s3 + $0x114] sm:$0xf] }
 0x48b   : > { %3395 = vmatpush.bf16.msrb.mxu0 %v5766_v29 }
 0x48c   : > { %2552 = vmatmul.bf16.gmra.mxu2 %v5476_v62  ;;  %2647 = vmatmul.bf16.gmra.mxu3 %v5228_v38 }
 0x48f   : > { %v2513_v18 = vpop.f32.mrf.mxu2  ;;  %v5755_v36 = vpop.f32.mrf.mxu3 }
 0x490   : > { %6782 = vst [vmem:[#allocation71_spill] sm:$0xff] %v5755_v36  ;;  %v5758_v40 = vadd.f32 %v2513_v18, %v5297_v47  ;;  %v4416_v47 = vld [vmem:[%s6695_s5 + $0xb0] sm:$0xf]  ;;  %v4685_v18 = vld [vmem:[%s6695_s5 + $0xb4] sm:$0xf0]  ;;  %v1461_v36 = vpop.f32.mrf.mxu1 }
 0x491   : > { %v5779_v23 = vor.u32 %v4685_v18, %v4416_v47  ;;  %v4632_v47 = vld [vmem:[%s6693_s3 + $0x94] sm:$0xf]  ;;  %v4210_v18 = vld [vmem:[%s6693_s3 + $0x98] sm:$0xf0] }
 0x492   : > { %6783 = vst [vmem:[#allocation72_spill] sm:$0xff] %v5758_v40  ;;  %v1192_v40 = vpop.f32.mrf.mxu0  ;;  %v4213_v41 = vor.u32 %v4632_v47, %v4210_v18 }
 0x493   : > { %3430 = vmatpush.bf16.msrb.mxu1 %v5779_v23  ;;  %v1570_v6 = vmax.f32 %v1192_v40, %v1461_v36  ;;  %v4747_v40 = vld [vmem:[%s6692_s2] ss:$0 sm:$0xff] }
 0x494   : > { %2695 = vmatpush.bf16.msra.mxu2 %v4213_v41 }
 0x497   : > { %v5769_v20 = vpop.f32.mrf.mxu2  ;;  %v5771_v9 = vpop.f32.mrf.mxu3 }
 0x498   : > { %6784 = vst [vmem:[#allocation73_spill] sm:$0xff] %v5769_v20  ;;  %v1464_v32 = vpop.f32.mrf.mxu1 }
 0x499   : > { %6785 = vst [vmem:[#allocation74_spill] sm:$0xff] %v5771_v9  ;;  %v1569_v9 = vmax.f32 %v1190_v16, %v1459_v0  ;;  %v4274_v0 = vld [vmem:[%s6693_s3 + $0x118] sm:$0xf0]  ;;  %v1622_v16 = vmax.f32 %v1566_v51, %v1570_v6  ;;  %v1567_v51 = vmax.f32 %v5734_v56, %v5736_v4  ;;  %v1568_v6 = vmax.f32 %v5745_v50, %v5747_v59  ;;  %v4630_v4 = vld [vmem:[%s6693_s3 + $0x84] sm:$0xf] }
 0x49a   : > { %v1195_v36 = vpop.f32.mrf.mxu0  ;;  %v4202_v59 = vld [vmem:[%s6693_s3 + $0x88] sm:$0xf0] }
 0x49b   : > { %v1621_v61 = vmax.f32 %v1565_v15, %v1569_v9  ;;  %v1678_v47 = vadd.f32 %v4747_v40, %v1622_v16  ;;  %v1571_v16 = vmax.f32 %v1195_v36, %v1464_v32 }
 0x49c   : > { %2557 = vmatmul.bf16.gmra.mxu2 %v5502_v46  ;;  %2652 = vmatmul.bf16.gmra.mxu3 %v5278_v8 }
 0x49d   : > { %v1730_v9 = vmax.f32 %v1678_v47, 0.0 }
 0x49f   : > { %v2518_v19 = vpop.f32.mrf.mxu2  ;;  %v5786_v20 = vpop.f32.mrf.mxu3 }
 0x4a0   : > { %6786 = vst [vmem:[#allocation75_spill] sm:$0xff] %v5786_v20  ;;  %v5789_v44 = vadd.f32 %v2518_v19, %v5331_v43  ;;  %v4277_v43 = vor.u32 %v4648_v10, %v4274_v0  ;;  %v1677_v19 = vadd.f32 %v4747_v40, %v1621_v61  ;;  %v1466_v10 = vpop.f32.mrf.mxu1 }
 0x4a2   : > { %6787 = vst [vmem:[#allocation76_spill] sm:$0xff] %v5789_v44  ;;  %2810 = vmatpush.bf16.msra.mxu3 %v4277_v43  ;;  %v1729_v18 = vmax.f32 %v1677_v19, 0.0  ;;  %v1197_v15 = vpop.f32.mrf.mxu0  ;;  %v1782_v19 = vpack.c.bf16 %v1730_v9, %v1730_v9 }
 0x4a4   : > { %v1781_v41 = vpack.c.bf16 %v1729_v18, %v1729_v18 }
 0x4a6   : > { %v1933_v47 = vunpack.c.l.b16 %v1781_v41 }
 0x4a7   : > { %v5806_v44 = vpop.f32.mrf.mxu2  ;;  %v5808_v46 = vpop.f32.mrf.mxu3 }
 0x4a8   : > { %6788 = vst [vmem:[#allocation77_spill] sm:$0xff] %v5806_v44  ;;  %v1572_v44 = vmax.f32 %v1197_v15, %v1466_v10 }
 0x4a9   : > { %6789 = vst [vmem:[#allocation78_spill] sm:$0xff] %v5808_v46  ;;  %v1934_v46 = vunpack.c.l.b16 %v1782_v19 }
 0x4aa   : > { %v1624_v20 = vmax.f32 %v1568_v6, %v1572_v44 }
 0x4ab   : > { %v5831_v32 = vpack.c.b16 %v1934_v46, %v1933_v47 }
 0x4ac   : > { %2562 = vmatmul.bf16.gmra.mxu2 %v5520_v35  ;;  %2657 = vmatmul.bf16.gmra.mxu3 %v5293_v13  ;;  %v1623_v35 = vmax.f32 %v1567_v51, %v1571_v16  ;;  %v1680_v18 = vadd.f32 %v4747_v40, %v1624_v20 }
 0x4ae   : > { %v1679_v36 = vadd.f32 %v4747_v40, %v1623_v35  ;;  %v1732_v44 = vmax.f32 %v1680_v18, 0.0  ;;  %v6790_v18 = vld [vmem:[#allocation31_spill] sm:$0xff] }
 0x4af   : > { %v2523_v0 = vpop.f32.mrf.mxu2  ;;  %v5816_v43 = vpop.f32.mrf.mxu3 }
 0x4b0   : > { %v5819_v61 = vadd.f32 %v2523_v0, %v5345_v17  ;;  %v4205_v17 = vor.u32 %v4630_v4, %v4202_v59  ;;  %v1731_v9 = vmax.f32 %v1679_v36, 0.0  ;;  %v1784_v41 = vpack.c.bf16 %v1732_v44, %v1732_v44  ;;  %v4266_v4 = vld [vmem:[%s6693_s3 + $0x108] sm:$0xf0]  ;;  %v6791_v44 = vld [vmem:[#allocation32_spill] sm:$0xff] }
 0x4b2   : > { %2696 = vmatpush.bf16.msra.mxu2 %v4205_v17  ;;  %v1783_v51 = vpack.c.bf16 %v1731_v9, %v1731_v9  ;;  %v1936_v35 = vunpack.c.l.b16 %v1784_v41  ;;  %v6793_v41 = vld [vmem:[#allocation36_spill] sm:$0xff] }
 0x4b4   : > { %v1935_v0 = vunpack.c.l.b16 %v1783_v51 }
 0x4b6   : > { %v5844_v40 = vpack.c.b16 %v1936_v35, %v1935_v0 }
 0x4b7   : > { %v5827_v50 = vpop.f32.mrf.mxu2  ;;  %v5829_v56 = vpop.f32.mrf.mxu3 }
 0x4bc   : > { %2567 = vmatmul.bf16.gmra.mxu2 %v5831_v32  ;;  %2662 = vmatmul.bf16.gmra.mxu3 %v5326_v34 }
 0x4bf   : > { %v2528_v15 = vpop.f32.mrf.mxu2  ;;  %v5835_v10 = vpop.f32.mrf.mxu3 }
 0x4c0   : > { %v5838_v6 = vadd.f32 %v2528_v15, %v5409_v39  ;;  %v4646_v39 = vld [vmem:[%s6693_s3 + $0x104] sm:$0xf] }
 0x4c1   : > { %v4269_v59 = vor.u32 %v4646_v39, %v4266_v4 }
 0x4c3   : > { %2811 = vmatpush.bf16.msra.mxu3 %v4269_v59 }
 0x4c7   : > { %v5840_v46 = vpop.f32.mrf.mxu2  ;;  %v5842_v20 = vpop.f32.mrf.mxu3  ;;  %4718 = vmatpush.bf16.msrb.mxu3 %v5371_v5 }
 0x4cb   : > { %4719 = vmatpush.bf16.msrb.mxu3 %v6790_v18  ;;  %v4408_v18 = vld [vmem:[%s6695_s5 + $0xa0] sm:$0xf] }
 0x4cc   : > { %2570 = vmatmul.bf16.gmra.mxu2 %v5844_v40  ;;  %2667 = vmatmul.bf16.gmra.mxu3 %v5341_v30 }
 0x4cf   : > { %v2533_v16 = vpop.f32.mrf.mxu2  ;;  %v5848_v19 = vpop.f32.mrf.mxu3  ;;  %4720 = vmatpush.bf16.msrb.mxu3 %v5542_v26 }
 0x4d0   : > { %v5851_v47 = vadd.f32 %v2533_v16, %v5420_v49 }
 0x4d3   : > { %4721 = vmatpush.bf16.msrb.mxu3 %v5645_v63  ;;  %v4344_v63 = vld [vmem:[%s6695_s5 + $0x20] sm:$0xf] }
 0x4d7   : > { %v5860_v17 = vpop.f32.mrf.mxu2  ;;  %v5862_v36 = vpop.f32.mrf.mxu3  ;;  %4722 = vmatpush.bf16.msrb.mxu3 %v5766_v29 }
 0x4dc   : > { %2672 = vmatmul.bf16.gmra.mxu3 %v5404_v1  ;;  %2697 = vmatmul.bf16.vlgmr.msra.gmra.mxu2 %v5045_v53 }
 0x4df   : > { %v2538_v49 = vpop.f32.mrf.mxu2  ;;  %v5868_v9 = vpop.f32.mrf.mxu3 }
 0x4e0   : > { %v5871_v15 = vadd.f32 %v2538_v49, %v6791_v44  ;;  %v4683_v49 = vld [vmem:[%s6695_s5 + $0xa4] sm:$0xf0] }
 0x4e1   : > { %v5909_v44 = vor.u32 %v4683_v49, %v4408_v18 }
 0x4e3   : > { %3431 = vmatpush.bf16.msrb.mxu1 %v5909_v44 }
 0x4e7   : > { %v5875_v5 = vpop.f32.mrf.mxu2  ;;  %v5877_v51 = vpop.f32.mrf.mxu3 }
 0x4e8   : > { %6792 = vst [vmem:[#allocation31_spill] sm:$0xff] %v5875_v5 }
 0x4ec   : > { %2677 = vmatmul.bf16.gmra.mxu3 %v5416_v22  ;;  %2702 = vmatmul.bf16.gmra.mxu2 %v5054_v7  ;;  %v4667_v7 = vld [vmem:[%s6695_s5 + $0x24] sm:$0xf0] }
 0x4ed   : > { %v4345_v29 = vor.u32 %v4667_v7, %v4344_v63 }
 0x4ef   : > { %v2543_v53 = vpop.f32.mrf.mxu2  ;;  %v5881_v26 = vpop.f32.mrf.mxu3  ;;  %3396 = vmatpush.bf16.msrb.mxu0 %v4345_v29  ;;  %4723 = vmatpush.bf16.msrb.mxu3 %v4345_v29 }
 0x4f0   : > { %v5884_v0 = vadd.f32 %v2543_v53, %v6793_v41 }
 0x4f2   : > { %6794 = vst [vmem:[#allocation32_spill] sm:$0xff] %v5884_v0 }
 0x4f7   : > { %v5886_v35 = vpop.f32.mrf.mxu2  ;;  %v5888_v16 = vpop.f32.mrf.mxu3 }
 0x4f8   : > { %6795 = vst [vmem:[#allocation36_spill] sm:$0xff] %v5886_v35 }
 0x4fc   : > { %2682 = vmatmul.bf16.gmra.mxu3 %v5446_v25  ;;  %2707 = vmatmul.bf16.gmra.mxu2 %v5069_v42 }
 0x4ff   : > { %v2548_v39 = vpop.f32.mrf.mxu2  ;;  %v5898_v4 = vpop.f32.mrf.mxu3 }
 0x500   : > { %v5901_v59 = vadd.f32 %v2548_v39, %v5515_v11 }
 0x502   : > { %6796 = vst [vmem:[#allocation79_spill] sm:$0xff] %v5901_v59 }
 0x507   : > { %v5912_v53 = vpop.f32.mrf.mxu2  ;;  %v5914_v41 = vpop.f32.mrf.mxu3 }
 0x508   : > { %6797 = vst [vmem:[#allocation80_spill] sm:$0xff] %v5912_v53 }
 0x50c   : > { %2685 = vmatmul.bf16.gmra.mxu3 %v5476_v62  ;;  %2712 = vmatmul.bf16.gmra.mxu2 %v5078_v60 }
 0x50f   : > { %v2553_v11 = vpop.f32.mrf.mxu2  ;;  %v5918_v63 = vpop.f32.mrf.mxu3 }
 0x510   : > { %v5921_v7 = vadd.f32 %v2553_v11, %v5524_v48 }
 0x512   : > { %6798 = vst [vmem:[#allocation81_spill] sm:$0xff] %v5921_v7 }
 0x517   : > { %v5923_v29 = vpop.f32.mrf.mxu2  ;;  %v5925_v39 = vpop.f32.mrf.mxu3 }
 0x518   : > { %6799 = vst [vmem:[#allocation82_spill] sm:$0xff] %v5923_v29 }
 0x51c   : > { %2717 = vmatmul.bf16.gmra.mxu2 %v5093_v33  ;;  %2812 = vmatmul.bf16.vlgmr.msra.gmra.mxu3 %v5069_v42  ;;  %v2451_v42 = vadd.f32 %v5612_v27, %v5564_v52 }
 0x51f   : > { %v2558_v18 = vpop.f32.mrf.mxu2  ;;  %v5929_v49 = vpop.f32.mrf.mxu3 }
 0x520   : > { %v5932_v53 = vadd.f32 %v2558_v18, %v5570_v28 }
 0x522   : > { %6800 = vst [vmem:[#allocation83_spill] sm:$0xff] %v5932_v53 }
 0x527   : > { %v5934_v59 = vpop.f32.mrf.mxu2  ;;  %v5936_v35 = vpop.f32.mrf.mxu3 }
 0x528   : > { %6801 = vst [vmem:[#allocation84_spill] sm:$0xff] %v5934_v59 }
 0x529   : > { %6802 = vst [vmem:[#allocation85_spill] sm:$0xff] %v5936_v35 }
 0x52c   : > { %2722 = vmatmul.bf16.gmra.mxu2 %v5108_v57  ;;  %2817 = vmatmul.bf16.gmra.mxu3 %v5078_v60 }
 0x52f   : > { %v2563_v48 = vpop.f32.mrf.mxu2  ;;  %v5940_v11 = vpop.f32.mrf.mxu3 }
 0x530   : > { %6803 = vst [vmem:[#allocation86_spill] sm:$0xff] %v5940_v11  ;;  %v5943_v29 = vadd.f32 %v2563_v48, %v5579_v31 }
 0x532   : > { %6804 = vst [vmem:[#allocation87_spill] sm:$0xff] %v5943_v29 }
 0x537   : > { %v2565_v7 = vpop.f32.mrf.mxu2  ;;  %v5947_v28 = vpop.f32.mrf.mxu3 }
 0x538   : > { %6805 = vst [vmem:[#allocation88_spill] sm:$0xff] %v5947_v28  ;;  %v5949_v18 = vadd.f32 %v2565_v7, %v2451_v42 }
 0x53a   : > { %6806 = vst [vmem:[#allocation89_spill] sm:$0xff] %v5949_v18 }
 0x53c   : > { %2727 = vmatmul.bf16.gmra.mxu2 %v5129_v37  ;;  %2822 = vmatmul.bf16.gmra.mxu3 %v5093_v33 }
 0x53f   : > { %v2568_v59 = vpop.f32.mrf.mxu2  ;;  %v5953_v60 = vpop.f32.mrf.mxu3 }
 0x540   : > { %6807 = vst [vmem:[#allocation90_spill] sm:$0xff] %v5953_v60  ;;  %v6815_v60 = vld [vmem:[#allocation2_spill] sm:$0xff] }
 0x547   : > { %v2569_v53 = vpop.f32.mrf.mxu2  ;;  %v5955_v0 = vpop.f32.mrf.mxu3 }
 0x548   : > { %6808 = vst [vmem:[#allocation91_spill] sm:$0xff] %v5955_v0  ;;  %v4336_v53 = vld [vmem:[%s6695_s5 + $0x10] sm:$0xf] }
 0x54c   : > { %2732 = vmatmul.bf16.gmra.mxu2 %v5144_v3  ;;  %2827 = vmatmul.bf16.gmra.mxu3 %v5108_v57  ;;  %v4665_v57 = vld [vmem:[%s6695_s5 + $0x14] sm:$0xf0] }
 0x54d   : > { %v4337_v48 = vor.u32 %v4665_v57, %v4336_v53 }
 0x54f   : > { %v2571_v52 = vpop.f32.mrf.mxu2  ;;  %v5959_v31 = vpop.f32.mrf.mxu3  ;;  %3397 = vmatpush.bf16.msrb.mxu0 %v4337_v48  ;;  %4724 = vmatpush.bf16.msrb.mxu3 %v4337_v48 }
 0x550   : > { %6809 = vst [vmem:[#allocation92_spill] sm:$0xff] %v5959_v31 }
 0x557   : > { %v2572_v27 = vpop.f32.mrf.mxu2  ;;  %v5961_v7 = vpop.f32.mrf.mxu3 }
 0x558   : > { %6810 = vst [vmem:[#allocation93_spill] sm:$0xff] %v5961_v7  ;;  %v4681_v27 = vld [vmem:[%s6695_s5 + $0x94] sm:$0xf0] }
 0x55c   : > { %2737 = vmatmul.bf16.gmra.mxu2 %v5165_v58  ;;  %2832 = vmatmul.bf16.gmra.mxu3 %v5129_v37  ;;  %v4400_v37 = vld [vmem:[%s6695_s5 + $0x90] sm:$0xf] }
 0x55d   : > { %v5981_v18 = vor.u32 %v4681_v27, %v4400_v37 }
 0x55f   : > { %v5965_v33 = vpop.f32.mrf.mxu3  ;;  %v2698_v59 = vpop.f32.mrf.mxu2  ;;  %3432 = vmatpush.bf16.msrb.mxu1 %v5981_v18 }
 0x560   : > { %6811 = vst [vmem:[#allocation94_spill] sm:$0xff] %v5965_v33 }
 0x567   : > { %v5973_v42 = vpop.f32.mrf.mxu3  ;;  %v2700_v52 = vpop.f32.mrf.mxu2 }
 0x568   : > { %6812 = vst [vmem:[#allocation95_spill] sm:$0xff] %v5973_v42  ;;  %v2701_v28 = vadd.f32 %v2700_v52, %v5671_v21  ;;  %v4328_v21 = vld [vmem:[%s6695_s5] sm:$0xf]  ;;  %v6820_v52 = vld [vmem:[#allocation24_spill] sm:$0xff] }
 0x56c   : > { %2742 = vmatmul.bf16.gmra.mxu2 %v5180_v24  ;;  %2837 = vmatmul.bf16.gmra.mxu3 %v5144_v3 }
 0x56f   : > { %v5986_v53 = vpop.f32.mrf.mxu3  ;;  %v2703_v57 = vpop.f32.mrf.mxu2 }
 0x570   : > { %6813 = vst [vmem:[#allocation96_spill] sm:$0xff] %v5986_v53 }
 0x577   : > { %v5988_v48 = vpop.f32.mrf.mxu3  ;;  %v2705_v29 = vpop.f32.mrf.mxu2 }
 0x578   : > { %6814 = vst [vmem:[#allocation97_spill] sm:$0xff] %v5988_v48 }
 0x57c   : > { %2747 = vmatmul.bf16.gmra.mxu2 %v5213_v45  ;;  %2842 = vmatmul.bf16.gmra.mxu3 %v5165_v58  ;;  %v2699_v58 = vadd.f32 %v2698_v59, %v5664_v14  ;;  %v2704_v14 = vadd.f32 %v2703_v57, %v5687_v54 }
 0x57f   : > { %v2683_v42 = vpop.f32.mrf.mxu3  ;;  %v2708_v33 = vpop.f32.mrf.mxu2 }
 0x587   : > { %v2684_v37 = vpop.f32.mrf.mxu3  ;;  %v2710_v27 = vpop.f32.mrf.mxu2 }
 0x58c   : > { %2752 = vmatmul.bf16.gmra.mxu2 %v5228_v38  ;;  %2847 = vmatmul.bf16.gmra.mxu3 %v5180_v24  ;;  %v6816_v24 = vld [vmem:[#allocation3_spill] sm:$0xff] }
 0x58f   : > { %v2686_v7 = vpop.f32.mrf.mxu3  ;;  %v5994_v3 = vpop.f32.mrf.mxu2 }
 0x590   : > { %v2356_v7 = vadd.f32 %v6816_v24, %v6815_v60 }
 0x592   : > { %v2471_v5 = vadd.f32 %v5602_v55, %v2356_v7  ;;  %v4663_v55 = vld [vmem:[%s6695_s5 + $0x4] sm:$0xf0] }
 0x597   : > { %v2687_v53 = vpop.f32.mrf.mxu3  ;;  %v5996_v31 = vpop.f32.mrf.mxu2 }
 0x59c   : > { %2757 = vmatmul.bf16.gmra.mxu2 %v5278_v8  ;;  %2852 = vmatmul.bf16.gmra.mxu3 %v5213_v45 }
 0x59f   : > { %v6001_v42 = vpop.f32.mrf.mxu2  ;;  %v2813_v37 = vpop.f32.mrf.mxu3 }
 0x5a0   : > { %v2814_v48 = vadd.f32 %v2813_v37, %v2699_v58  ;;  %v6821_v58 = vld [vmem:[#allocation48_spill] sm:$0xff] }
 0x5a2   : > { %v2919_v0 = vmax.f32 %v5599_v2, %v2814_v48 }
 0x5a7   : > { %v6007_v53 = vpop.f32.mrf.mxu2  ;;  %v2815_v11 = vpop.f32.mrf.mxu3 }
 0x5a8   : > { %v2816_v35 = vadd.f32 %v2815_v11, %v2701_v28  ;;  %v6819_v11 = vld [vmem:[#allocation58_spill] sm:$0xff] }
 0x5a9   : > { %v2706_v28 = vadd.f32 %v2705_v29, %v6819_v11  ;;  %v6826_v11 = vld [vmem:[#allocation52_spill] sm:$0xff] }
 0x5aa   : > { %v2920_v45 = vmax.f32 %v2471_v5, %v2816_v35  ;;  %v4329_v5 = vor.u32 %v4663_v55, %v4328_v21  ;;  %v6818_v35 = vld [vmem:[#allocation5_spill] sm:$0xff] }
 0x5ab   : > { %v6824_v21 = vld [vmem:[#allocation45_spill] sm:$0xff] }
 0x5ac   : > { %2762 = vmatmul.bf16.gmra.mxu2 %v5293_v13  ;;  %2857 = vmatmul.bf16.gmra.mxu3 %v5228_v38  ;;  %v6817_v38 = vld [vmem:[#allocation4_spill] sm:$0xff] }
 0x5ad   : > { %3398 = vmatpush.bf16.msrb.mxu0 %v4329_v5  ;;  %4725 = vmatpush.bf16.msrb.mxu3 %v4329_v5  ;;  %v2361_v54 = vadd.f32 %v6818_v35, %v6817_v38  ;;  %v6825_v38 = vld [vmem:[#allocation49_spill] sm:$0xff] }
 0x5af   : > { %v6013_v59 = vpop.f32.mrf.mxu2  ;;  %v2818_v2 = vpop.f32.mrf.mxu3  ;;  %v2476_v37 = vadd.f32 %v6821_v58, %v2361_v54 }
 0x5b0   : > { %v2819_v48 = vadd.f32 %v2818_v2, %v2704_v14  ;;  %v6822_v14 = vld [vmem:[#allocation33_spill] sm:$0xff]  ;;  %v6823_v2 = vld [vmem:[#allocation59_spill] sm:$0xff] }
 0x5b1   : > { %4726 = vmatpush.bf16.msra.mxu3 %v6820_v52  ;;  %v6827_v52 = vld [vmem:[#allocation6_spill] sm:$0xff] }
 0x5b2   : > { %v2921_v60 = vmax.f32 %v5609_v12, %v2819_v48  ;;  %v2709_v48 = vadd.f32 %v2708_v33, %v6823_v2  ;;  %v6829_v33 = vld [vmem:[#allocation62_spill] sm:$0xff] }
 0x5b3   : > { %v2711_v58 = vadd.f32 %v2710_v27, %v6829_v33  ;;  %v6831_v27 = vld [vmem:[#allocation63_spill] sm:$0xff] }
 0x5b5   : > { %4727 = vmatpush.bf16.msra.mxu3 %v6822_v14  ;;  %v6830_v14 = vld [vmem:[#allocation50_spill] sm:$0xff] }
 0x5b7   : > { %v6026_v57 = vpop.f32.mrf.mxu2  ;;  %v2820_v12 = vpop.f32.mrf.mxu3 }
 0x5b8   : > { %v2821_v24 = vadd.f32 %v2820_v12, %v2706_v28  ;;  %v6041_v28 = vld [vmem:[%s6694_s4] ss:$0 sm:$0xff] }
 0x5b9   : > { %4728 = vmatpush.bf16.msra.mxu3 %v6824_v21 }
 0x5ba   : > { %v2922_v7 = vmax.f32 %v2476_v37, %v2821_v24 }
 0x5bc   : > { %2767 = vmatmul.bf16.gmra.mxu2 %v5326_v34  ;;  %2862 = vmatmul.bf16.gmra.mxu3 %v5278_v8  ;;  %v6828_v8 = vld [vmem:[#allocation7_spill] sm:$0xff] }
 0x5bd   : > { %4729 = vmatpush.bf16.msra.mxu3 %v6826_v11  ;;  %v2366_v12 = vadd.f32 %v6828_v8, %v6827_v52 }
 0x5bf   : > { %v6034_v29 = vpop.f32.mrf.mxu2  ;;  %v2823_v55 = vpop.f32.mrf.mxu3  ;;  %v2481_v2 = vadd.f32 %v6830_v14, %v2366_v12  ;;  %v6832_v12 = vld [vmem:[#allocation51_spill] sm:$0xff]  ;;  %v6833_v14 = vld [vmem:[#allocation8_spill] sm:$0xff] }
 0x5c0   : > { %v2824_v5 = vadd.f32 %v2823_v55, %v2709_v48 }
 0x5c1   : > { %4730 = vmatpush.bf16.msra.mxu3 %v5779_v23  ;;  %v2714_v23 = vadd.f32 %v5994_v3, %v6831_v27  ;;  %v4679_v3 = vld [vmem:[%s6695_s5 + $0x84] sm:$0xf0] }
 0x5c2   : > { %v2923_v35 = vmax.f32 %v6825_v38, %v2824_v5 }
 0x5c4   : > { %v2959_v54 = vmax.f32 %v2919_v0, %v2923_v35 }
 0x5c5   : > { %4731 = vmatpush.bf16.msra.mxu3 %v5909_v44 }
 0x5c6   : > { %v2983_v48 = vadd.f32 %v6041_v28, %v2959_v54 }
 0x5c7   : > { %v6047_v37 = vpop.f32.mrf.mxu2  ;;  %v2825_v24 = vpop.f32.mrf.mxu3 }
 0x5c8   : > { %v2826_v0 = vadd.f32 %v2825_v24, %v2711_v58  ;;  %v3003_v55 = vmax.f32 %v2983_v48, 0.0 }
 0x5c9   : > { %4732 = vmatpush.bf16.msra.mxu3 %v5981_v18 }
 0x5ca   : > { %v2924_v21 = vmax.f32 %v2481_v2, %v2826_v0  ;;  %v3023_v54 = vpack.c.bf16 %v3003_v55, %v3003_v55  ;;  %v6834_v2 = vld [vmem:[#allocation9_spill] sm:$0xff]  ;;  %v6835_v0 = vld [vmem:[#allocation66_spill] sm:$0xff] }
 0x5cb   : > { %v2371_v48 = vadd.f32 %v6834_v2, %v6833_v14 }
 0x5cc   : > { %v2960_v5 = vmax.f32 %v2920_v45, %v2924_v21  ;;  %2772 = vmatmul.bf16.gmra.mxu2 %v5341_v30  ;;  %2867 = vmatmul.bf16.gmra.mxu3 %v5293_v13  ;;  %v4392_v13 = vld [vmem:[%s6695_s5 + $0x80] sm:$0xf]  ;;  %v3055_v58 = vunpack.c.l.b16 %v3023_v54  ;;  %v2716_v21 = vadd.f32 %v5996_v31, %v6835_v0  ;;  %v6837_v31 = vld [vmem:[#allocation67_spill] sm:$0xff] }
 0x5cd   : > { %v4393_v33 = vor.u32 %v4679_v3, %v4392_v13  ;;  %v6840_v0 = vld [vmem:[#allocation11_spill] sm:$0xff] }
 0x5ce   : > { %v2984_v38 = vadd.f32 %v6041_v28, %v2960_v5 }
 0x5cf   : > { %v6058_v35 = vpop.f32.mrf.mxu2  ;;  %v2828_v11 = vpop.f32.mrf.mxu3  ;;  %3433 = vmatpush.bf16.msrb.mxu1 %v4393_v33  ;;  %4733 = vmatpush.bf16.msra.mxu3 %v4393_v33 }
 0x5d0   : > { %v3004_v52 = vmax.f32 %v2984_v38, 0.0  ;;  %v2829_v8 = vadd.f32 %v2828_v11, %v2714_v23  ;;  %v6836_v23 = vld [vmem:[#allocation53_spill] sm:$0xff] }
 0x5d1   : > { %v2486_v38 = vadd.f32 %v6836_v23, %v2371_v48  ;;  %v6839_v48 = vld [vmem:[#allocation10_spill] sm:$0xff] }
 0x5d2   : > { %v3024_v44 = vpack.c.bf16 %v3004_v52, %v3004_v52  ;;  %v2925_v45 = vmax.f32 %v6832_v12, %v2829_v8 }
 0x5d4   : > { %v3056_v18 = vunpack.c.l.b16 %v3024_v44  ;;  %v2961_v24 = vmax.f32 %v2921_v60, %v2925_v45  ;;  %v2719_v44 = vadd.f32 %v6001_v42, %v6837_v31 }
 0x5d6   : > { %v6071_v55 = vpack.c.b16 %v3056_v18, %v3055_v58  ;;  %v2985_v11 = vadd.f32 %v6041_v28, %v2961_v24  ;;  %v6838_v18 = vld [vmem:[#allocation54_spill] sm:$0xff] }
 0x5d7   : > { %v6073_v5 = vpop.f32.mrf.mxu2  ;;  %v2830_v27 = vpop.f32.mrf.mxu3 }
 0x5d8   : > { %v2831_v54 = vadd.f32 %v2830_v27, %v2716_v21  ;;  %3399 = vmatmul.bf16.vlgmr.msrb.gmra.mxu0 %v6071_v55  ;;  %v3005_v8 = vmax.f32 %v2985_v11, 0.0  ;;  %v6841_v21 = vld [vmem:[#allocation70_spill] sm:$0xff]  ;;  %v6842_v11 = vld [vmem:[#allocation55_spill] sm:$0xff] }
 0x5d9   : > { %v2721_v27 = vadd.f32 %v6007_v53, %v6841_v21 }
 0x5da   : > { %v2926_v60 = vmax.f32 %v2486_v38, %v2831_v54  ;;  %v3025_v58 = vpack.c.bf16 %v3005_v8, %v3005_v8  ;;  %v6843_v8 = vld [vmem:[#allocation71_spill] sm:$0xff] }
 0x5db   : > { %v2724_v31 = vadd.f32 %v6013_v59, %v6843_v8  ;;  %v6849_v59 = vld [vmem:[#allocation75_spill] sm:$0xff] }
 0x5dc   : > { %v2962_v52 = vmax.f32 %v2922_v7, %v2926_v60  ;;  %2777 = vmatmul.bf16.gmra.mxu2 %v5404_v1  ;;  %2872 = vmatmul.bf16.gmra.mxu3 %v5326_v34  ;;  %v3057_v7 = vunpack.c.l.b16 %v3025_v58  ;;  %v2376_v34 = vadd.f32 %v6840_v0, %v6839_v48  ;;  %v6846_v58 = vld [vmem:[#allocation13_spill] sm:$0xff] }
 0x5dd   : > { %v6848_v0 = vld [vmem:[#allocation57_spill] sm:$0xff] }
 0x5de   : > { %v2986_v12 = vadd.f32 %v6041_v28, %v2962_v52  ;;  %v2491_v54 = vadd.f32 %v6842_v11, %v2376_v34 }
 0x5df   : > { %v6083_v45 = vpop.f32.mrf.mxu2  ;;  %v2833_v13 = vpop.f32.mrf.mxu3 }
 0x5e0   : > { %v2834_v3 = vadd.f32 %v2833_v13, %v2719_v44  ;;  %v3006_v33 = vmax.f32 %v2986_v12, 0.0  ;;  %v6844_v13 = vld [vmem:[#allocation56_spill] sm:$0xff] }
 0x5e2   : > { %v2927_v24 = vmax.f32 %v6838_v18, %v2834_v3  ;;  %v3026_v14 = vpack.c.bf16 %v3006_v33, %v3006_v33  ;;  %v6845_v33 = vld [vmem:[#allocation12_spill] sm:$0xff] }
 0x5e3   : > { %v2381_v18 = vadd.f32 %v6846_v58, %v6845_v33 }
 0x5e4   : > { %v3058_v2 = vunpack.c.l.b16 %v3026_v14  ;;  %v6847_v14 = vld [vmem:[#allocation74_spill] sm:$0xff] }
 0x5e6   : > { %v6090_v42 = vpack.c.b16 %v3058_v2, %v3057_v7  ;;  %v2726_v7 = vadd.f32 %v6026_v57, %v6847_v14 }
 0x5e7   : > { %v6092_v23 = vpop.f32.mrf.mxu2  ;;  %v2835_v38 = vpop.f32.mrf.mxu3 }
 0x5e8   : > { %v2836_v60 = vadd.f32 %v2835_v38, %v2721_v27  ;;  %3404 = vmatmul.bf16.gmra.mxu0 %v6090_v42  ;;  %v2729_v27 = vadd.f32 %v6034_v29, %v6849_v59 }
 0x5ea   : > { %v2928_v52 = vmax.f32 %v2491_v54, %v2836_v60  ;;  %v6850_v60 = vld [vmem:[#allocation60_spill] sm:$0xff] }
 0x5ec   : > { %2782 = vmatmul.bf16.gmra.mxu2 %v5416_v22  ;;  %2877 = vmatmul.bf16.gmra.mxu3 %v5341_v30  ;;  %v2496_v30 = vadd.f32 %v6848_v0, %v2381_v18 }
 0x5ef   : > { %v6100_v44 = vpop.f32.mrf.mxu2  ;;  %v2838_v53 = vpop.f32.mrf.mxu3 }
 0x5f0   : > { %v2839_v12 = vadd.f32 %v2838_v53, %v2724_v31  ;;  %v6851_v31 = vld [vmem:[#allocation14_spill] sm:$0xff]  ;;  %v6852_v53 = vld [vmem:[#allocation15_spill] sm:$0xff] }
 0x5f2   : > { %v2929_v3 = vmax.f32 %v6844_v13, %v2839_v12  ;;  %v2386_v12 = vadd.f32 %v6852_v53, %v6851_v31  ;;  %v6853_v13 = vld [vmem:[#allocation78_spill] sm:$0xff] }
 0x5f3   : > { %v2731_v33 = vadd.f32 %v6047_v37, %v6853_v13  ;;  %v6857_v13 = vld [vmem:[#allocation17_spill] sm:$0xff] }
 0x5f7   : > { %v6107_v2 = vpop.f32.mrf.mxu2  ;;  %v2840_v48 = vpop.f32.mrf.mxu3 }
 0x5f8   : > { %v2841_v34 = vadd.f32 %v2840_v48, %v2726_v7 }
 0x5fa   : > { %v2930_v21 = vmax.f32 %v2496_v30, %v2841_v34 }
 0x5fc   : > { %2787 = vmatmul.bf16.gmra.mxu2 %v5446_v25  ;;  %2882 = vmatmul.bf16.gmra.mxu3 %v5404_v1  ;;  %v6854_v1 = vld [vmem:[#allocation61_spill] sm:$0xff] }
 0x5fd   : > { %v2501_v14 = vadd.f32 %v6854_v1, %v2386_v12  ;;  %v6856_v12 = vld [vmem:[#allocation16_spill] sm:$0xff]  ;;  %v6858_v1 = vld [vmem:[#allocation65_spill] sm:$0xff] }
 0x5ff   : > { %v6114_v38 = vpop.f32.mrf.mxu2  ;;  %v2843_v11 = vpop.f32.mrf.mxu3 }
 0x600   : > { %v2844_v54 = vadd.f32 %v2843_v11, %v2729_v27 }
 0x602   : > { %v2931_v57 = vmax.f32 %v6850_v60, %v2844_v54 }
 0x604   : > { %v2963_v8 = vmax.f32 %v2927_v24, %v2931_v57  ;;  %v2734_v24 = vadd.f32 %v6058_v35, %v5816_v43  ;;  %v6855_v57 = vld [vmem:[#allocation64_spill] sm:$0xff]  ;;  %v2736_v43 = vadd.f32 %v6073_v5, %v5829_v56  ;;  %v2739_v56 = vadd.f32 %v6083_v45, %v5835_v10 }
 0x605   : > { %v2741_v10 = vadd.f32 %v6092_v23, %v5842_v20  ;;  %v4504_v23 = vld [vmem:[%s6695_s5 + $0x160] sm:$0xf] }
 0x606   : > { %v2987_v29 = vadd.f32 %v6041_v28, %v2963_v8 }
 0x607   : > { %v6121_v58 = vpop.f32.mrf.mxu2  ;;  %v2845_v18 = vpop.f32.mrf.mxu3 }
 0x608   : > { %v2846_v7 = vadd.f32 %v2845_v18, %v2731_v33  ;;  %v3007_v0 = vmax.f32 %v2987_v29, 0.0 }
 0x60a   : > { %v2932_v48 = vmax.f32 %v2501_v14, %v2846_v7  ;;  %v3027_v27 = vpack.c.bf16 %v3007_v0, %v3007_v0 }
 0x60c   : > { %v2964_v30 = vmax.f32 %v2928_v52, %v2932_v48  ;;  %2792 = vmatmul.bf16.gmra.mxu2 %v5476_v62  ;;  %2887 = vmatmul.bf16.gmra.mxu3 %v5416_v22  ;;  %v3059_v31 = vunpack.c.l.b16 %v3027_v27  ;;  %v2391_v22 = vadd.f32 %v6857_v13, %v6856_v12  ;;  %v4709_v12 = vld [vmem:[%s6695_s5 + $0x174] sm:$0xf0] }
 0x60e   : > { %v2988_v37 = vadd.f32 %v6041_v28, %v2964_v30  ;;  %v2506_v14 = vadd.f32 %v6858_v1, %v2391_v22  ;;  %v6859_v30 = vld [vmem:[#allocation39_spill] sm:$0xff] }
 0x60f   : > { %v6130_v34 = vpop.f32.mrf.mxu2  ;;  %v2848_v59 = vpop.f32.mrf.mxu3 }
 0x610   : > { %v3008_v11 = vmax.f32 %v2988_v37, 0.0  ;;  %v2849_v54 = vadd.f32 %v2848_v59, %v2734_v24 }
 0x612   : > { %v3028_v60 = vpack.c.bf16 %v3008_v11, %v3008_v11  ;;  %v2933_v8 = vmax.f32 %v6855_v57, %v2849_v54 }
 0x614   : > { %v3060_v52 = vunpack.c.l.b16 %v3028_v60  ;;  %v2965_v53 = vmax.f32 %v2929_v3, %v2933_v8  ;;  %v6860_v60 = vld [vmem:[#allocation68_spill] sm:$0xff] }
 0x616   : > { %v6137_v35 = vpack.c.b16 %v3060_v52, %v3059_v31  ;;  %v2989_v29 = vadd.f32 %v6041_v28, %v2965_v53  ;;  %v6861_v31 = vld [vmem:[#allocation18_spill] sm:$0xff]  ;;  %v4512_v53 = vld [vmem:[%s6695_s5 + $0x170] sm:$0xf] }
 0x617   : > { %v6139_v33 = vpop.f32.mrf.mxu2  ;;  %v2850_v18 = vpop.f32.mrf.mxu3 }
 0x618   : > { %v2851_v7 = vadd.f32 %v2850_v18, %v2736_v43  ;;  %3409 = vmatmul.bf16.gmra.mxu0 %v6137_v35  ;;  %3434 = vmatmul.bf16.vlgmr.msrb.gmra.mxu1 %v6137_v35  ;;  %v3009_v48 = vmax.f32 %v2989_v29, 0.0  ;;  %v4513_v43 = vor.u32 %v4709_v12, %v4512_v53  ;;  %v6863_v18 = vld [vmem:[#allocation69_spill] sm:$0xff]  ;;  %v4707_v29 = vld [vmem:[%s6695_s5 + $0x164] sm:$0xf0] }
 0x619   : > { %v4701_v53 = vld [vmem:[%s6695_s5 + $0x134] sm:$0xf0] }
 0x61a   : > { %v2934_v3 = vmax.f32 %v2506_v14, %v2851_v7  ;;  %v3029_v59 = vpack.c.bf16 %v3009_v48, %v3009_v48  ;;  %3461 = vmatpush.bf16.msra.mxu0 %v4513_v43  ;;  %v4505_v7 = vor.u32 %v4707_v29, %v4504_v23  ;;  %v2744_v48 = vadd.f32 %v6100_v44, %v5848_v19  ;;  %v4488_v19 = vld [vmem:[%s6695_s5 + $0x140] sm:$0xf]  ;;  %v4703_v44 = vld [vmem:[%s6695_s5 + $0x144] sm:$0xf0] }
 0x61c   : > { %v2966_v0 = vmax.f32 %v2930_v21, %v2934_v3  ;;  %2797 = vmatmul.bf16.gmra.mxu2 %v6859_v30  ;;  %2892 = vmatmul.bf16.gmra.mxu3 %v5446_v25  ;;  %v3061_v57 = vunpack.c.l.b16 %v3029_v59  ;;  %v6862_v25 = vld [vmem:[#allocation19_spill] sm:$0xff]  ;;  %v6864_v3 = vld [vmem:[#allocation42_spill] sm:$0xff] }
 0x61d   : > { %v2396_v52 = vadd.f32 %v6862_v25, %v6861_v31  ;;  %v6867_v31 = vld [vmem:[#allocation21_spill] sm:$0xff] }
 0x61e   : > { %v2990_v5 = vadd.f32 %v6041_v28, %v2966_v0  ;;  %3462 = vmatpush.bf16.msra.mxu0 %v4505_v7  ;;  %v4496_v0 = vld [vmem:[%s6695_s5 + $0x150] sm:$0xf]  ;;  %v4699_v7 = vld [vmem:[%s6695_s5 + $0x124] sm:$0xf0] }
 0x61f   : > { %v6150_v24 = vpop.f32.mrf.mxu2  ;;  %v2853_v37 = vpop.f32.mrf.mxu3  ;;  %v6171_v1 = vadd.f32 %v6863_v18, %v2396_v52  ;;  %v2746_v52 = vadd.f32 %v6107_v2, %v5862_v36  ;;  %v6868_v18 = vld [vmem:[#allocation73_spill] sm:$0xff]  ;;  %v4472_v2 = vld [vmem:[%s6695_s5 + $0x120] sm:$0xf] }
 0x620   : > { %v3010_v27 = vmax.f32 %v2990_v5, 0.0  ;;  %v6152_v11 = vadd.f32 %v2853_v37, %v2739_v56  ;;  %v4705_v56 = vld [vmem:[%s6695_s5 + $0x154] sm:$0xf0] }
 0x621   : > { %v4497_v59 = vor.u32 %v4705_v56, %v4496_v0  ;;  %v2749_v0 = vadd.f32 %v6114_v38, %v5868_v9  ;;  %v4464_v56 = vld [vmem:[%s6695_s5 + $0x110] sm:$0xf]  ;;  %v4456_v9 = vld [vmem:[%s6695_s5 + $0x100] sm:$0xf]  ;;  %v4695_v38 = vld [vmem:[%s6695_s5 + $0x104] sm:$0xf0] }
 0x622   : > { %v3030_v54 = vpack.c.bf16 %v3010_v27, %v3010_v27  ;;  %v2935_v21 = vmax.f32 %v6860_v60, %v6152_v11  ;;  %v4717_v11 = vld [vmem:[%s6697_s7 + $0x38] sm:$0xff] }
 0x623   : > { %3463 = vmatpush.bf16.msra.mxu0 %v4497_v59  ;;  %3695 = vmatpush.bf16.msrb.mxu2 %v4717_v11  ;;  %v6873_v11 = vld [vmem:[#allocation25_spill] sm:$0xff] }
 0x624   : > { %v3062_v8 = vunpack.c.l.b16 %v3030_v54 }
 0x626   : > { %v6160_v45 = vpack.c.b16 %v3062_v8, %v3061_v57  ;;  %v4489_v57 = vor.u32 %v4703_v44, %v4488_v19  ;;  %v6866_v8 = vld [vmem:[#allocation20_spill] sm:$0xff] }
 0x627   : > { %v6168_v13 = vpop.f32.mrf.mxu2  ;;  %v2855_v22 = vpop.f32.mrf.mxu3  ;;  %v2401_v25 = vadd.f32 %v6867_v31, %v6866_v8  ;;  %v6869_v8 = vld [vmem:[#allocation76_spill] sm:$0xff]  ;;  %v4457_v31 = vor.u32 %v4695_v38, %v4456_v9  ;;  %v2754_v38 = vadd.f32 %v6130_v34, %v5881_v26  ;;  %v4362_v26 = vld [vmem:[%s6695_s5 + $0x48] sm:$0xf0] }
 0x628   : > { %v6173_v14 = vadd.f32 %v2855_v22, %v2741_v10  ;;  %3414 = vmatmul.bf16.gmra.mxu0 %v6160_v45  ;;  %3439 = vmatmul.bf16.gmra.mxu1 %v6160_v45  ;;  %v4480_v10 = vld [vmem:[%s6695_s5 + $0x130] sm:$0xf] }
 0x629   : > { %3464 = vmatpush.bf16.msra.mxu0 %v4489_v57  ;;  %v4481_v43 = vor.u32 %v4701_v53, %v4480_v10  ;;  %v6220_v23 = vadd.f32 %v6868_v18, %v2401_v25  ;;  %v6871_v10 = vld [vmem:[#allocation23_spill] sm:$0xff]  ;;  %v4386_v18 = vld [vmem:[%s6695_s5 + $0x78] sm:$0xf0] }
 0x62a   : > { %v2936_v20 = vmax.f32 %v6171_v1, %v6173_v14 }
 0x62c   : > { %2800 = vmatmul.bf16.gmra.mxu2 %v6864_v3  ;;  %2897 = vmatmul.bf16.gmra.mxu3 %v5476_v62  ;;  %v6865_v62 = vld [vmem:[#allocation72_spill] sm:$0xff] }
 0x62d   : > { %3465 = vmatpush.bf16.msra.mxu0 %v4481_v43  ;;  %v4676_v43 = vld [vmem:[%s6695_s5 + $0x74] sm:$0xf] }
 0x62f   : > { %v6195_v5 = vpop.f32.mrf.mxu2  ;;  %v2858_v37 = vpop.f32.mrf.mxu3 }
 0x630   : > { %v6197_v27 = vadd.f32 %v2858_v37, %v2744_v48  ;;  %v4473_v48 = vor.u32 %v4699_v7, %v4472_v2  ;;  %v4697_v37 = vld [vmem:[%s6695_s5 + $0x114] sm:$0xf0]  ;;  %v4389_v2 = vor.u32 %v4676_v43, %v4386_v18 }
 0x631   : > { %v4465_v44 = vor.u32 %v4697_v37, %v4464_v56  ;;  %v6872_v7 = vld [vmem:[#allocation77_spill] sm:$0xff] }
 0x632   : > { %v2937_v54 = vmax.f32 %v6865_v62, %v6197_v27  ;;  %3466 = vmatpush.bf16.msra.mxu0 %v4473_v48  ;;  %3496 = vmatpush.bf16.msra.mxu1 %v4389_v2 }
 0x636   : > { %3467 = vmatpush.bf16.msra.mxu0 %v4465_v44 }
 0x637   : > { %v6217_v12 = vpop.f32.mrf.mxu2  ;;  %v2860_v22 = vpop.f32.mrf.mxu3 }
 0x638   : > { %v6222_v29 = vadd.f32 %v2860_v22, %v2746_v52  ;;  %v6870_v52 = vld [vmem:[#allocation22_spill] sm:$0xff]  ;;  %v2751_v22 = vadd.f32 %v6121_v58, %v5877_v51  ;;  %v4378_v58 = vld [vmem:[%s6695_s5 + $0x68] sm:$0xf0] }
 0x639   : > { %v2406_v53 = vadd.f32 %v6871_v10, %v6870_v52  ;;  %v4674_v51 = vld [vmem:[%s6695_s5 + $0x64] sm:$0xf] }
 0x63a   : > { %v2938_v36 = vmax.f32 %v6220_v23, %v6222_v29  ;;  %3468 = vmatpush.bf16.msra.mxu0 %v4457_v31  ;;  %v4381_v37 = vor.u32 %v4674_v51, %v4378_v58  ;;  %v6875_v23 = vld [vmem:[#allocation27_spill] sm:$0xff]  ;;  %v6876_v29 = vld [vmem:[#allocation28_spill] sm:$0xff] }
 0x63b   : > { %v2521_v48 = vadd.f32 %v6872_v7, %v2406_v53  ;;  %v4670_v53 = vld [vmem:[%s6695_s5 + $0x44] sm:$0xf] }
 0x63c   : > { %2902 = vmatmul.bf16.gmra.mxu3 %v6859_v30  ;;  %3497 = vmatpush.bf16.msra.mxu1 %v4381_v37  ;;  %v4365_v34 = vor.u32 %v4670_v53, %v4362_v26  ;;  %v4666_v26 = vld [vmem:[%s6695_s5 + $0x24] sm:$0xf] }
 0x63f   : > { %v6241_v59 = vpop.f32.mrf.mxu2  ;;  %v2863_v19 = vpop.f32.mrf.mxu3 }
 0x640   : > { %v2864_v57 = vadd.f32 %v2863_v19, %v2749_v0 }
 0x642   : > { %v2939_v30 = vmax.f32 %v6869_v8, %v2864_v57  ;;  %v4672_v8 = vld [vmem:[%s6695_s5 + $0x54] sm:$0xf] }
 0x644   : > { %v2967_v25 = vmax.f32 %v2935_v21, %v2939_v30  ;;  %v4370_v30 = vld [vmem:[%s6695_s5 + $0x58] sm:$0xf0] }
 0x645   : > { %v4373_v9 = vor.u32 %v4672_v8, %v4370_v30 }
 0x646   : > { %v2991_v0 = vadd.f32 %v6041_v28, %v2967_v25 }
 0x647   : > { %v6266_v60 = vpop.f32.mrf.mxu2  ;;  %v2865_v21 = vpop.f32.mrf.mxu3  ;;  %3498 = vmatpush.bf16.msra.mxu1 %v4373_v9 }
 0x648   : > { %v2866_v56 = vadd.f32 %v2865_v21, %v2751_v22  ;;  %v3011_v44 = vmax.f32 %v2991_v0, 0.0  ;;  %v6874_v21 = vld [vmem:[#allocation26_spill] sm:$0xff] }
 0x649   : > { %v2411_v2 = vadd.f32 %v6874_v21, %v6873_v11 }
 0x64a   : > { %v2940_v19 = vmax.f32 %v2521_v48, %v2866_v56  ;;  %v3031_v14 = vpack.c.bf16 %v3011_v44, %v3011_v44 }
 0x64b   : > { %3499 = vmatpush.bf16.msra.mxu1 %v4365_v34  ;;  %v2526_v48 = vadd.f32 %v5827_v50, %v2411_v2  ;;  %v4346_v34 = vld [vmem:[%s6695_s5 + $0x28] sm:$0xf0] }
 0x64c   : > { %v2968_v57 = vmax.f32 %v2936_v20, %v2940_v19  ;;  %2907 = vmatmul.bf16.gmra.mxu3 %v6864_v3  ;;  %v3063_v22 = vunpack.c.l.b16 %v3031_v14 }
 0x64e   : > { %v2992_v31 = vadd.f32 %v6041_v28, %v2968_v57 }
 0x64f   : > { %v6289_v25 = vpop.f32.mrf.mxu2  ;;  %v2868_v1 = vpop.f32.mrf.mxu3 }
 0x650   : > { %v3012_v20 = vmax.f32 %v2992_v31, 0.0  ;;  %v2869_v3 = vadd.f32 %v2868_v1, %v2754_v38 }
 0x652   : > { %v3032_v52 = vpack.c.bf16 %v3012_v20, %v3012_v20  ;;  %v2941_v10 = vmax.f32 %v5819_v61, %v2869_v3  ;;  %v2756_v61 = vadd.f32 %v6139_v33, %v5888_v16  ;;  %v2759_v33 = vadd.f32 %v6150_v24, %v5898_v4  ;;  %v4668_v20 = vld [vmem:[%s6695_s5 + $0x34] sm:$0xf] }
 0x653   : > { %v2764_v3 = vadd.f32 %v6195_v5, %v5918_v63  ;;  %v6877_v63 = vld [vmem:[#allocation29_spill] sm:$0xff]  ;;  %v6878_v5 = vld [vmem:[#allocation30_spill] sm:$0xff] }
 0x654   : > { %v3064_v43 = vunpack.c.l.b16 %v3032_v52  ;;  %v2969_v18 = vmax.f32 %v2937_v54, %v2941_v10 }
 0x656   : > { %v6305_v51 = vpack.c.b16 %v3064_v43, %v3063_v22  ;;  %v2993_v0 = vadd.f32 %v6041_v28, %v2969_v18  ;;  %v4349_v22 = vor.u32 %v4666_v26, %v4346_v34  ;;  %v2421_v43 = vadd.f32 %v6878_v5, %v6877_v63 }
 0x657   : > { %v6307_v58 = vpop.f32.mrf.mxu2  ;;  %v2870_v7 = vpop.f32.mrf.mxu3  ;;  %v2766_v18 = vadd.f32 %v6217_v12, %v5925_v39  ;;  %v4664_v39 = vld [vmem:[%s6695_s5 + $0x14] sm:$0xf]  ;;  %v4338_v12 = vld [vmem:[%s6695_s5 + $0x18] sm:$0xf0] }
 0x658   : > { %v2871_v56 = vadd.f32 %v2870_v7, %v2756_v61  ;;  %3419 = vmatmul.bf16.gmra.mxu0 %v6305_v51  ;;  %3444 = vmatmul.bf16.gmra.mxu1 %v6305_v51  ;;  %v3013_v62 = vmax.f32 %v2993_v0, 0.0  ;;  %v6365_v2 = vadd.f32 %v5860_v17, %v2421_v43  ;;  %v2769_v17 = vadd.f32 %v6241_v59, %v5929_v49  ;;  %v6880_v49 = vld [vmem:[#allocation35_spill] sm:$0xff] }
 0x65a   : > { %v2942_v27 = vmax.f32 %v2526_v48, %v2871_v56  ;;  %v3033_v19 = vpack.c.bf16 %v3013_v62, %v3013_v62  ;;  %v4341_v48 = vor.u32 %v4664_v39, %v4338_v12  ;;  %v4715_v12 = vld [vmem:[%s6697_s7 + $0x28] sm:$0xff] }
 0x65c   : > { %v2970_v16 = vmax.f32 %v2938_v36, %v2942_v27  ;;  %2912 = vmatmul.bf16.gmra.mxu3 %v5831_v32  ;;  %v3065_v9 = vunpack.c.l.b16 %v3033_v19  ;;  %v2416_v36 = vadd.f32 %v6876_v29, %v6875_v23  ;;  %v2761_v32 = vadd.f32 %v6168_v13, %v5914_v41  ;;  %v4354_v41 = vld [vmem:[%s6695_s5 + $0x38] sm:$0xf0]  ;;  %v6879_v19 = vld [vmem:[#allocation34_spill] sm:$0xff] }
 0x65d   : > { %v4357_v13 = vor.u32 %v4668_v20, %v4354_v41  ;;  %v2426_v59 = vadd.f32 %v6880_v49, %v6879_v19  ;;  %v6886_v19 = vld [vmem:[#allocation38_spill] sm:$0xff] }
 0x65e   : > { %v2994_v50 = vadd.f32 %v6041_v28, %v2970_v16  ;;  %v2531_v1 = vadd.f32 %v5840_v46, %v2416_v36  ;;  %v4716_v46 = vld [vmem:[%s6697_s7 + $0x30] sm:$0xff]  ;;  %v4662_v16 = vld [vmem:[%s6695_s5 + $0x4] sm:$0xf]  ;;  %v3400_v36 = vpop.f32.mrf.mxu0 }
 0x65f   : > { %v6320_v54 = vpop.f32.mrf.mxu2  ;;  %v2873_v37 = vpop.f32.mrf.mxu3  ;;  %3696 = vmatpush.bf16.msrb.mxu2 %v4716_v46  ;;  %3500 = vmatpush.bf16.msra.mxu1 %v4357_v13  ;;  %v6883_v13 = vld [vmem:[#allocation86_spill] sm:$0xff] }
 0x660   : > { %v3014_v44 = vmax.f32 %v2994_v50, 0.0  ;;  %v2874_v57 = vadd.f32 %v2873_v37, %v2759_v33  ;;  %v4330_v33 = vld [vmem:[%s6695_s5 + $0x8] sm:$0xf0] }
 0x661   : > { %v4333_v50 = vor.u32 %v4662_v16, %v4330_v33 }
 0x662   : > { %v3034_v8 = vpack.c.bf16 %v3014_v44, %v3014_v44  ;;  %v2943_v30 = vmax.f32 %v5838_v6, %v2874_v57  ;;  %v6881_v44 = vld [vmem:[#allocation85_spill] sm:$0xff] }
 0x663   : > { %3501 = vmatpush.bf16.msra.mxu1 %v4349_v22  ;;  %v2771_v57 = vadd.f32 %v6266_v60, %v6881_v44  ;;  %3697 = vmatpush.bf16.msrb.mxu2 %v4715_v12 }
 0x664   : > { %v3066_v38 = vunpack.c.l.b16 %v3034_v8  ;;  %v4450_v8 = vld [vmem:[%s6695_s5 + $0xf8] sm:$0xf0] }
 0x666   : > { %v6327_v4 = vpack.c.b16 %v3066_v38, %v3065_v9  ;;  %v6415_v43 = vpop.f32.mrf.mxu0 }
 0x667   : > { %v6329_v24 = vpop.f32.mrf.mxu2  ;;  %v2875_v31 = vpop.f32.mrf.mxu3  ;;  %3502 = vmatpush.bf16.msra.mxu1 %v4341_v48 }
 0x668   : > { %v2876_v14 = vadd.f32 %v2875_v31, %v2761_v32  ;;  %3449 = vmatmul.bf16.gmra.mxu1 %v6327_v4  ;;  %3469 = vmatmul.bf16.vlgmr.msra.gmra.mxu0 %v6305_v51 }
 0x66a   : > { %v2944_v6 = vmax.f32 %v2531_v1, %v2876_v14  ;;  %v4708_v1 = vld [vmem:[%s6695_s5 + $0x174] sm:$0xf]  ;;  %v4514_v14 = vld [vmem:[%s6695_s5 + $0x178] sm:$0xf0] }
 0x66b   : > { %3503 = vmatpush.bf16.msra.mxu1 %v4333_v50  ;;  %v4517_v20 = vor.u32 %v4708_v1, %v4514_v14  ;;  %v6889_v14 = vld [vmem:[#allocation90_spill] sm:$0xff] }
 0x66c   : > { %2915 = vmatmul.bf16.gmra.mxu3 %v5844_v40 }
 0x66f   : > { %v6346_v52 = vpop.f32.mrf.mxu2  ;;  %v2878_v40 = vpop.f32.mrf.mxu3  ;;  %3566 = vmatpush.bf16.msrb.mxu1 %v4517_v20  ;;  %v2779_v20 = vadd.f32 %v6320_v54, %v6889_v14 }
 0x670   : > { %v6348_v10 = vadd.f32 %v2878_v40, %v2764_v3  ;;  %v2774_v3 = vadd.f32 %v6289_v25, %v6883_v13  ;;  %v4442_v25 = vld [vmem:[%s6695_s5 + $0xe8] sm:$0xf0] }
 0x672   : > { %v2945_v53 = vmax.f32 %v5851_v47, %v6348_v10  ;;  %v6888_v47 = vld [vmem:[#allocation36_spill] sm:$0xff] }
 0x677   : > { %v6362_v11 = vpop.f32.mrf.mxu2  ;;  %v2880_v21 = vpop.f32.mrf.mxu3 }
 0x678   : > { %v6367_v61 = vadd.f32 %v2880_v21, %v2766_v18  ;;  %3474 = vmatmul.bf16.gmra.mxu0 %v6327_v4  ;;  %v6884_v21 = vld [vmem:[#allocation32_spill] sm:$0xff] }
 0x67a   : > { %v2946_v7 = vmax.f32 %v6365_v2, %v6367_v61 }
 0x67c   : > { %3422 = vmatmul.bf16.vlgmr.msrb.gmra.mxu3 %v6327_v4 }
 0x67f   : > { %v6381_v0 = vpop.f32.mrf.mxu2  ;;  %v2883_v56 = vpop.f32.mrf.mxu3 }
 0x680   : > { %v2884_v27 = vadd.f32 %v2883_v56, %v2769_v17  ;;  %v4706_v17 = vld [vmem:[%s6695_s5 + $0x164] sm:$0xf]  ;;  %v4506_v56 = vld [vmem:[%s6695_s5 + $0x168] sm:$0xf0] }
 0x681   : > { %v4509_v33 = vor.u32 %v4706_v17, %v4506_v56  ;;  %v4704_v17 = vld [vmem:[%s6695_s5 + $0x154] sm:$0xf]  ;;  %v4498_v56 = vld [vmem:[%s6695_s5 + $0x158] sm:$0xf0] }
 0x682   : > { %v2947_v62 = vmax.f32 %v5871_v15, %v2884_v27  ;;  %v4692_v15 = vld [vmem:[%s6695_s5 + $0xf4] sm:$0xf] }
 0x683   : > { %v4453_v23 = vor.u32 %v4692_v15, %v4450_v8  ;;  %3567 = vmatpush.bf16.msrb.mxu1 %v4509_v33  ;;  %v6894_v33 = vld [vmem:[#allocation80_spill] sm:$0xff] }
 0x684   : > { %v2971_v37 = vmax.f32 %v2943_v30, %v2947_v62  ;;  %v6882_v30 = vld [vmem:[#allocation31_spill] sm:$0xff] }
 0x685   : > { %v2541_v29 = vadd.f32 %v6882_v30, %v2426_v59  ;;  %3531 = vmatpush.bf16.msrb.mxu0 %v4453_v23  ;;  %v6887_v59 = vld [vmem:[#allocation88_spill] sm:$0xff] }
 0x686   : > { %v2995_v32 = vadd.f32 %v6041_v28, %v2971_v37  ;;  %v6885_v37 = vld [vmem:[#allocation37_spill] sm:$0xff]  ;;  %v2776_v44 = vadd.f32 %v6307_v58, %v6887_v59  ;;  %v4688_v58 = vld [vmem:[%s6695_s5 + $0xd4] sm:$0xf] }
 0x687   : > { %v6400_v9 = vpop.f32.mrf.mxu2  ;;  %v2885_v38 = vpop.f32.mrf.mxu3  ;;  %v2431_v49 = vadd.f32 %v6886_v19, %v6885_v37  ;;  %v6895_v19 = vld [vmem:[#allocation92_spill] sm:$0xff] }
 0x688   : > { %v2886_v31 = vadd.f32 %v2885_v38, %v2771_v57  ;;  %v3015_v41 = vmax.f32 %v2995_v32, 0.0  ;;  %v3405_v32 = vpop.f32.mrf.mxu0 }
 0x689   : > { %v2546_v10 = vadd.f32 %v6888_v47, %v2431_v49  ;;  %v2784_v49 = vadd.f32 %v6346_v52, %v6895_v19  ;;  %v4490_v52 = vld [vmem:[%s6695_s5 + $0x148] sm:$0xf0] }
 0x68a   : > { %v2948_v60 = vmax.f32 %v2541_v29, %v2886_v31  ;;  %v3035_v22 = vpack.c.bf16 %v3015_v41, %v3015_v41  ;;  %v4434_v29 = vld [vmem:[%s6695_s5 + $0xd8] sm:$0xf0] }
 0x68c   : > { %v2972_v46 = vmax.f32 %v2944_v6, %v2948_v60  ;;  %v4690_v6 = vld [vmem:[%s6695_s5 + $0xe4] sm:$0xf]  ;;  %v3083_v27 = vunpack.c.l.b16 %v3035_v22 }
 0x68d   : > { %v4445_v48 = vor.u32 %v4690_v6, %v4442_v25  ;;  %v6893_v6 = vld [vmem:[#allocation91_spill] sm:$0xff] }
 0x68e   : > { %v2996_v40 = vadd.f32 %v6041_v28, %v2972_v46  ;;  %v2781_v54 = vadd.f32 %v6329_v24, %v6893_v6  ;;  %v4714_v6 = vld [vmem:[%s6697_s7 + $0x20] sm:$0xff] }
 0x68f   : > { %v6413_v26 = vpop.f32.mrf.mxu2  ;;  %v2888_v34 = vpop.f32.mrf.mxu3  ;;  %3532 = vmatpush.bf16.msrb.mxu0 %v4445_v48  ;;  %3698 = vmatpush.bf16.msrb.mxu2 %v4714_v6 }
 0x690   : > { %v3016_v63 = vmax.f32 %v2996_v40, 0.0  ;;  %v2889_v5 = vadd.f32 %v2888_v34, %v2774_v3  ;;  %v6472_v25 = vpop.f32.mrf.mxu0 }
 0x692   : > { %v3036_v18 = vpack.c.bf16 %v3016_v63, %v3016_v63  ;;  %v2949_v39 = vmax.f32 %v6884_v21, %v2889_v5  ;;  %v6890_v63 = vld [vmem:[#allocation79_spill] sm:$0xff]  ;;  %v6892_v21 = vld [vmem:[#allocation41_spill] sm:$0xff] }
 0x694   : > { %v3084_v62 = vunpack.c.l.b16 %v3036_v18  ;;  %v2973_v16 = vmax.f32 %v2945_v53, %v2949_v39  ;;  %v6891_v18 = vld [vmem:[#allocation40_spill] sm:$0xff] }
 0x695   : > { %v3435_v50 = vpop.f32.mrf.mxu1  ;;  %v2436_v39 = vadd.f32 %v6892_v21, %v6891_v18  ;;  %v4700_v21 = vld [vmem:[%s6695_s5 + $0x134] sm:$0xf] }
 0x696   : > { %v6440_v57 = vadd.f32 %v3435_v50, %v3400_v36  ;;  %v6442_v15 = vpack.c.b16 %v3084_v62, %v3083_v27  ;;  %v2997_v53 = vadd.f32 %v6041_v28, %v2973_v16  ;;  %v4437_v36 = vor.u32 %v4688_v58, %v4434_v29  ;;  %v6896_v58 = vld [vmem:[#allocation81_spill] sm:$0xff] }
 0x697   : > { %v6444_v8 = vpop.f32.mrf.mxu2  ;;  %v2890_v38 = vpop.f32.mrf.mxu3  ;;  %v4501_v16 = vor.u32 %v4704_v17, %v4498_v56  ;;  %v6485_v50 = vadd.f32 %v6894_v33, %v2436_v39  ;;  %v4482_v39 = vld [vmem:[%s6695_s5 + $0x138] sm:$0xf0]  ;;  %v4682_v17 = vld [vmem:[%s6695_s5 + $0xa4] sm:$0xf] }
 0x698   : > { %v2891_v23 = vadd.f32 %v2890_v38, %v2776_v44  ;;  %3454 = vmatmul.bf16.gmra.mxu1 %v6442_v15  ;;  %3479 = vmatmul.bf16.gmra.mxu0 %v6442_v15  ;;  %v3017_v31 = vmax.f32 %v2997_v53, 0.0  ;;  %v6493_v59 = vpop.f32.mrf.mxu0  ;;  %v4686_v44 = vld [vmem:[%s6695_s5 + $0xc4] sm:$0xf]  ;;  %v4426_v38 = vld [vmem:[%s6695_s5 + $0xc8] sm:$0xf0] }
 0x699   : > { %3533 = vmatpush.bf16.msrb.mxu0 %v4437_v36  ;;  %3568 = vmatpush.bf16.msrb.mxu1 %v4501_v16  ;;  %v4429_v53 = vor.u32 %v4686_v44, %v4426_v38  ;;  %v6897_v36 = vld [vmem:[#allocation43_spill] sm:$0xff]  ;;  %v4698_v56 = vld [vmem:[%s6695_s5 + $0x124] sm:$0xf]  ;;  %v6903_v44 = vld [vmem:[#allocation44_spill] sm:$0xff] }
 0x69a   : > { %v2950_v30 = vmax.f32 %v2546_v10, %v2891_v23  ;;  %v3037_v3 = vpack.c.bf16 %v3017_v31, %v3017_v31  ;;  %v4474_v16 = vld [vmem:[%s6695_s5 + $0x128] sm:$0xf0] }
 0x69b   : > { %v4477_v33 = vor.u32 %v4698_v56, %v4474_v16  ;;  %v6904_v38 = vld [vmem:[#allocation47_spill] sm:$0xff] }
 0x69c   : > { %v2974_v60 = vmax.f32 %v2946_v7, %v2950_v30  ;;  %v3085_v2 = vunpack.c.l.b16 %v3037_v3 }
 0x69d   : > { %v6459_v1 = vpop.f32.mrf.mxu1  ;;  %3534 = vmatpush.bf16.msrb.mxu0 %v4429_v53 }
 0x69e   : > { %v2998_v41 = vadd.f32 %v6041_v28, %v2974_v60  ;;  %v6899_v60 = vld [vmem:[#allocation93_spill] sm:$0xff] }
 0x69f   : > { %v2798_v46 = vpop.f32.mrf.mxu2  ;;  %v2893_v13 = vpop.f32.mrf.mxu3  ;;  %v2786_v14 = vadd.f32 %v6362_v11, %v6899_v60 }
 0x6a0   : > { %v3018_v40 = vmax.f32 %v2998_v41, 0.0  ;;  %v6464_v34 = vadd.f32 %v2893_v13, %v2779_v20  ;;  %v4684_v20 = vld [vmem:[%s6695_s5 + $0xb4] sm:$0xf]  ;;  %v4418_v41 = vld [vmem:[%s6695_s5 + $0xb8] sm:$0xf0] }
 0x6a1   : > { %v4421_v3 = vor.u32 %v4684_v20, %v4418_v41  ;;  %v4680_v41 = vld [vmem:[%s6695_s5 + $0x94] sm:$0xf] }
 0x6a2   : > { %v3038_v22 = vpack.c.bf16 %v3018_v40, %v3018_v40  ;;  %v2951_v5 = vmax.f32 %v6890_v63, %v6464_v34  ;;  %v6900_v40 = vld [vmem:[#allocation82_spill] sm:$0xff] }
 0x6a3   : > { %3535 = vmatpush.bf16.msrb.mxu0 %v4421_v3  ;;  %v4696_v3 = vld [vmem:[%s6695_s5 + $0x114] sm:$0xf] }
 0x6a4   : > { %v3086_v61 = vunpack.c.l.b16 %v3038_v22 }
 0x6a5   : > { %v3440_v7 = vpop.f32.mrf.mxu1 }
 0x6a6   : > { %v6474_v12 = vpack.c.b16 %v3086_v61, %v3085_v2  ;;  %v6476_v48 = vadd.f32 %v3440_v7, %v3405_v32  ;;  %v6898_v32 = vld [vmem:[#allocation46_spill] sm:$0xff]  ;;  %v6526_v61 = vpop.f32.mrf.mxu0 }
 0x6a7   : > { %v2799_v27 = vpop.f32.mrf.mxu2  ;;  %v2895_v62 = vpop.f32.mrf.mxu3  ;;  %v2441_v31 = vadd.f32 %v6898_v32, %v6897_v36  ;;  %v6901_v7 = vld [vmem:[#allocation94_spill] sm:$0xff] }
 0x6a8   : > { %v2896_v24 = vadd.f32 %v2895_v62, %v2781_v54  ;;  %3457 = vmatmul.bf16.vlgmr.msra.gmra.mxu3 %v6474_v12  ;;  %3484 = vmatmul.bf16.gmra.mxu0 %v6474_v12  ;;  %v2789_v18 = vadd.f32 %v6381_v0, %v6901_v7  ;;  %v4485_v54 = vor.u32 %v4700_v21, %v4482_v39  ;;  %v4410_v0 = vld [vmem:[%s6695_s5 + $0xa8] sm:$0xf0] }
 0x6a9   : > { %3504 = vmatmul.bf16.vlgmr.msra.gmra.mxu1 %v6071_v55  ;;  %v4702_v55 = vld [vmem:[%s6695_s5 + $0x144] sm:$0xf]  ;;  %v6522_v22 = vadd.f32 %v6900_v40, %v2441_v31  ;;  %v4413_v62 = vor.u32 %v4682_v17, %v4410_v0  ;;  %v6908_v39 = vld [vmem:[#allocation87_spill] sm:$0xff] }
 0x6aa   : > { %v2952_v37 = vmax.f32 %v6485_v50, %v2896_v24  ;;  %v4493_v30 = vor.u32 %v4702_v55, %v4490_v52  ;;  %v6902_v50 = vld [vmem:[#allocation83_spill] sm:$0xff]  ;;  %v2446_v55 = vadd.f32 %v6904_v38, %v6903_v44  ;;  %v6906_v52 = vld [vmem:[#allocation84_spill] sm:$0xff] }
 0x6ab   : > { %3536 = vmatpush.bf16.msrb.mxu0 %v4413_v62  ;;  %v4394_v17 = vld [vmem:[%s6695_s5 + $0x88] sm:$0xf0] }
 0x6ac   : > { %3569 = vmatpush.bf16.msrb.mxu1 %v4493_v30  ;;  %v2561_v30 = vadd.f32 %v6906_v52, %v2446_v55 }
 0x6ad   : > { %v6569_v63 = vpop.f32.mrf.mxu1 }
 0x6ae   : > { %v6555_v19 = vpop.f32.mrf.mxu0 }
 0x6af   : > { %v2801_v47 = vpop.f32.mrf.mxu2  ;;  %v2898_v10 = vpop.f32.mrf.mxu3 }
 0x6b0   : > { %v6507_v23 = vadd.f32 %v2898_v10, %v2784_v49  ;;  %3570 = vmatpush.bf16.msrb.mxu1 %v4485_v54  ;;  %v6905_v47 = vld [vmem:[#allocation95_spill] sm:$0xff]  ;;  %v4678_v54 = vld [vmem:[%s6695_s5 + $0x84] sm:$0xf] }
 0x6b1   : > { %v2791_v10 = vadd.f32 %v6400_v9, %v6905_v47  ;;  %v4397_v62 = vor.u32 %v4678_v54, %v4394_v17 }
 0x6b2   : > { %v2953_v29 = vmax.f32 %v6896_v58, %v6507_v23  ;;  %v4694_v23 = vld [vmem:[%s6695_s5 + $0x104] sm:$0xf] }
 0x6b4   : > { %3571 = vmatpush.bf16.msrb.mxu1 %v4477_v33 }
 0x6b6   : > { %v6567_v34 = vpop.f32.mrf.mxu0 }
 0x6b7   : > { %v2802_v46 = vpop.f32.mrf.mxu2  ;;  %v2900_v13 = vpop.f32.mrf.mxu3 }
 0x6b8   : > { %v6524_v2 = vadd.f32 %v2900_v13, %v2786_v14  ;;  %v4402_v46 = vld [vmem:[%s6695_s5 + $0x98] sm:$0xf0] }
 0x6b9   : > { %3509 = vmatmul.bf16.gmra.mxu1 %v6090_v42 }
 0x6ba   : > { %v2954_v11 = vmax.f32 %v6522_v22, %v6524_v2 }
 0x6bf   : > { %v2903_v42 = vpop.f32.mrf.mxu3 }
 0x6c0   : > { %v2904_v27 = vadd.f32 %v2903_v42, %v2789_v18 }
 0x6c2   : > { %v2955_v24 = vmax.f32 %v6902_v50, %v2904_v27  ;;  %v6909_v50 = vld [vmem:[#allocation97_spill] sm:$0xff] }
 0x6c4   : > { %v2975_v49 = vmax.f32 %v2951_v5, %v2955_v24  ;;  %v6907_v5 = vld [vmem:[#allocation96_spill] sm:$0xff]  ;;  %v2796_v24 = vadd.f32 %v6444_v8, %v6909_v50  ;;  %v4458_v8 = vld [vmem:[%s6695_s5 + $0x108] sm:$0xf0] }
 0x6c5   : > { %v2794_v20 = vadd.f32 %v6413_v26, %v6907_v5  ;;  %v4466_v26 = vld [vmem:[%s6695_s5 + $0x118] sm:$0xf0] }
 0x6c6   : > { %v2999_v36 = vadd.f32 %v6041_v28, %v2975_v49  ;;  %v4469_v21 = vor.u32 %v4696_v3, %v4466_v26 }
 0x6c7   : > { %v2905_v53 = vpop.f32.mrf.mxu3 }
 0x6c8   : > { %v2906_v32 = vadd.f32 %v2905_v53, %v2791_v10  ;;  %v3019_v14 = vmax.f32 %v2999_v36, 0.0  ;;  %3572 = vmatpush.bf16.msrb.mxu1 %v4469_v21 }
 0x6c9   : > { %3514 = vmatmul.bf16.gmra.mxu1 %v6137_v35 }
 0x6ca   : > { %v2956_v31 = vmax.f32 %v2561_v30, %v2906_v32  ;;  %v3039_v18 = vpack.c.bf16 %v3019_v14, %v3019_v14 }
 0x6cc   : > { %v2976_v60 = vmax.f32 %v2952_v37, %v2956_v31  ;;  %v4405_v37 = vor.u32 %v4680_v41, %v4402_v46  ;;  %v3095_v56 = vunpack.c.l.b16 %v3039_v18 }
 0x6ce   : > { %v3000_v9 = vadd.f32 %v6041_v28, %v2976_v60  ;;  %3537 = vmatpush.bf16.msrb.mxu0 %v4405_v37 }
 0x6cf   : > { %v2908_v13 = vpop.f32.mrf.mxu3 }
 0x6d0   : > { %v2909_v40 = vadd.f32 %v2908_v13, %v2794_v20  ;;  %v3020_v7 = vmax.f32 %v3000_v9, 0.0 }
 0x6d2   : > { %v2957_v6 = vmax.f32 %v6908_v39, %v2909_v40  ;;  %v3040_v42 = vpack.c.bf16 %v3020_v7, %v3020_v7  ;;  %3538 = vmatpush.bf16.msrb.mxu0 %v4397_v62 }
 0x6d4   : > { %v2977_v0 = vmax.f32 %v2953_v29, %v2957_v6  ;;  %v3096_v27 = vunpack.c.l.b16 %v3040_v42  ;;  %v4461_v29 = vor.u32 %v4694_v23, %v4458_v8 }
 0x6d5   : > { %v3420_v16 = vpop.f32.mrf.mxu0  ;;  %v3445_v33 = vpop.f32.mrf.mxu1 }
 0x6d6   : > { %v3446_v49 = vadd.f32 %v3445_v33, %v6493_v59  ;;  %v6599_v44 = vpack.c.b16 %v3096_v27, %v3095_v56  ;;  %v3001_v55 = vadd.f32 %v6041_v28, %v2977_v0  ;;  %v6910_v59 = vld [vmem:[#allocation89_spill] sm:$0xff]  ;;  %3573 = vmatpush.bf16.msrb.mxu1 %v4461_v29  ;;  %v4711_v16 = vld [vmem:[%s6697_s7 + $0x8] sm:$0xff] }
 0x6d7   : > { %v2910_v38 = vpop.f32.mrf.mxu3 }
 0x6d8   : > { %v2911_v47 = vadd.f32 %v2910_v38, %v2796_v24  ;;  %3489 = vmatmul.bf16.gmra.mxu0 %v6599_v44  ;;  %v3021_v53 = vmax.f32 %v3001_v55, 0.0 }
 0x6d9   : > { %3519 = vmatmul.bf16.gmra.mxu1 %v6160_v45 }
 0x6da   : > { %v2958_v58 = vmax.f32 %v6910_v59, %v2911_v47  ;;  %v3041_v60 = vpack.c.bf16 %v3021_v53, %v3021_v53  ;;  %v4710_v59 = vld [vmem:[%s6697_s7] sm:$0xff] }
 0x6dc   : > { %v2978_v10 = vmax.f32 %v2954_v11, %v2958_v58  ;;  %v3097_v5 = vunpack.c.l.b16 %v3041_v60 }
 0x6dd   : > { %v3421_v52 = vpop.f32.mrf.mxu0  ;;  %v6614_v30 = vpop.f32.mrf.mxu1 }
 0x6de   : > { %v3002_v36 = vadd.f32 %v6041_v28, %v2978_v10  ;;  %v4713_v28 = vld [vmem:[%s6697_s7 + $0x18] sm:$0xff] }
 0x6df   : > { %v2913_v32 = vpop.f32.mrf.mxu3  ;;  %3699 = vmatpush.bf16.msrb.mxu2 %v4713_v28 }
 0x6e0   : > { %v3022_v31 = vmax.f32 %v3002_v36, 0.0 }
 0x6e2   : > { %v3042_v14 = vpack.c.bf16 %v3022_v31, %v3022_v31 }
 0x6e4   : > { %v3098_v20 = vunpack.c.l.b16 %v3042_v14 }
 0x6e5   : > { %v3450_v9 = vpop.f32.mrf.mxu1  ;;  %v3470_v41 = vpop.f32.mrf.mxu0 }
 0x6e6   : > { %v3451_v46 = vadd.f32 %v3450_v9, %v6555_v19  ;;  %v6619_v22 = vadd.f32 %v3470_v41, %v6440_v57  ;;  %v3100_v2 = vpack.c.b16 %v3098_v20, %v3097_v5 }
 0x6e7   : > { %v2914_v11 = vpop.f32.mrf.mxu3 }
 0x6e8   : > { %3492 = vmatmul.bf16.gmra.mxu0 %v3100_v2 }
 0x6e9   : > { %3524 = vmatmul.bf16.gmra.mxu1 %v6305_v51 }
 0x6ed   : > { %v6625_v13 = vpop.f32.mrf.mxu0  ;;  %v6634_v7 = vpop.f32.mrf.mxu1 }
 0x6ef   : > { %v2916_v37 = vpop.f32.mrf.mxu3 }
 0x6f5   : > { %v3475_v3 = vpop.f32.mrf.mxu0 }
 0x6f6   : > { %v6628_v26 = vadd.f32 %v3475_v3, %v6476_v48  ;;  %v4712_v48 = vld [vmem:[%s6697_s7 + $0x10] sm:$0xff] }
 0x6f7   : > { %v2917_v19 = vpop.f32.mrf.mxu3  ;;  %3700 = vmatpush.bf16.msrb.mxu2 %v4712_v48 }
 0x6f8   : > { %3539 = vmatmul.bf16.vlgmr.msrb.gmra.mxu0 %v6137_v35  ;;  %v3438_v19 = vadd.f32 %v6459_v1, %v6415_v43 }
 0x6f9   : > { %3527 = vmatmul.bf16.gmra.mxu1 %v6327_v4 }
 0x6fb   : > { %3701 = vmatpush.bf16.msrb.mxu2 %v4711_v16 }
 0x6fd   : > { %v6636_v18 = vpop.f32.mrf.mxu0 }
 0x6ff   : > { %v3423_v57 = vpop.f32.mrf.mxu3  ;;  %3702 = vmatpush.bf16.msrb.mxu2 %v4710_v59 }
 0x700   : > { %v3448_v57 = vadd.f32 %v6614_v30, %v6526_v61 }
 0x707   : > { %v3424_v40 = vpop.f32.mrf.mxu3 }
 0x708   : > { %3544 = vmatmul.bf16.gmra.mxu0 %v6160_v45 }
 0x709   : > { %3574 = vmatmul.bf16.vlgmr.msrb.gmra.mxu1 %v6305_v51 }
 0x715   : > { %v3455_v21 = vpop.f32.mrf.mxu1  ;;  %v3480_v39 = vpop.f32.mrf.mxu0 }
 0x716   : > { %v3481_v6 = vadd.f32 %v3480_v39, %v3446_v49 }
 0x718   : > { %3549 = vmatmul.bf16.gmra.mxu0 %v6305_v51 }
 0x719   : > { %3579 = vmatmul.bf16.gmra.mxu1 %v6327_v4 }
 0x71d   : > { %v3456_v35 = vpop.f32.mrf.mxu1  ;;  %v3482_v45 = vpop.f32.mrf.mxu0 }
 0x71e   : > { %v3473_v35 = vadd.f32 %v6625_v13, %v3438_v19 }
 0x725   : > { %v3485_v42 = vpop.f32.mrf.mxu0 }
 0x726   : > { %v6643_v54 = vadd.f32 %v3485_v42, %v3451_v46  ;;  %v3505_v17 = vpop.f32.mrf.mxu1  ;;  %v3483_v42 = vadd.f32 %v3482_v45, %v3448_v57 }
 0x728   : > { %3554 = vmatmul.bf16.gmra.mxu0 %v6327_v4 }
 0x729   : > { %3584 = vmatmul.bf16.gmra.mxu1 %v6442_v15 }
 0x72b   : > { %v3458_v0 = vpop.f32.mrf.mxu3 }
 0x72d   : > { %v6656_v4 = vpop.f32.mrf.mxu0 }
 0x72e   : > { %v3507_v56 = vpop.f32.mrf.mxu1 }
 0x733   : > { %v3459_v27 = vpop.f32.mrf.mxu3 }
 0x736   : > { %v3510_v62 = vpop.f32.mrf.mxu1 }
 0x738   : > { %3559 = vmatmul.bf16.gmra.mxu0 %v6442_v15 }
 0x739   : > { %3589 = vmatmul.bf16.gmra.mxu1 %v6474_v12 }
 0x73e   : > { %v6649_v51 = vpop.f32.mrf.mxu1 }
 0x746   : > { %v3515_v33 = vpop.f32.mrf.mxu1 }
 0x748   : > { %3562 = vmatmul.bf16.gmra.mxu0 %v6474_v12 }
 0x749   : > { %3594 = vmatmul.bf16.gmra.mxu1 %v6599_v44 }
 0x74e   : > { %v3517_v50 = vpop.f32.mrf.mxu1 }
 0x755   : > { %v3490_v24 = vpop.f32.mrf.mxu0 }
 0x756   : > { %v3520_v49 = vpop.f32.mrf.mxu1 }
 0x759   : > { %3597 = vmatmul.bf16.gmra.mxu1 %v3100_v2 }
 0x75d   : > { %v3491_v15 = vpop.f32.mrf.mxu0 }
 0x75e   : > { %v3522_v38 = vpop.f32.mrf.mxu1 }
 0x765   : > { %v3493_v55 = vpop.f32.mrf.mxu0 }
 0x766   : > { %v3525_v47 = vpop.f32.mrf.mxu1 }
 0x76d   : > { %v3494_v23 = vpop.f32.mrf.mxu0 }
 0x76e   : > { %v3526_v8 = vpop.f32.mrf.mxu1 }
 0x775   : > { %v3540_v12 = vpop.f32.mrf.mxu0 }
 0x776   : > { %v3528_v58 = vpop.f32.mrf.mxu1  ;;  %v3541_v5 = vadd.f32 %v3540_v12, %v3505_v17 }
 0x77d   : > { %v3542_v44 = vpop.f32.mrf.mxu0 }
 0x77e   : > { %v3529_v29 = vpop.f32.mrf.mxu1  ;;  %v3543_v37 = vadd.f32 %v3542_v44, %v3507_v56 }
 0x785   : > { %v3545_v10 = vpop.f32.mrf.mxu0 }
 0x786   : > { %v3575_v53 = vpop.f32.mrf.mxu1  ;;  %v3546_v56 = vadd.f32 %v3545_v10, %v3510_v62  ;;  %v3443_v62 = vadd.f32 %v6569_v63, %v6472_v25 }
 0x787   : > { %v3576_v20 = vadd.f32 %v3575_v53, %v3541_v5 }
 0x788   : > { %v3478_v44 = vadd.f32 %v6636_v18, %v3443_v62  ;;  %v4745_v18 = vld [vmem:[%s6698_s8] ss:$0 sm:$0xff] }
 0x789   : > { %v3601_v11 = vmax.f32 %v6619_v22, %v3576_v20  ;;  %v4744_v22 = vld [vmem:[%s6696_s6] ss:$0 sm:$0xff] }
 0x78d   : > { %v3547_v52 = vpop.f32.mrf.mxu0 }
 0x78e   : > { %v3577_v36 = vpop.f32.mrf.mxu1  ;;  %v3548_v47 = vadd.f32 %v3547_v52, %v6649_v51 }
 0x78f   : > { %v3578_v40 = vadd.f32 %v3577_v36, %v3543_v37 }
 0x791   : > { %v3602_v17 = vmax.f32 %v3473_v35, %v3578_v40 }
 0x795   : > { %v3550_v32 = vpop.f32.mrf.mxu0 }
 0x796   : > { %v3580_v31 = vpop.f32.mrf.mxu1  ;;  %v3551_v9 = vadd.f32 %v3550_v32, %v3515_v33 }
 0x797   : > { %v3581_v1 = vadd.f32 %v3580_v31, %v3546_v56 }
 0x799   : > { %v3603_v13 = vmax.f32 %v6628_v26, %v3581_v1 }
 0x79d   : > { %v3552_v60 = vpop.f32.mrf.mxu0 }
 0x79e   : > { %v3582_v14 = vpop.f32.mrf.mxu1  ;;  %v3553_v21 = vadd.f32 %v3552_v60, %v3517_v50 }
 0x79f   : > { %v3583_v8 = vadd.f32 %v3582_v14, %v3548_v47 }
 0x7a5   : > { %v3555_v41 = vpop.f32.mrf.mxu0 }
 0x7a6   : > { %v3585_v46 = vpop.f32.mrf.mxu1  ;;  %v3556_v16 = vadd.f32 %v3555_v41, %v3520_v49  ;;  %v3453_v49 = vadd.f32 %v6634_v7, %v6567_v34 }
 0x7a7   : > { %v3586_v2 = vadd.f32 %v3585_v46, %v3551_v9 }
 0x7a8   : > { %v3488_v26 = vadd.f32 %v6656_v4, %v3453_v49 }
 0x7a9   : > { %v3605_v28 = vmax.f32 %v3481_v6, %v3586_v2 }
 0x7ab   : > { %v3609_v3 = vmax.f32 %v3601_v11, %v3605_v28 }
 0x7ad   : > { %v3557_v39 = vpop.f32.mrf.mxu0  ;;  %v3617_v27 = vadd.f32 %v4744_v22, %v3609_v3 }
 0x7ae   : > { %v3587_v48 = vpop.f32.mrf.mxu1  ;;  %v3558_v59 = vadd.f32 %v3557_v39, %v3522_v38 }
 0x7af   : > { %v3588_v6 = vadd.f32 %v3587_v48, %v3553_v21  ;;  %v3621_v50 = vmax.f32 %v3617_v27, 0.0 }
 0x7b1   : > { %v3606_v0 = vmax.f32 %v3483_v42, %v3588_v6 }
 0x7b3   : > { %v3610_v43 = vmax.f32 %v3602_v17, %v3606_v0 }
 0x7b5   : > { %v3618_v61 = vadd.f32 %v4744_v22, %v3610_v43  ;;  %v3560_v30 = vpop.f32.mrf.mxu0 }
 0x7b6   : > { %v3590_v33 = vpop.f32.mrf.mxu1 }
 0x7b7   : > { %v3622_v24 = vmax.f32 %v3618_v61, 0.0  ;;  %v3591_v15 = vadd.f32 %v3590_v33, %v3556_v16 }
 0x7b9   : > { %v3625_v45 = vpack.c.bf16 %v3622_v24, %v3621_v50  ;;  %v3607_v55 = vmax.f32 %v6643_v54, %v3591_v15  ;;  %v3604_v54 = vmax.f32 %v3478_v44, %v3583_v8 }
 0x7bb   : > { %v3611_v23 = vmax.f32 %v3603_v13, %v3607_v55  ;;  %3703 = vmatmul.bf16.vlgmr.msrb.gmra.mxu2 %v3625_v45 }
 0x7bd   : > { %v3561_v12 = vpop.f32.mrf.mxu0  ;;  %v3619_v53 = vadd.f32 %v4744_v22, %v3611_v23 }
 0x7be   : > { %v3592_v58 = vpop.f32.mrf.mxu1 }
 0x7bf   : > { %v3593_v29 = vadd.f32 %v3592_v58, %v3558_v59  ;;  %v3623_v63 = vmax.f32 %v3619_v53, 0.0 }
 0x7c1   : > { %v3608_v51 = vmax.f32 %v3488_v26, %v3593_v29 }
 0x7c3   : > { %v3612_v10 = vmax.f32 %v3604_v54, %v3608_v51 }
 0x7c5   : > { %v3563_v52 = vpop.f32.mrf.mxu0  ;;  %v3620_v36 = vadd.f32 %v4744_v22, %v3612_v10 }
 0x7c6   : > { %v3595_v25 = vpop.f32.mrf.mxu1 }
 0x7c7   : > { %v3624_v32 = vmax.f32 %v3620_v36, 0.0 }
 0x7c9   : > { %v3626_v34 = vpack.c.bf16 %v3624_v32, %v3623_v63 }
 0x7cb   : > { %3708 = vmatmul.bf16.gmra.mxu2 %v3626_v34 }
 0x7cd   : > { %v3564_v7 = vpop.f32.mrf.mxu0 }
 0x7ce   : > { %v3596_v38 = vpop.f32.mrf.mxu1 }
 0x7d6   : > { %v3598_v31 = vpop.f32.mrf.mxu1 }
 0x7de   : > { %v3599_v60 = vpop.f32.mrf.mxu1 }
 0x83e   : > { %v3704_v4 = vpop.f32.mrf.mxu2 }
 0x83f   : > { %v3705_v14 = vadd.f32 %v4745_v18, %v3704_v4 }
 0x841   : > { %3714 = vst [vmem:[%s334_s28] sm:$0xff] %v3705_v14 }
 0x846   : > { %v3706_v5 = vpop.f32.mrf.mxu2 }
 0x847   : > { %v3707_v20 = vadd.f32 %v4745_v18, %v3706_v5 }
 0x849   : > { %3715 = vst [vmem:[%s334_s28 + $0x8] sm:$0xff] %v3707_v20 }
 0x84e   : > { %v3709_v9 = vpop.f32.mrf.mxu2 }
 0x84f   : > { %v3710_v41 = vadd.f32 %v4745_v18, %v3709_v9 }
 0x851   : > { %3716 = vst [vmem:[%s334_s28 + $0x10] sm:$0xff] %v3710_v41 }
 0x856   : > { %v3711_v46 = vpop.f32.mrf.mxu2 }
 0x857   : > { %v3712_v2 = vadd.f32 %v4745_v18, %v3711_v46 }
 0x859   : > { %3717 = vst [vmem:[%s334_s28 + $0x18] sm:$0xff] %v3712_v2 }
 0x85a PF: > { %s19_s30 = sadd.s32 1, %s4754_s30  }
 0x85b   : > { %p16_p5 = scmp.ge.s32.totalorder %s19_s30, 4  }
 0x85d   :  { %18 = sbr.rel (!%p16_p5) target bundleno = 1 (0x1), region = 86 }

</bundles_post_ra>
